<compile_context>
chip_gen: v6e
topology: v6e:2x2x1
jax: 0.10.0
libtpu: 0.0.40
codegen_flags: <defaults>
</compile_context>

<pallas_src>
import numpy as np

import jax
import jax.numpy as jnp
from jax.experimental import pallas as pl
from jax.experimental.pallas import tpu as pltpu

F32 = jnp.float32
BF16 = jnp.bfloat16
WPAD = 32            # lane width of the packed weight buffer (>= max C_in = 24)


def _align8(n):
    return ((n + 7) // 8) * 8


# ------------------------------ in-kernel helpers ------------------------------
# These operate on VMEM-resident jnp values (C <= 24, L <= 768) inside the
# single fused kernel; weight/bias loads are lazy slices of the packed refs.

def _pad_lanes(x, pad_l, pad_r):
    parts = []
    if pad_l:
        parts.append(jnp.zeros((x.shape[0], pad_l), x.dtype))
    parts.append(x)
    if pad_r:
        parts.append(jnp.zeros((x.shape[0], pad_r), x.dtype))
    return jnp.concatenate(parts, axis=-1) if len(parts) > 1 else x


def _conv_acc(x, wref, m, pad_l, pad_r):
    """Conv1d as K accumulated MXU matmuls (no tap concat); returns f32 pre-bias."""
    k, cin, cout, rpt, woff = m["k"], m["cin"], m["cout"], m["rpt"], m["woff"]
    xp = _pad_lanes(x.astype(BF16), pad_l, pad_r)
    lo = xp.shape[1] - k + 1
    acc = None
    for j in range(k):
        wj = wref[woff + j * rpt: woff + j * rpt + cout, 0:cin]       # bf16, lazy
        t = jnp.dot(wj, xp[:, j:j + lo], preferred_element_type=F32)
        acc = t if acc is None else acc + t
    return acc                                                        # (cout, lo)


def _bias_act(acc, bref, m, relu=True):
    y = acc + bref[m["boff"]:m["boff"] + m["cout"], :]
    return jnp.maximum(y, 0.0) if relu else y


def _conv(x, wref, bref, m, *, pad_l, pad_r, relu=True):
    return _bias_act(_conv_acc(x, wref, m, pad_l, pad_r), bref, m, relu=relu)


def _fc(v, wref, bref, m):
    w = wref[m["woff"]:m["woff"] + m["cout"], 0:m["cin"]]
    y = jnp.dot(w, v.astype(BF16), preferred_element_type=F32)
    return y + bref[m["boff"]:m["boff"] + m["cout"], :]


def _res_block(x, wref, bref, m):
    k = m["conv1"]["k"]
    p_l = (k - 1) // 2
    p_r = k - 1 - p_l
    h = _conv(x, wref, bref, m["conv1"], pad_l=p_l, pad_r=p_r)
    h = _conv(h, wref, bref, m["conv2"], pad_l=p_l, pad_r=p_r)
    pooled = jnp.mean(h, axis=-1, keepdims=True)                      # (C, 1)
    z = jnp.maximum(_fc(pooled, wref, bref, m["se1"]), 0.0)
    z = _fc(z, wref, bref, m["se2"])
    gate = 1.0 / (1.0 + jnp.exp(-z))                                  # exact sigmoid
    return x + h * gate


def _pool_sum(x, k, pad):
    """Stride-1 windowed sum for avg_pool1d (count_include_pad=True)."""
    xp = _pad_lanes(x, pad, pad)
    lo = xp.shape[1] - k + 1
    acc = xp[:, 0:lo]
    for j in range(1, k):
        acc = acc + xp[:, j:j + lo]
    return acc


# ------------------------------- fused kernel ----------------------------------

def _make_kernel(meta, geom, n_up):
    n_down = len(geom)

    def kernel(x_ref, wref, bref, *refs):
        urefs = refs[:n_up]
        selrefs = refs[n_up:n_up + n_down]
        o_ref = refs[-1]

        x_in = x_ref[0]                                               # (C_in, L) f32

        m0 = meta["init"]
        p0 = (m0["k"] - 1) // 2
        h = _conv(x_in, wref, bref, m0, pad_l=p0, pad_r=m0["k"] - 1 - p0)

        x_avg = x_in
        skips = []
        for i in range(n_down):
            g = geom[i]
            stg = meta["down"][i]
            mc = stg["conv"]
            acc = _conv_acc(h, wref, mc, g["pad"], g["pad"])          # (C_out, l_s1)
            sel = selrefs[i][...]                                     # (l_s1, l_out) bf16
            if i < n_down - 1:
                # One shared stride-2 selection matmul for conv + avg-pool.
                pool = _pool_sum(x_avg, g["k"], g["pad"]) * (1.0 / g["k"])
                stacked = jnp.concatenate([acc, pool], axis=0).astype(BF16)
                sub = jnp.dot(stacked, sel, preferred_element_type=F32)
                h = _bias_act(sub[:mc["cout"]], bref, mc)
                x_avg = sub[mc["cout"]:]
                for blk in stg["res"]:
                    h = _res_block(h, wref, bref, blk)
                skips.append(h)
                h = jnp.concatenate([h, x_avg], axis=0)
            else:
                sub = jnp.dot(acc.astype(BF16), sel, preferred_element_type=F32)
                h = _bias_act(sub, bref, mc)
                for blk in stg["res"]:
                    h = _res_block(h, wref, bref, blk)

        for i in range(n_up):
            mu = meta["up"][i]
            pu = (mu["k"] - 1) // 2
            # linear 2x upsample (align_corners=False) as a right matmul
            h = jnp.dot(h.astype(BF16), urefs[i][...], preferred_element_type=F32)
            h = jnp.concatenate([h, skips[-i - 1]], axis=0)
            h = _conv(h, wref, bref, mu, pad_l=pu, pad_r=mu["k"] - 1 - pu)

        mo = meta["out"]
        po = (mo["k"] - 1) // 2
        # Full lane-dense pre-crop output; crop happens in the wrapper.
        o_ref[0] = _conv(h, wref, bref, mo, pad_l=po, pad_r=mo["k"] - 1 - po,
                         relu=False)

    return kernel


def unet1d_forward(buffers, meta, geom, x):
    b, c_in, length = x.shape
    n_down = len(geom)
    n_up = n_down - 1
    l_head = geom[0]["l_out"]

    operands = [x, buffers["wbuf"], buffers["bbuf"],
                *buffers["umats"], *buffers["sels"]]

    def _whole(a):
        return pl.BlockSpec(a.shape, lambda i: (0,) * a.ndim)

    in_specs = [pl.BlockSpec((1, c_in, length), lambda i: (i, 0, 0))]
    in_specs += [_whole(a) for a in operands[1:]]

    out = pl.pallas_call(
        _make_kernel(meta, geom, n_up),
        out_shape=jax.ShapeDtypeStruct((b, 1, l_head), F32),
        grid=(b,),
        in_specs=in_specs,
        out_specs=pl.BlockSpec((1, 1, l_head), lambda i: (i, 0, 0)),
        compiler_params=pltpu.CompilerParams(
            dimension_semantics=("parallel",)),
    )(*operands)
    return out[:, 0, 180:-180]


# -------------------------- parameter init / packing ---------------------------

class _Packer:
    """Packs all conv/SE weights into one bf16 (rows, WPAD) buffer (tap-major,
    8-aligned row blocks) and all biases into one f32 (rows, 1) buffer."""

    def __init__(self):
        self.wblocks, self.bblocks = [], []
        self.wrow = 0
        self.brow = 0

    def add(self, w, b):
        c_out, c_in, k = w.shape
        assert c_in <= WPAD
        rpt = _align8(c_out)
        meta = dict(woff=self.wrow, boff=self.brow,
                    cout=c_out, cin=c_in, k=k, rpt=rpt)
        for j in range(k):
            blk = np.zeros((rpt, WPAD), np.float32)
            blk[:c_out, :c_in] = w[:, :, j]
            self.wblocks.append(blk)
        self.wrow += k * rpt
        bb = np.zeros((_align8(c_out), 1), np.float32)
        bb[:c_out, 0] = b
        self.bblocks.append(bb)
        self.brow += _align8(c_out)
        return meta

    def finalize(self):
        wbuf = jnp.asarray(np.concatenate(self.wblocks, axis=0), dtype=BF16)
        bbuf = jnp.asarray(np.concatenate(self.bblocks, axis=0), dtype=F32)
        return wbuf, bbuf


def _conv_bn_params(rng, c_in, c_out, k, groups=1, bn=True):
    """Conv1d init (+eval-mode BatchNorm folded into w, b). Returns dense (C_out, C_in, K)."""
    cin_g = c_in // groups
    bound = 1.0 / np.sqrt(cin_g * k)
    w = rng.uniform(-bound, bound, size=(c_out, cin_g, k)).astype(np.float32)
    b = rng.uniform(-bound, bound, size=(c_out,)).astype(np.float32)
    if groups > 1:                       # grouped conv -> exact block-diagonal dense
        out_g = c_out // groups
        wd = np.zeros((c_out, c_in, k), np.float32)
        for g in range(groups):
            wd[g * out_g:(g + 1) * out_g, g * cin_g:(g + 1) * cin_g, :] = \
                w[g * out_g:(g + 1) * out_g]
        w = wd
    if bn:
        gamma = (1.0 + 0.1 * rng.standard_normal(c_out)).astype(np.float32)
        beta = (0.1 * rng.standard_normal(c_out)).astype(np.float32)
        mean = (0.1 * rng.standard_normal(c_out)).astype(np.float32)
        var = (0.5 + rng.uniform(0.0, 1.0, c_out)).astype(np.float32)
        scale = gamma / np.sqrt(var + 1e-5)
        w = w * scale[:, None, None]
        b = beta + (b - mean) * scale
    return w.astype(np.float32), b.astype(np.float32)


def _sel_matrix(l_in, l_out, stride):
    """Even-column selection: y_out = y_stride1 @ sel."""
    s = np.zeros((l_in, l_out), np.float32)
    for o in range(l_out):
        s[stride * o, o] = 1.0
    return s


def _upsample_matrix(l_in, scale):
    """F.interpolate(mode='linear', align_corners=False) as a right matmul."""
    l_out = l_in * scale
    u = np.zeros((l_in, l_out), np.float32)
    for j in range(l_out):
        src = max((j + 0.5) / scale - 0.5, 0.0)
        i0 = int(np.floor(src))
        i1 = min(i0 + 1, l_in - 1)
        lam = src - i0
        u[i0, j] += 1.0 - lam
        u[i1, j] += lam
    return u


def init_unet1d(cfg, length, seed=0):
    rng = np.random.default_rng(seed)
    pk = _Packer()
    n_down = len(cfg["down_channels"])

    meta = {"init": pk.add(*_conv_bn_params(
        rng, cfg["input_channels"], cfg["initial_channels"],
        cfg["initial_kernel_size"], groups=cfg["input_channels"]))}

    geom, down_meta = [], []
    cur = length
    for i in range(n_down):
        in_ch = (cfg["down_channels"][i - 1] + cfg["input_channels"]) if i > 0 \
            else cfg["initial_channels"]
        out_ch = cfg["down_channels"][i]
        kd, st = cfg["down_kernel_size"][i], cfg["down_stride"][i]
        pad = (kd - st) // 2
        stage = {"conv": pk.add(*_conv_bn_params(rng, in_ch, out_ch, kd)), "res": []}
        for _ in range(cfg["res_depth"]):
            cr = out_ch // cfg["se_ratio"]
            stage["res"].append({
                "conv1": pk.add(*_conv_bn_params(rng, out_ch, out_ch,
                                                 cfg["res_kernel_size"])),
                "conv2": pk.add(*_conv_bn_params(rng, out_ch, out_ch,
                                                 cfg["res_kernel_size"])),
                "se1": pk.add(*_conv_bn_params(rng, out_ch, cr, 1, bn=False)),
                "se2": pk.add(*_conv_bn_params(rng, cr, out_ch, 1, bn=False)),
            })
        down_meta.append(stage)
        l_s1 = cur + 2 * pad - kd + 1
        l_out = (cur + 2 * pad - kd) // st + 1
        geom.append(dict(k=kd, stride=st, pad=pad, l_s1=l_s1, l_out=l_out))
        cur = l_out
    meta["down"] = down_meta

    up_meta, umats = [], []
    for i in range(n_down - 1, 0, -1):
        in_ch = cfg["down_channels"][i] + cfg["down_channels"][i - 1]
        up_meta.append(pk.add(*_conv_bn_params(
            rng, in_ch, cfg["down_channels"][i - 1], cfg["down_kernel_size"][i])))
        scale = cfg["down_stride"][i]
        umats.append(jnp.asarray(_upsample_matrix(cur, scale), dtype=BF16))
        cur *= scale
    meta["up"] = up_meta

    meta["out"] = pk.add(*_conv_bn_params(
        rng, cfg["down_channels"][1], 1, cfg["out_kernel_size"], bn=False))

    wbuf, bbuf = pk.finalize()
    sels = [jnp.asarray(_sel_matrix(g["l_s1"], g["l_out"], g["stride"]), dtype=BF16)
            for g in geom]
    buffers = dict(wbuf=wbuf, bbuf=bbuf, umats=umats, sels=sels)
    return buffers, meta, geom


# ------------------------------------- main -------------------------------------

if __name__ == "__main__":
    cfg = dict(
        input_channels=2,
        initial_channels=4,
        initial_kernel_size=5,
        down_channels=[8, 8, 16],
        down_kernel_size=[4, 4, 4],
        down_stride=[2, 2, 2],
        res_depth=1,
        res_kernel_size=3,
        se_ratio=2,
        out_kernel_size=3,
    )
    # The module hard-codes a [180:-180] crop after one stride-2 stage, so L/2
    # must exceed 360; L = 768 is the smallest friendly size.
    B, L = 2, 768

    buffers, meta, geom = init_unet1d(cfg, L, seed=0)
    x = jax.random.normal(jax.random.PRNGKey(0), (B, cfg["input_channels"], L), F32)

    fwd = jax.jit(lambda bufs, xx: unet1d_forward(bufs, meta, geom, xx))
    out = jax.block_until_ready(fwd(buffers, x))

    assert out.shape == (B, L // 2 - 360), out.shape
    assert bool(jnp.all(jnp.isfinite(out)))
    print("KERNEL_OK")
</pallas_src>

<mosaic_0001>
module attributes {stable_mosaic.version = 11 : i64} {
  func.func @kernel(%arg0: i32, %arg1: memref<1x2x768xf32, #tpu.memory_space<vmem>>, %arg2: memref<504x32xbf16, #tpu.memory_space<vmem>>, %arg3: memref<184x1xf32, #tpu.memory_space<vmem>>, %arg4: memref<96x192xbf16, #tpu.memory_space<vmem>>, %arg5: memref<192x384xbf16, #tpu.memory_space<vmem>>, %arg6: memref<767x384xbf16, #tpu.memory_space<vmem>>, %arg7: memref<383x192xbf16, #tpu.memory_space<vmem>>, %arg8: memref<191x96xbf16, #tpu.memory_space<vmem>>, %arg9: memref<1x1x384xf32, #tpu.memory_space<vmem>>) attributes {dimension_semantics = [#tpu.dimension_semantics<parallel>], iteration_bounds = array<i64: 2>, scalar_prefetch = 0 : i64, scratch_operands = 0 : i64, tpu.core_type = #tpu.core_type<tc>, window_params = [{transform_indices = @transform_0, window_bounds = array<i64: 1, 2, 768>}, {pipeline_mode = #tpu.pipeline_mode<synchronous>, transform_indices = @transform_1, window_bounds = array<i64: 504, 32>}, {pipeline_mode = #tpu.pipeline_mode<synchronous>, transform_indices = @transform_2, window_bounds = array<i64: 184, 1>}, {pipeline_mode = #tpu.pipeline_mode<synchronous>, transform_indices = @transform_3, window_bounds = array<i64: 96, 192>}, {pipeline_mode = #tpu.pipeline_mode<synchronous>, transform_indices = @transform_4, window_bounds = array<i64: 192, 384>}, {pipeline_mode = #tpu.pipeline_mode<synchronous>, transform_indices = @transform_5, window_bounds = array<i64: 767, 384>}, {pipeline_mode = #tpu.pipeline_mode<synchronous>, transform_indices = @transform_6, window_bounds = array<i64: 383, 192>}, {pipeline_mode = #tpu.pipeline_mode<synchronous>, transform_indices = @transform_7, window_bounds = array<i64: 191, 96>}, {transform_indices = @transform_8, window_bounds = array<i64: 1, 1, 384>}]} {
    %c0 = arith.constant 0 : index
    %c0_0 = arith.constant 0 : index
    %c0_1 = arith.constant 0 : index
    %0 = vector.load %arg1[%c0, %c0_0, %c0_1] : memref<1x2x768xf32, #tpu.memory_space<vmem>>, vector<1x2x768xf32>
    %1 = vector.shape_cast %0 : vector<1x2x768xf32> to vector<2x768xf32>
    %2 = arith.truncf %1 : vector<2x768xf32> to vector<2x768xbf16>
    %cst = arith.constant 0.000000e+00 : bf16
    %3 = vector.broadcast %cst : bf16 to vector<2x2xbf16>
    %cst_2 = arith.constant 0.000000e+00 : bf16
    %4 = vector.broadcast %cst_2 : bf16 to vector<2x2xbf16>
    %5 = tpu.concatenate %3, %2, %4 in 1 : vector<2x2xbf16>, vector<2x768xbf16>, vector<2x2xbf16> -> vector<2x772xbf16>
    %c0_3 = arith.constant 0 : index
    %c0_4 = arith.constant 0 : index
    %6 = vector.load %arg2[%c0_3, %c0_4] : memref<504x32xbf16, #tpu.memory_space<vmem>>, vector<4x2xbf16>
    %7 = vector.extract_strided_slice %5 {offsets = [0, 0], sizes = [2, 768], strides = [1, 1]} : vector<2x772xbf16> to vector<2x768xbf16>
    %cst_5 = arith.constant dense<0.000000e+00> : vector<4x768xf32>
    %8 = tpu.matmul %6, %7, %cst_5 {dimension_numbers = #tpu.dot_dimension_numbers<[1], [0], [0], [1], [0, 0, 1, 1], [], []>} : vector<4x2xbf16>, vector<2x768xbf16>, vector<4x768xf32> -> vector<4x768xf32>
    %c8 = arith.constant 8 : index
    %c0_6 = arith.constant 0 : index
    %9 = vector.load %arg2[%c8, %c0_6] : memref<504x32xbf16, #tpu.memory_space<vmem>>, vector<4x2xbf16>
    %10 = vector.extract_strided_slice %5 {offsets = [0, 1], sizes = [2, 768], strides = [1, 1]} : vector<2x772xbf16> to vector<2x768xbf16>
    %cst_7 = arith.constant dense<0.000000e+00> : vector<4x768xf32>
    %11 = tpu.matmul %9, %10, %cst_7 {dimension_numbers = #tpu.dot_dimension_numbers<[1], [0], [0], [1], [0, 0, 1, 1], [], []>} : vector<4x2xbf16>, vector<2x768xbf16>, vector<4x768xf32> -> vector<4x768xf32>
    %12 = arith.addf %8, %11 : vector<4x768xf32>
    %c16 = arith.constant 16 : index
    %c0_8 = arith.constant 0 : index
    %13 = vector.load %arg2[%c16, %c0_8] : memref<504x32xbf16, #tpu.memory_space<vmem>>, vector<4x2xbf16>
    %14 = vector.extract_strided_slice %5 {offsets = [0, 2], sizes = [2, 768], strides = [1, 1]} : vector<2x772xbf16> to vector<2x768xbf16>
    %cst_9 = arith.constant dense<0.000000e+00> : vector<4x768xf32>
    %15 = tpu.matmul %13, %14, %cst_9 {dimension_numbers = #tpu.dot_dimension_numbers<[1], [0], [0], [1], [0, 0, 1, 1], [], []>} : vector<4x2xbf16>, vector<2x768xbf16>, vector<4x768xf32> -> vector<4x768xf32>
    %16 = arith.addf %12, %15 : vector<4x768xf32>
    %c24 = arith.constant 24 : index
    %c0_10 = arith.constant 0 : index
    %17 = vector.load %arg2[%c24, %c0_10] : memref<504x32xbf16, #tpu.memory_space<vmem>>, vector<4x2xbf16>
    %18 = vector.extract_strided_slice %5 {offsets = [0, 3], sizes = [2, 768], strides = [1, 1]} : vector<2x772xbf16> to vector<2x768xbf16>
    %cst_11 = arith.constant dense<0.000000e+00> : vector<4x768xf32>
    %19 = tpu.matmul %17, %18, %cst_11 {dimension_numbers = #tpu.dot_dimension_numbers<[1], [0], [0], [1], [0, 0, 1, 1], [], []>} : vector<4x2xbf16>, vector<2x768xbf16>, vector<4x768xf32> -> vector<4x768xf32>
    %20 = arith.addf %16, %19 : vector<4x768xf32>
    %c32 = arith.constant 32 : index
    %c0_12 = arith.constant 0 : index
    %21 = vector.load %arg2[%c32, %c0_12] : memref<504x32xbf16, #tpu.memory_space<vmem>>, vector<4x2xbf16>
    %22 = vector.extract_strided_slice %5 {offsets = [0, 4], sizes = [2, 768], strides = [1, 1]} : vector<2x772xbf16> to vector<2x768xbf16>
    %cst_13 = arith.constant dense<0.000000e+00> : vector<4x768xf32>
    %23 = tpu.matmul %21, %22, %cst_13 {dimension_numbers = #tpu.dot_dimension_numbers<[1], [0], [0], [1], [0, 0, 1, 1], [], []>} : vector<4x2xbf16>, vector<2x768xbf16>, vector<4x768xf32> -> vector<4x768xf32>
    %24 = arith.addf %20, %23 : vector<4x768xf32>
    %c0_14 = arith.constant 0 : index
    %c0_15 = arith.constant 0 : index
    %25 = vector.load %arg3[%c0_14, %c0_15] : memref<184x1xf32, #tpu.memory_space<vmem>>, vector<4x1xf32>
    %26 = vector.broadcast %25 : vector<4x1xf32> to vector<4x768xf32>
    %27 = arith.addf %24, %26 : vector<4x768xf32>
    %cst_16 = arith.constant 0.000000e+00 : f32
    %28 = vector.broadcast %cst_16 : f32 to vector<4x768xf32>
    %29 = arith.maximumf %27, %28 : vector<4x768xf32>
    %30 = arith.truncf %29 : vector<4x768xf32> to vector<4x768xbf16>
    %cst_17 = arith.constant 0.000000e+00 : bf16
    %31 = vector.broadcast %cst_17 : bf16 to vector<4x1xbf16>
    %cst_18 = arith.constant 0.000000e+00 : bf16
    %32 = vector.broadcast %cst_18 : bf16 to vector<4x1xbf16>
    %33 = tpu.concatenate %31, %30, %32 in 1 : vector<4x1xbf16>, vector<4x768xbf16>, vector<4x1xbf16> -> vector<4x770xbf16>
    %c40 = arith.constant 40 : index
    %c0_19 = arith.constant 0 : index
    %34 = vector.load %arg2[%c40, %c0_19] : memref<504x32xbf16, #tpu.memory_space<vmem>>, vector<8x4xbf16>
    %35 = vector.extract_strided_slice %33 {offsets = [0, 0], sizes = [4, 767], strides = [1, 1]} : vector<4x770xbf16> to vector<4x767xbf16>
    %cst_20 = arith.constant dense<0.000000e+00> : vector<8x767xf32>
    %36 = tpu.matmul %34, %35, %cst_20 {dimension_numbers = #tpu.dot_dimension_numbers<[1], [0], [0], [1], [0, 0, 1, 1], [], []>} : vector<8x4xbf16>, vector<4x767xbf16>, vector<8x767xf32> -> vector<8x767xf32>
    %c48 = arith.constant 48 : index
    %c0_21 = arith.constant 0 : index
    %37 = vector.load %arg2[%c48, %c0_21] : memref<504x32xbf16, #tpu.memory_space<vmem>>, vector<8x4xbf16>
    %38 = vector.extract_strided_slice %33 {offsets = [0, 1], sizes = [4, 767], strides = [1, 1]} : vector<4x770xbf16> to vector<4x767xbf16>
    %cst_22 = arith.constant dense<0.000000e+00> : vector<8x767xf32>
    %39 = tpu.matmul %37, %38, %cst_22 {dimension_numbers = #tpu.dot_dimension_numbers<[1], [0], [0], [1], [0, 0, 1, 1], [], []>} : vector<8x4xbf16>, vector<4x767xbf16>, vector<8x767xf32> -> vector<8x767xf32>
    %40 = arith.addf %36, %39 : vector<8x767xf32>
    %c56 = arith.constant 56 : index
    %c0_23 = arith.constant 0 : index
    %41 = vector.load %arg2[%c56, %c0_23] : memref<504x32xbf16, #tpu.memory_space<vmem>>, vector<8x4xbf16>
    %42 = vector.extract_strided_slice %33 {offsets = [0, 2], sizes = [4, 767], strides = [1, 1]} : vector<4x770xbf16> to vector<4x767xbf16>
    %cst_24 = arith.constant dense<0.000000e+00> : vector<8x767xf32>
    %43 = tpu.matmul %41, %42, %cst_24 {dimension_numbers = #tpu.dot_dimension_numbers<[1], [0], [0], [1], [0, 0, 1, 1], [], []>} : vector<8x4xbf16>, vector<4x767xbf16>, vector<8x767xf32> -> vector<8x767xf32>
    %44 = arith.addf %40, %43 : vector<8x767xf32>
    %c64 = arith.constant 64 : index
    %c0_25 = arith.constant 0 : index
    %45 = vector.load %arg2[%c64, %c0_25] : memref<504x32xbf16, #tpu.memory_space<vmem>>, vector<8x4xbf16>
    %46 = vector.extract_strided_slice %33 {offsets = [0, 3], sizes = [4, 767], strides = [1, 1]} : vector<4x770xbf16> to vector<4x767xbf16>
    %cst_26 = arith.constant dense<0.000000e+00> : vector<8x767xf32>
    %47 = tpu.matmul %45, %46, %cst_26 {dimension_numbers = #tpu.dot_dimension_numbers<[1], [0], [0], [1], [0, 0, 1, 1], [], []>} : vector<8x4xbf16>, vector<4x767xbf16>, vector<8x767xf32> -> vector<8x767xf32>
    %48 = arith.addf %44, %47 : vector<8x767xf32>
    %c0_27 = arith.constant 0 : index
    %c0_28 = arith.constant 0 : index
    %49 = vector.load %arg6[%c0_27, %c0_28] : memref<767x384xbf16, #tpu.memory_space<vmem>>, vector<767x384xbf16>
    %cst_29 = arith.constant 0.000000e+00 : f32
    %50 = vector.broadcast %cst_29 : f32 to vector<2x1xf32>
    %cst_30 = arith.constant 0.000000e+00 : f32
    %51 = vector.broadcast %cst_30 : f32 to vector<2x1xf32>
    %52 = tpu.concatenate %50, %1, %51 in 1 : vector<2x1xf32>, vector<2x768xf32>, vector<2x1xf32> -> vector<2x770xf32>
    %53 = vector.extract_strided_slice %52 {offsets = [0, 0], sizes = [2, 767], strides = [1, 1]} : vector<2x770xf32> to vector<2x767xf32>
    %54 = vector.extract_strided_slice %52 {offsets = [0, 1], sizes = [2, 767], strides = [1, 1]} : vector<2x770xf32> to vector<2x767xf32>
    %55 = arith.addf %53, %54 : vector<2x767xf32>
    %56 = vector.extract_strided_slice %52 {offsets = [0, 2], sizes = [2, 767], strides = [1, 1]} : vector<2x770xf32> to vector<2x767xf32>
    %57 = arith.addf %55, %56 : vector<2x767xf32>
    %58 = vector.extract_strided_slice %52 {offsets = [0, 3], sizes = [2, 767], strides = [1, 1]} : vector<2x770xf32> to vector<2x767xf32>
    %59 = arith.addf %57, %58 : vector<2x767xf32>
    %cst_31 = arith.constant 2.500000e-01 : f32
    %60 = vector.broadcast %cst_31 : f32 to vector<2x767xf32>
    %61 = arith.mulf %59, %60 : vector<2x767xf32>
    %62 = tpu.concatenate %48, %61 in 0 : vector<8x767xf32>, vector<2x767xf32> -> vector<10x767xf32>
    %63 = arith.truncf %62 : vector<10x767xf32> to vector<10x767xbf16>
    %cst_32 = arith.constant dense<0.000000e+00> : vector<10x384xf32>
    %64 = tpu.matmul %63, %49, %cst_32 {dimension_numbers = #tpu.dot_dimension_numbers<[1], [0], [0], [1], [0, 0, 1, 1], [], []>} : vector<10x767xbf16>, vector<767x384xbf16>, vector<10x384xf32> -> vector<10x384xf32>
    %65 = vector.extract_strided_slice %64 {offsets = [0, 0], sizes = [8, 384], strides = [1, 1]} : vector<10x384xf32> to vector<8x384xf32>
    %c8_33 = arith.constant 8 : index
    %c0_34 = arith.constant 0 : index
    %66 = vector.load %arg3[%c8_33, %c0_34] : memref<184x1xf32, #tpu.memory_space<vmem>>, vector<8x1xf32>
    %67 = vector.broadcast %66 : vector<8x1xf32> to vector<8x384xf32>
    %68 = arith.addf %65, %67 : vector<8x384xf32>
    %cst_35 = arith.constant 0.000000e+00 : f32
    %69 = vector.broadcast %cst_35 : f32 to vector<8x384xf32>
    %70 = arith.maximumf %68, %69 : vector<8x384xf32>
    %71 = vector.extract_strided_slice %64 {offsets = [8, 0], sizes = [2, 384], strides = [1, 1]} : vector<10x384xf32> to vector<2x384xf32>
    %72 = arith.truncf %70 : vector<8x384xf32> to vector<8x384xbf16>
    %cst_36 = arith.constant 0.000000e+00 : bf16
    %73 = vector.broadcast %cst_36 : bf16 to vector<8x1xbf16>
    %cst_37 = arith.constant 0.000000e+00 : bf16
    %74 = vector.broadcast %cst_37 : bf16 to vector<8x1xbf16>
    %75 = tpu.concatenate %73, %72, %74 in 1 : vector<8x1xbf16>, vector<8x384xbf16>, vector<8x1xbf16> -> vector<8x386xbf16>
    %c72 = arith.constant 72 : index
    %c0_38 = arith.constant 0 : index
    %76 = vector.load %arg2[%c72, %c0_38] : memref<504x32xbf16, #tpu.memory_space<vmem>>, vector<8x8xbf16>
    %77 = vector.extract_strided_slice %75 {offsets = [0, 0], sizes = [8, 384], strides = [1, 1]} : vector<8x386xbf16> to vector<8x384xbf16>
    %cst_39 = arith.constant dense<0.000000e+00> : vector<8x384xf32>
    %78 = tpu.matmul %76, %77, %cst_39 {dimension_numbers = #tpu.dot_dimension_numbers<[1], [0], [0], [1], [0, 0, 1, 1], [], []>} : vector<8x8xbf16>, vector<8x384xbf16>, vector<8x384xf32> -> vector<8x384xf32>
    %c80 = arith.constant 80 : index
    %c0_40 = arith.constant 0 : index
    %79 = vector.load %arg2[%c80, %c0_40] : memref<504x32xbf16, #tpu.memory_space<vmem>>, vector<8x8xbf16>
    %80 = vector.extract_strided_slice %75 {offsets = [0, 1], sizes = [8, 384], strides = [1, 1]} : vector<8x386xbf16> to vector<8x384xbf16>
    %cst_41 = arith.constant dense<0.000000e+00> : vector<8x384xf32>
    %81 = tpu.matmul %79, %80, %cst_41 {dimension_numbers = #tpu.dot_dimension_numbers<[1], [0], [0], [1], [0, 0, 1, 1], [], []>} : vector<8x8xbf16>, vector<8x384xbf16>, vector<8x384xf32> -> vector<8x384xf32>
    %82 = arith.addf %78, %81 : vector<8x384xf32>
    %c88 = arith.constant 88 : index
    %c0_42 = arith.constant 0 : index
    %83 = vector.load %arg2[%c88, %c0_42] : memref<504x32xbf16, #tpu.memory_space<vmem>>, vector<8x8xbf16>
    %84 = vector.extract_strided_slice %75 {offsets = [0, 2], sizes = [8, 384], strides = [1, 1]} : vector<8x386xbf16> to vector<8x384xbf16>
    %cst_43 = arith.constant dense<0.000000e+00> : vector<8x384xf32>
    %85 = tpu.matmul %83, %84, %cst_43 {dimension_numbers = #tpu.dot_dimension_numbers<[1], [0], [0], [1], [0, 0, 1, 1], [], []>} : vector<8x8xbf16>, vector<8x384xbf16>, vector<8x384xf32> -> vector<8x384xf32>
    %86 = arith.addf %82, %85 : vector<8x384xf32>
    %c16_44 = arith.constant 16 : index
    %c0_45 = arith.constant 0 : index
    %87 = vector.load %arg3[%c16_44, %c0_45] : memref<184x1xf32, #tpu.memory_space<vmem>>, vector<8x1xf32>
    %88 = vector.broadcast %87 : vector<8x1xf32> to vector<8x384xf32>
    %89 = arith.addf %86, %88 : vector<8x384xf32>
    %cst_46 = arith.constant 0.000000e+00 : f32
    %90 = vector.broadcast %cst_46 : f32 to vector<8x384xf32>
    %91 = arith.maximumf %89, %90 : vector<8x384xf32>
    %92 = arith.truncf %91 : vector<8x384xf32> to vector<8x384xbf16>
    %cst_47 = arith.constant 0.000000e+00 : bf16
    %93 = vector.broadcast %cst_47 : bf16 to vector<8x1xbf16>
    %cst_48 = arith.constant 0.000000e+00 : bf16
    %94 = vector.broadcast %cst_48 : bf16 to vector<8x1xbf16>
    %95 = tpu.concatenate %93, %92, %94 in 1 : vector<8x1xbf16>, vector<8x384xbf16>, vector<8x1xbf16> -> vector<8x386xbf16>
    %c96 = arith.constant 96 : index
    %c0_49 = arith.constant 0 : index
    %96 = vector.load %arg2[%c96, %c0_49] : memref<504x32xbf16, #tpu.memory_space<vmem>>, vector<8x8xbf16>
    %97 = vector.extract_strided_slice %95 {offsets = [0, 0], sizes = [8, 384], strides = [1, 1]} : vector<8x386xbf16> to vector<8x384xbf16>
    %cst_50 = arith.constant dense<0.000000e+00> : vector<8x384xf32>
    %98 = tpu.matmul %96, %97, %cst_50 {dimension_numbers = #tpu.dot_dimension_numbers<[1], [0], [0], [1], [0, 0, 1, 1], [], []>} : vector<8x8xbf16>, vector<8x384xbf16>, vector<8x384xf32> -> vector<8x384xf32>
    %c104 = arith.constant 104 : index
    %c0_51 = arith.constant 0 : index
    %99 = vector.load %arg2[%c104, %c0_51] : memref<504x32xbf16, #tpu.memory_space<vmem>>, vector<8x8xbf16>
    %100 = vector.extract_strided_slice %95 {offsets = [0, 1], sizes = [8, 384], strides = [1, 1]} : vector<8x386xbf16> to vector<8x384xbf16>
    %cst_52 = arith.constant dense<0.000000e+00> : vector<8x384xf32>
    %101 = tpu.matmul %99, %100, %cst_52 {dimension_numbers = #tpu.dot_dimension_numbers<[1], [0], [0], [1], [0, 0, 1, 1], [], []>} : vector<8x8xbf16>, vector<8x384xbf16>, vector<8x384xf32> -> vector<8x384xf32>
    %102 = arith.addf %98, %101 : vector<8x384xf32>
    %c112 = arith.constant 112 : index
    %c0_53 = arith.constant 0 : index
    %103 = vector.load %arg2[%c112, %c0_53] : memref<504x32xbf16, #tpu.memory_space<vmem>>, vector<8x8xbf16>
    %104 = vector.extract_strided_slice %95 {offsets = [0, 2], sizes = [8, 384], strides = [1, 1]} : vector<8x386xbf16> to vector<8x384xbf16>
    %cst_54 = arith.constant dense<0.000000e+00> : vector<8x384xf32>
    %105 = tpu.matmul %103, %104, %cst_54 {dimension_numbers = #tpu.dot_dimension_numbers<[1], [0], [0], [1], [0, 0, 1, 1], [], []>} : vector<8x8xbf16>, vector<8x384xbf16>, vector<8x384xf32> -> vector<8x384xf32>
    %106 = arith.addf %102, %105 : vector<8x384xf32>
    %c24_55 = arith.constant 24 : index
    %c0_56 = arith.constant 0 : index
    %107 = vector.load %arg3[%c24_55, %c0_56] : memref<184x1xf32, #tpu.memory_space<vmem>>, vector<8x1xf32>
    %108 = vector.broadcast %107 : vector<8x1xf32> to vector<8x384xf32>
    %109 = arith.addf %106, %108 : vector<8x384xf32>
    %cst_57 = arith.constant 0.000000e+00 : f32
    %110 = vector.broadcast %cst_57 : f32 to vector<8x384xf32>
    %111 = arith.maximumf %109, %110 : vector<8x384xf32>
    %cst_58 = arith.constant dense<0.000000e+00> : vector<8xf32>
    %112 = vector.multi_reduction <add>, %111, %cst_58 [1] : vector<8x384xf32> to vector<8xf32>
    %113 = vector.shape_cast %112 : vector<8xf32> to vector<8x1xf32>
    %cst_59 = arith.constant 3.840000e+02 : f32
    %114 = vector.broadcast %cst_59 : f32 to vector<8x1xf32>
    %115 = arith.divf %113, %114 : vector<8x1xf32>
    %c120 = arith.constant 120 : index
    %c0_60 = arith.constant 0 : index
    %116 = vector.load %arg2[%c120, %c0_60] : memref<504x32xbf16, #tpu.memory_space<vmem>>, vector<4x8xbf16>
    %117 = arith.truncf %115 : vector<8x1xf32> to vector<8x1xbf16>
    %cst_61 = arith.constant dense<0.000000e+00> : vector<4x1xf32>
    %118 = tpu.matmul %116, %117, %cst_61 {dimension_numbers = #tpu.dot_dimension_numbers<[1], [0], [0], [1], [0, 0, 1, 1], [], []>} : vector<4x8xbf16>, vector<8x1xbf16>, vector<4x1xf32> -> vector<4x1xf32>
    %c32_62 = arith.constant 32 : index
    %c0_63 = arith.constant 0 : index
    %119 = vector.load %arg3[%c32_62, %c0_63] : memref<184x1xf32, #tpu.memory_space<vmem>>, vector<4x1xf32>
    %120 = arith.addf %118, %119 : vector<4x1xf32>
    %cst_64 = arith.constant 0.000000e+00 : f32
    %121 = vector.broadcast %cst_64 : f32 to vector<4x1xf32>
    %122 = arith.maximumf %120, %121 : vector<4x1xf32>
    %c128 = arith.constant 128 : index
    %c0_65 = arith.constant 0 : index
    %123 = vector.load %arg2[%c128, %c0_65] : memref<504x32xbf16, #tpu.memory_space<vmem>>, vector<8x4xbf16>
    %124 = arith.truncf %122 : vector<4x1xf32> to vector<4x1xbf16>
    %cst_66 = arith.constant dense<0.000000e+00> : vector<8x1xf32>
    %125 = tpu.matmul %123, %124, %cst_66 {dimension_numbers = #tpu.dot_dimension_numbers<[1], [0], [0], [1], [0, 0, 1, 1], [], []>} : vector<8x4xbf16>, vector<4x1xbf16>, vector<8x1xf32> -> vector<8x1xf32>
    %c40_67 = arith.constant 40 : index
    %c0_68 = arith.constant 0 : index
    %126 = vector.load %arg3[%c40_67, %c0_68] : memref<184x1xf32, #tpu.memory_space<vmem>>, vector<8x1xf32>
    %127 = arith.addf %125, %126 : vector<8x1xf32>
    %cst_69 = arith.constant 0.000000e+00 : f32
    %128 = vector.broadcast %cst_69 : f32 to vector<8x1xf32>
    %129 = arith.subf %128, %127 : vector<8x1xf32>
    %130 = math.exp %129 : vector<8x1xf32>
    %cst_70 = arith.constant 1.000000e+00 : f32
    %131 = vector.broadcast %cst_70 : f32 to vector<8x1xf32>
    %132 = arith.addf %131, %130 : vector<8x1xf32>
    %cst_71 = arith.constant 1.000000e+00 : f32
    %133 = vector.broadcast %cst_71 : f32 to vector<8x1xf32>
    %134 = arith.divf %133, %132 : vector<8x1xf32>
    %135 = vector.broadcast %134 : vector<8x1xf32> to vector<8x384xf32>
    %136 = arith.mulf %111, %135 : vector<8x384xf32>
    %137 = arith.addf %70, %136 : vector<8x384xf32>
    %138 = tpu.concatenate %137, %71 in 0 : vector<8x384xf32>, vector<2x384xf32> -> vector<10x384xf32>
    %139 = arith.truncf %138 : vector<10x384xf32> to vector<10x384xbf16>
    %cst_72 = arith.constant 0.000000e+00 : bf16
    %140 = vector.broadcast %cst_72 : bf16 to vector<10x1xbf16>
    %cst_73 = arith.constant 0.000000e+00 : bf16
    %141 = vector.broadcast %cst_73 : bf16 to vector<10x1xbf16>
    %142 = tpu.concatenate %140, %139, %141 in 1 : vector<10x1xbf16>, vector<10x384xbf16>, vector<10x1xbf16> -> vector<10x386xbf16>
    %c136 = arith.constant 136 : index
    %c0_74 = arith.constant 0 : index
    %143 = vector.load %arg2[%c136, %c0_74] : memref<504x32xbf16, #tpu.memory_space<vmem>>, vector<8x10xbf16>
    %144 = vector.extract_strided_slice %142 {offsets = [0, 0], sizes = [10, 383], strides = [1, 1]} : vector<10x386xbf16> to vector<10x383xbf16>
    %cst_75 = arith.constant dense<0.000000e+00> : vector<8x383xf32>
    %145 = tpu.matmul %143, %144, %cst_75 {dimension_numbers = #tpu.dot_dimension_numbers<[1], [0], [0], [1], [0, 0, 1, 1], [], []>} : vector<8x10xbf16>, vector<10x383xbf16>, vector<8x383xf32> -> vector<8x383xf32>
    %c144 = arith.constant 144 : index
    %c0_76 = arith.constant 0 : index
    %146 = vector.load %arg2[%c144, %c0_76] : memref<504x32xbf16, #tpu.memory_space<vmem>>, vector<8x10xbf16>
    %147 = vector.extract_strided_slice %142 {offsets = [0, 1], sizes = [10, 383], strides = [1, 1]} : vector<10x386xbf16> to vector<10x383xbf16>
    %cst_77 = arith.constant dense<0.000000e+00> : vector<8x383xf32>
    %148 = tpu.matmul %146, %147, %cst_77 {dimension_numbers = #tpu.dot_dimension_numbers<[1], [0], [0], [1], [0, 0, 1, 1], [], []>} : vector<8x10xbf16>, vector<10x383xbf16>, vector<8x383xf32> -> vector<8x383xf32>
    %149 = arith.addf %145, %148 : vector<8x383xf32>
    %c152 = arith.constant 152 : index
    %c0_78 = arith.constant 0 : index
    %150 = vector.load %arg2[%c152, %c0_78] : memref<504x32xbf16, #tpu.memory_space<vmem>>, vector<8x10xbf16>
    %151 = vector.extract_strided_slice %142 {offsets = [0, 2], sizes = [10, 383], strides = [1, 1]} : vector<10x386xbf16> to vector<10x383xbf16>
    %cst_79 = arith.constant dense<0.000000e+00> : vector<8x383xf32>
    %152 = tpu.matmul %150, %151, %cst_79 {dimension_numbers = #tpu.dot_dimension_numbers<[1], [0], [0], [1], [0, 0, 1, 1], [], []>} : vector<8x10xbf16>, vector<10x383xbf16>, vector<8x383xf32> -> vector<8x383xf32>
    %153 = arith.addf %149, %152 : vector<8x383xf32>
    %c160 = arith.constant 160 : index
    %c0_80 = arith.constant 0 : index
    %154 = vector.load %arg2[%c160, %c0_80] : memref<504x32xbf16, #tpu.memory_space<vmem>>, vector<8x10xbf16>
    %155 = vector.extract_strided_slice %142 {offsets = [0, 3], sizes = [10, 383], strides = [1, 1]} : vector<10x386xbf16> to vector<10x383xbf16>
    %cst_81 = arith.constant dense<0.000000e+00> : vector<8x383xf32>
    %156 = tpu.matmul %154, %155, %cst_81 {dimension_numbers = #tpu.dot_dimension_numbers<[1], [0], [0], [1], [0, 0, 1, 1], [], []>} : vector<8x10xbf16>, vector<10x383xbf16>, vector<8x383xf32> -> vector<8x383xf32>
    %157 = arith.addf %153, %156 : vector<8x383xf32>
    %c0_82 = arith.constant 0 : index
    %c0_83 = arith.constant 0 : index
    %158 = vector.load %arg7[%c0_82, %c0_83] : memref<383x192xbf16, #tpu.memory_space<vmem>>, vector<383x192xbf16>
    %cst_84 = arith.constant 0.000000e+00 : f32
    %159 = vector.broadcast %cst_84 : f32 to vector<2x1xf32>
    %cst_85 = arith.constant 0.000000e+00 : f32
    %160 = vector.broadcast %cst_85 : f32 to vector<2x1xf32>
    %161 = tpu.concatenate %159, %71, %160 in 1 : vector<2x1xf32>, vector<2x384xf32>, vector<2x1xf32> -> vector<2x386xf32>
    %162 = vector.extract_strided_slice %161 {offsets = [0, 0], sizes = [2, 383], strides = [1, 1]} : vector<2x386xf32> to vector<2x383xf32>
    %163 = vector.extract_strided_slice %161 {offsets = [0, 1], sizes = [2, 383], strides = [1, 1]} : vector<2x386xf32> to vector<2x383xf32>
    %164 = arith.addf %162, %163 : vector<2x383xf32>
    %165 = vector.extract_strided_slice %161 {offsets = [0, 2], sizes = [2, 383], strides = [1, 1]} : vector<2x386xf32> to vector<2x383xf32>
    %166 = arith.addf %164, %165 : vector<2x383xf32>
    %167 = vector.extract_strided_slice %161 {offsets = [0, 3], sizes = [2, 383], strides = [1, 1]} : vector<2x386xf32> to vector<2x383xf32>
    %168 = arith.addf %166, %167 : vector<2x383xf32>
    %cst_86 = arith.constant 2.500000e-01 : f32
    %169 = vector.broadcast %cst_86 : f32 to vector<2x383xf32>
    %170 = arith.mulf %168, %169 : vector<2x383xf32>
    %171 = tpu.concatenate %157, %170 in 0 : vector<8x383xf32>, vector<2x383xf32> -> vector<10x383xf32>
    %172 = arith.truncf %171 : vector<10x383xf32> to vector<10x383xbf16>
    %cst_87 = arith.constant dense<0.000000e+00> : vector<10x192xf32>
    %173 = tpu.matmul %172, %158, %cst_87 {dimension_numbers = #tpu.dot_dimension_numbers<[1], [0], [0], [1], [0, 0, 1, 1], [], []>} : vector<10x383xbf16>, vector<383x192xbf16>, vector<10x192xf32> -> vector<10x192xf32>
    %174 = vector.extract_strided_slice %173 {offsets = [0, 0], sizes = [8, 192], strides = [1, 1]} : vector<10x192xf32> to vector<8x192xf32>
    %c48_88 = arith.constant 48 : index
    %c0_89 = arith.constant 0 : index
    %175 = vector.load %arg3[%c48_88, %c0_89] : memref<184x1xf32, #tpu.memory_space<vmem>>, vector<8x1xf32>
    %176 = vector.broadcast %175 : vector<8x1xf32> to vector<8x192xf32>
    %177 = arith.addf %174, %176 : vector<8x192xf32>
    %cst_90 = arith.constant 0.000000e+00 : f32
    %178 = vector.broadcast %cst_90 : f32 to vector<8x192xf32>
    %179 = arith.maximumf %177, %178 : vector<8x192xf32>
    %180 = vector.extract_strided_slice %173 {offsets = [8, 0], sizes = [2, 192], strides = [1, 1]} : vector<10x192xf32> to vector<2x192xf32>
    %181 = arith.truncf %179 : vector<8x192xf32> to vector<8x192xbf16>
    %cst_91 = arith.constant 0.000000e+00 : bf16
    %182 = vector.broadcast %cst_91 : bf16 to vector<8x1xbf16>
    %cst_92 = arith.constant 0.000000e+00 : bf16
    %183 = vector.broadcast %cst_92 : bf16 to vector<8x1xbf16>
    %184 = tpu.concatenate %182, %181, %183 in 1 : vector<8x1xbf16>, vector<8x192xbf16>, vector<8x1xbf16> -> vector<8x194xbf16>
    %c168 = arith.constant 168 : index
    %c0_93 = arith.constant 0 : index
    %185 = vector.load %arg2[%c168, %c0_93] : memref<504x32xbf16, #tpu.memory_space<vmem>>, vector<8x8xbf16>
    %186 = vector.extract_strided_slice %184 {offsets = [0, 0], sizes = [8, 192], strides = [1, 1]} : vector<8x194xbf16> to vector<8x192xbf16>
    %cst_94 = arith.constant dense<0.000000e+00> : vector<8x192xf32>
    %187 = tpu.matmul %185, %186, %cst_94 {dimension_numbers = #tpu.dot_dimension_numbers<[1], [0], [0], [1], [0, 0, 1, 1], [], []>} : vector<8x8xbf16>, vector<8x192xbf16>, vector<8x192xf32> -> vector<8x192xf32>
    %c176 = arith.constant 176 : index
    %c0_95 = arith.constant 0 : index
    %188 = vector.load %arg2[%c176, %c0_95] : memref<504x32xbf16, #tpu.memory_space<vmem>>, vector<8x8xbf16>
    %189 = vector.extract_strided_slice %184 {offsets = [0, 1], sizes = [8, 192], strides = [1, 1]} : vector<8x194xbf16> to vector<8x192xbf16>
    %cst_96 = arith.constant dense<0.000000e+00> : vector<8x192xf32>
    %190 = tpu.matmul %188, %189, %cst_96 {dimension_numbers = #tpu.dot_dimension_numbers<[1], [0], [0], [1], [0, 0, 1, 1], [], []>} : vector<8x8xbf16>, vector<8x192xbf16>, vector<8x192xf32> -> vector<8x192xf32>
    %191 = arith.addf %187, %190 : vector<8x192xf32>
    %c184 = arith.constant 184 : index
    %c0_97 = arith.constant 0 : index
    %192 = vector.load %arg2[%c184, %c0_97] : memref<504x32xbf16, #tpu.memory_space<vmem>>, vector<8x8xbf16>
    %193 = vector.extract_strided_slice %184 {offsets = [0, 2], sizes = [8, 192], strides = [1, 1]} : vector<8x194xbf16> to vector<8x192xbf16>
    %cst_98 = arith.constant dense<0.000000e+00> : vector<8x192xf32>
    %194 = tpu.matmul %192, %193, %cst_98 {dimension_numbers = #tpu.dot_dimension_numbers<[1], [0], [0], [1], [0, 0, 1, 1], [], []>} : vector<8x8xbf16>, vector<8x192xbf16>, vector<8x192xf32> -> vector<8x192xf32>
    %195 = arith.addf %191, %194 : vector<8x192xf32>
    %c56_99 = arith.constant 56 : index
    %c0_100 = arith.constant 0 : index
    %196 = vector.load %arg3[%c56_99, %c0_100] : memref<184x1xf32, #tpu.memory_space<vmem>>, vector<8x1xf32>
    %197 = vector.broadcast %196 : vector<8x1xf32> to vector<8x192xf32>
    %198 = arith.addf %195, %197 : vector<8x192xf32>
    %cst_101 = arith.constant 0.000000e+00 : f32
    %199 = vector.broadcast %cst_101 : f32 to vector<8x192xf32>
    %200 = arith.maximumf %198, %199 : vector<8x192xf32>
    %201 = arith.truncf %200 : vector<8x192xf32> to vector<8x192xbf16>
    %cst_102 = arith.constant 0.000000e+00 : bf16
    %202 = vector.broadcast %cst_102 : bf16 to vector<8x1xbf16>
    %cst_103 = arith.constant 0.000000e+00 : bf16
    %203 = vector.broadcast %cst_103 : bf16 to vector<8x1xbf16>
    %204 = tpu.concatenate %202, %201, %203 in 1 : vector<8x1xbf16>, vector<8x192xbf16>, vector<8x1xbf16> -> vector<8x194xbf16>
    %c192 = arith.constant 192 : index
    %c0_104 = arith.constant 0 : index
    %205 = vector.load %arg2[%c192, %c0_104] : memref<504x32xbf16, #tpu.memory_space<vmem>>, vector<8x8xbf16>
    %206 = vector.extract_strided_slice %204 {offsets = [0, 0], sizes = [8, 192], strides = [1, 1]} : vector<8x194xbf16> to vector<8x192xbf16>
    %cst_105 = arith.constant dense<0.000000e+00> : vector<8x192xf32>
    %207 = tpu.matmul %205, %206, %cst_105 {dimension_numbers = #tpu.dot_dimension_numbers<[1], [0], [0], [1], [0, 0, 1, 1], [], []>} : vector<8x8xbf16>, vector<8x192xbf16>, vector<8x192xf32> -> vector<8x192xf32>
    %c200 = arith.constant 200 : index
    %c0_106 = arith.constant 0 : index
    %208 = vector.load %arg2[%c200, %c0_106] : memref<504x32xbf16, #tpu.memory_space<vmem>>, vector<8x8xbf16>
    %209 = vector.extract_strided_slice %204 {offsets = [0, 1], sizes = [8, 192], strides = [1, 1]} : vector<8x194xbf16> to vector<8x192xbf16>
    %cst_107 = arith.constant dense<0.000000e+00> : vector<8x192xf32>
    %210 = tpu.matmul %208, %209, %cst_107 {dimension_numbers = #tpu.dot_dimension_numbers<[1], [0], [0], [1], [0, 0, 1, 1], [], []>} : vector<8x8xbf16>, vector<8x192xbf16>, vector<8x192xf32> -> vector<8x192xf32>
    %211 = arith.addf %207, %210 : vector<8x192xf32>
    %c208 = arith.constant 208 : index
    %c0_108 = arith.constant 0 : index
    %212 = vector.load %arg2[%c208, %c0_108] : memref<504x32xbf16, #tpu.memory_space<vmem>>, vector<8x8xbf16>
    %213 = vector.extract_strided_slice %204 {offsets = [0, 2], sizes = [8, 192], strides = [1, 1]} : vector<8x194xbf16> to vector<8x192xbf16>
    %cst_109 = arith.constant dense<0.000000e+00> : vector<8x192xf32>
    %214 = tpu.matmul %212, %213, %cst_109 {dimension_numbers = #tpu.dot_dimension_numbers<[1], [0], [0], [1], [0, 0, 1, 1], [], []>} : vector<8x8xbf16>, vector<8x192xbf16>, vector<8x192xf32> -> vector<8x192xf32>
    %215 = arith.addf %211, %214 : vector<8x192xf32>
    %c64_110 = arith.constant 64 : index
    %c0_111 = arith.constant 0 : index
    %216 = vector.load %arg3[%c64_110, %c0_111] : memref<184x1xf32, #tpu.memory_space<vmem>>, vector<8x1xf32>
    %217 = vector.broadcast %216 : vector<8x1xf32> to vector<8x192xf32>
    %218 = arith.addf %215, %217 : vector<8x192xf32>
    %cst_112 = arith.constant 0.000000e+00 : f32
    %219 = vector.broadcast %cst_112 : f32 to vector<8x192xf32>
    %220 = arith.maximumf %218, %219 : vector<8x192xf32>
    %cst_113 = arith.constant dense<0.000000e+00> : vector<8xf32>
    %221 = vector.multi_reduction <add>, %220, %cst_113 [1] : vector<8x192xf32> to vector<8xf32>
    %222 = vector.shape_cast %221 : vector<8xf32> to vector<8x1xf32>
    %cst_114 = arith.constant 1.920000e+02 : f32
    %223 = vector.broadcast %cst_114 : f32 to vector<8x1xf32>
    %224 = arith.divf %222, %223 : vector<8x1xf32>
    %c216 = arith.constant 216 : index
    %c0_115 = arith.constant 0 : index
    %225 = vector.load %arg2[%c216, %c0_115] : memref<504x32xbf16, #tpu.memory_space<vmem>>, vector<4x8xbf16>
    %226 = arith.truncf %224 : vector<8x1xf32> to vector<8x1xbf16>
    %cst_116 = arith.constant dense<0.000000e+00> : vector<4x1xf32>
    %227 = tpu.matmul %225, %226, %cst_116 {dimension_numbers = #tpu.dot_dimension_numbers<[1], [0], [0], [1], [0, 0, 1, 1], [], []>} : vector<4x8xbf16>, vector<8x1xbf16>, vector<4x1xf32> -> vector<4x1xf32>
    %c72_117 = arith.constant 72 : index
    %c0_118 = arith.constant 0 : index
    %228 = vector.load %arg3[%c72_117, %c0_118] : memref<184x1xf32, #tpu.memory_space<vmem>>, vector<4x1xf32>
    %229 = arith.addf %227, %228 : vector<4x1xf32>
    %cst_119 = arith.constant 0.000000e+00 : f32
    %230 = vector.broadcast %cst_119 : f32 to vector<4x1xf32>
    %231 = arith.maximumf %229, %230 : vector<4x1xf32>
    %c224 = arith.constant 224 : index
    %c0_120 = arith.constant 0 : index
    %232 = vector.load %arg2[%c224, %c0_120] : memref<504x32xbf16, #tpu.memory_space<vmem>>, vector<8x4xbf16>
    %233 = arith.truncf %231 : vector<4x1xf32> to vector<4x1xbf16>
    %cst_121 = arith.constant dense<0.000000e+00> : vector<8x1xf32>
    %234 = tpu.matmul %232, %233, %cst_121 {dimension_numbers = #tpu.dot_dimension_numbers<[1], [0], [0], [1], [0, 0, 1, 1], [], []>} : vector<8x4xbf16>, vector<4x1xbf16>, vector<8x1xf32> -> vector<8x1xf32>
    %c80_122 = arith.constant 80 : index
    %c0_123 = arith.constant 0 : index
    %235 = vector.load %arg3[%c80_122, %c0_123] : memref<184x1xf32, #tpu.memory_space<vmem>>, vector<8x1xf32>
    %236 = arith.addf %234, %235 : vector<8x1xf32>
    %cst_124 = arith.constant 0.000000e+00 : f32
    %237 = vector.broadcast %cst_124 : f32 to vector<8x1xf32>
    %238 = arith.subf %237, %236 : vector<8x1xf32>
    %239 = math.exp %238 : vector<8x1xf32>
    %cst_125 = arith.constant 1.000000e+00 : f32
    %240 = vector.broadcast %cst_125 : f32 to vector<8x1xf32>
    %241 = arith.addf %240, %239 : vector<8x1xf32>
    %cst_126 = arith.constant 1.000000e+00 : f32
    %242 = vector.broadcast %cst_126 : f32 to vector<8x1xf32>
    %243 = arith.divf %242, %241 : vector<8x1xf32>
    %244 = vector.broadcast %243 : vector<8x1xf32> to vector<8x192xf32>
    %245 = arith.mulf %220, %244 : vector<8x192xf32>
    %246 = arith.addf %179, %245 : vector<8x192xf32>
    %247 = tpu.concatenate %246, %180 in 0 : vector<8x192xf32>, vector<2x192xf32> -> vector<10x192xf32>
    %248 = arith.truncf %247 : vector<10x192xf32> to vector<10x192xbf16>
    %cst_127 = arith.constant 0.000000e+00 : bf16
    %249 = vector.broadcast %cst_127 : bf16 to vector<10x1xbf16>
    %cst_128 = arith.constant 0.000000e+00 : bf16
    %250 = vector.broadcast %cst_128 : bf16 to vector<10x1xbf16>
    %251 = tpu.concatenate %249, %248, %250 in 1 : vector<10x1xbf16>, vector<10x192xbf16>, vector<10x1xbf16> -> vector<10x194xbf16>
    %c232 = arith.constant 232 : index
    %c0_129 = arith.constant 0 : index
    %252 = vector.load %arg2[%c232, %c0_129] : memref<504x32xbf16, #tpu.memory_space<vmem>>, vector<16x10xbf16>
    %253 = vector.extract_strided_slice %251 {offsets = [0, 0], sizes = [10, 191], strides = [1, 1]} : vector<10x194xbf16> to vector<10x191xbf16>
    %cst_130 = arith.constant dense<0.000000e+00> : vector<16x191xf32>
    %254 = tpu.matmul %252, %253, %cst_130 {dimension_numbers = #tpu.dot_dimension_numbers<[1], [0], [0], [1], [0, 0, 1, 1], [], []>} : vector<16x10xbf16>, vector<10x191xbf16>, vector<16x191xf32> -> vector<16x191xf32>
    %c248 = arith.constant 248 : index
    %c0_131 = arith.constant 0 : index
    %255 = vector.load %arg2[%c248, %c0_131] : memref<504x32xbf16, #tpu.memory_space<vmem>>, vector<16x10xbf16>
    %256 = vector.extract_strided_slice %251 {offsets = [0, 1], sizes = [10, 191], strides = [1, 1]} : vector<10x194xbf16> to vector<10x191xbf16>
    %cst_132 = arith.constant dense<0.000000e+00> : vector<16x191xf32>
    %257 = tpu.matmul %255, %256, %cst_132 {dimension_numbers = #tpu.dot_dimension_numbers<[1], [0], [0], [1], [0, 0, 1, 1], [], []>} : vector<16x10xbf16>, vector<10x191xbf16>, vector<16x191xf32> -> vector<16x191xf32>
    %258 = arith.addf %254, %257 : vector<16x191xf32>
    %c264 = arith.constant 264 : index
    %c0_133 = arith.constant 0 : index
    %259 = vector.load %arg2[%c264, %c0_133] : memref<504x32xbf16, #tpu.memory_space<vmem>>, vector<16x10xbf16>
    %260 = vector.extract_strided_slice %251 {offsets = [0, 2], sizes = [10, 191], strides = [1, 1]} : vector<10x194xbf16> to vector<10x191xbf16>
    %cst_134 = arith.constant dense<0.000000e+00> : vector<16x191xf32>
    %261 = tpu.matmul %259, %260, %cst_134 {dimension_numbers = #tpu.dot_dimension_numbers<[1], [0], [0], [1], [0, 0, 1, 1], [], []>} : vector<16x10xbf16>, vector<10x191xbf16>, vector<16x191xf32> -> vector<16x191xf32>
    %262 = arith.addf %258, %261 : vector<16x191xf32>
    %c280 = arith.constant 280 : index
    %c0_135 = arith.constant 0 : index
    %263 = vector.load %arg2[%c280, %c0_135] : memref<504x32xbf16, #tpu.memory_space<vmem>>, vector<16x10xbf16>
    %264 = vector.extract_strided_slice %251 {offsets = [0, 3], sizes = [10, 191], strides = [1, 1]} : vector<10x194xbf16> to vector<10x191xbf16>
    %cst_136 = arith.constant dense<0.000000e+00> : vector<16x191xf32>
    %265 = tpu.matmul %263, %264, %cst_136 {dimension_numbers = #tpu.dot_dimension_numbers<[1], [0], [0], [1], [0, 0, 1, 1], [], []>} : vector<16x10xbf16>, vector<10x191xbf16>, vector<16x191xf32> -> vector<16x191xf32>
    %266 = arith.addf %262, %265 : vector<16x191xf32>
    %c0_137 = arith.constant 0 : index
    %c0_138 = arith.constant 0 : index
    %267 = vector.load %arg8[%c0_137, %c0_138] : memref<191x96xbf16, #tpu.memory_space<vmem>>, vector<191x96xbf16>
    %268 = arith.truncf %266 : vector<16x191xf32> to vector<16x191xbf16>
    %cst_139 = arith.constant dense<0.000000e+00> : vector<16x96xf32>
    %269 = tpu.matmul %268, %267, %cst_139 {dimension_numbers = #tpu.dot_dimension_numbers<[1], [0], [0], [1], [0, 0, 1, 1], [], []>} : vector<16x191xbf16>, vector<191x96xbf16>, vector<16x96xf32> -> vector<16x96xf32>
    %c88_140 = arith.constant 88 : index
    %c0_141 = arith.constant 0 : index
    %270 = vector.load %arg3[%c88_140, %c0_141] : memref<184x1xf32, #tpu.memory_space<vmem>>, vector<16x1xf32>
    %271 = vector.broadcast %270 : vector<16x1xf32> to vector<16x96xf32>
    %272 = arith.addf %269, %271 : vector<16x96xf32>
    %cst_142 = arith.constant 0.000000e+00 : f32
    %273 = vector.broadcast %cst_142 : f32 to vector<16x96xf32>
    %274 = arith.maximumf %272, %273 : vector<16x96xf32>
    %275 = arith.truncf %274 : vector<16x96xf32> to vector<16x96xbf16>
    %cst_143 = arith.constant 0.000000e+00 : bf16
    %276 = vector.broadcast %cst_143 : bf16 to vector<16x1xbf16>
    %cst_144 = arith.constant 0.000000e+00 : bf16
    %277 = vector.broadcast %cst_144 : bf16 to vector<16x1xbf16>
    %278 = tpu.concatenate %276, %275, %277 in 1 : vector<16x1xbf16>, vector<16x96xbf16>, vector<16x1xbf16> -> vector<16x98xbf16>
    %c296 = arith.constant 296 : index
    %c0_145 = arith.constant 0 : index
    %279 = vector.load %arg2[%c296, %c0_145] : memref<504x32xbf16, #tpu.memory_space<vmem>>, vector<16x16xbf16>
    %280 = vector.extract_strided_slice %278 {offsets = [0, 0], sizes = [16, 96], strides = [1, 1]} : vector<16x98xbf16> to vector<16x96xbf16>
    %cst_146 = arith.constant dense<0.000000e+00> : vector<16x96xf32>
    %281 = tpu.matmul %279, %280, %cst_146 {dimension_numbers = #tpu.dot_dimension_numbers<[1], [0], [0], [1], [0, 0, 1, 1], [], []>} : vector<16x16xbf16>, vector<16x96xbf16>, vector<16x96xf32> -> vector<16x96xf32>
    %c312 = arith.constant 312 : index
    %c0_147 = arith.constant 0 : index
    %282 = vector.load %arg2[%c312, %c0_147] : memref<504x32xbf16, #tpu.memory_space<vmem>>, vector<16x16xbf16>
    %283 = vector.extract_strided_slice %278 {offsets = [0, 1], sizes = [16, 96], strides = [1, 1]} : vector<16x98xbf16> to vector<16x96xbf16>
    %cst_148 = arith.constant dense<0.000000e+00> : vector<16x96xf32>
    %284 = tpu.matmul %282, %283, %cst_148 {dimension_numbers = #tpu.dot_dimension_numbers<[1], [0], [0], [1], [0, 0, 1, 1], [], []>} : vector<16x16xbf16>, vector<16x96xbf16>, vector<16x96xf32> -> vector<16x96xf32>
    %285 = arith.addf %281, %284 : vector<16x96xf32>
    %c328 = arith.constant 328 : index
    %c0_149 = arith.constant 0 : index
    %286 = vector.load %arg2[%c328, %c0_149] : memref<504x32xbf16, #tpu.memory_space<vmem>>, vector<16x16xbf16>
    %287 = vector.extract_strided_slice %278 {offsets = [0, 2], sizes = [16, 96], strides = [1, 1]} : vector<16x98xbf16> to vector<16x96xbf16>
    %cst_150 = arith.constant dense<0.000000e+00> : vector<16x96xf32>
    %288 = tpu.matmul %286, %287, %cst_150 {dimension_numbers = #tpu.dot_dimension_numbers<[1], [0], [0], [1], [0, 0, 1, 1], [], []>} : vector<16x16xbf16>, vector<16x96xbf16>, vector<16x96xf32> -> vector<16x96xf32>
    %289 = arith.addf %285, %288 : vector<16x96xf32>
    %c104_151 = arith.constant 104 : index
    %c0_152 = arith.constant 0 : index
    %290 = vector.load %arg3[%c104_151, %c0_152] : memref<184x1xf32, #tpu.memory_space<vmem>>, vector<16x1xf32>
    %291 = vector.broadcast %290 : vector<16x1xf32> to vector<16x96xf32>
    %292 = arith.addf %289, %291 : vector<16x96xf32>
    %cst_153 = arith.constant 0.000000e+00 : f32
    %293 = vector.broadcast %cst_153 : f32 to vector<16x96xf32>
    %294 = arith.maximumf %292, %293 : vector<16x96xf32>
    %295 = arith.truncf %294 : vector<16x96xf32> to vector<16x96xbf16>
    %cst_154 = arith.constant 0.000000e+00 : bf16
    %296 = vector.broadcast %cst_154 : bf16 to vector<16x1xbf16>
    %cst_155 = arith.constant 0.000000e+00 : bf16
    %297 = vector.broadcast %cst_155 : bf16 to vector<16x1xbf16>
    %298 = tpu.concatenate %296, %295, %297 in 1 : vector<16x1xbf16>, vector<16x96xbf16>, vector<16x1xbf16> -> vector<16x98xbf16>
    %c344 = arith.constant 344 : index
    %c0_156 = arith.constant 0 : index
    %299 = vector.load %arg2[%c344, %c0_156] : memref<504x32xbf16, #tpu.memory_space<vmem>>, vector<16x16xbf16>
    %300 = vector.extract_strided_slice %298 {offsets = [0, 0], sizes = [16, 96], strides = [1, 1]} : vector<16x98xbf16> to vector<16x96xbf16>
    %cst_157 = arith.constant dense<0.000000e+00> : vector<16x96xf32>
    %301 = tpu.matmul %299, %300, %cst_157 {dimension_numbers = #tpu.dot_dimension_numbers<[1], [0], [0], [1], [0, 0, 1, 1], [], []>} : vector<16x16xbf16>, vector<16x96xbf16>, vector<16x96xf32> -> vector<16x96xf32>
    %c360 = arith.constant 360 : index
    %c0_158 = arith.constant 0 : index
    %302 = vector.load %arg2[%c360, %c0_158] : memref<504x32xbf16, #tpu.memory_space<vmem>>, vector<16x16xbf16>
    %303 = vector.extract_strided_slice %298 {offsets = [0, 1], sizes = [16, 96], strides = [1, 1]} : vector<16x98xbf16> to vector<16x96xbf16>
    %cst_159 = arith.constant dense<0.000000e+00> : vector<16x96xf32>
    %304 = tpu.matmul %302, %303, %cst_159 {dimension_numbers = #tpu.dot_dimension_numbers<[1], [0], [0], [1], [0, 0, 1, 1], [], []>} : vector<16x16xbf16>, vector<16x96xbf16>, vector<16x96xf32> -> vector<16x96xf32>
    %305 = arith.addf %301, %304 : vector<16x96xf32>
    %c376 = arith.constant 376 : index
    %c0_160 = arith.constant 0 : index
    %306 = vector.load %arg2[%c376, %c0_160] : memref<504x32xbf16, #tpu.memory_space<vmem>>, vector<16x16xbf16>
    %307 = vector.extract_strided_slice %298 {offsets = [0, 2], sizes = [16, 96], strides = [1, 1]} : vector<16x98xbf16> to vector<16x96xbf16>
    %cst_161 = arith.constant dense<0.000000e+00> : vector<16x96xf32>
    %308 = tpu.matmul %306, %307, %cst_161 {dimension_numbers = #tpu.dot_dimension_numbers<[1], [0], [0], [1], [0, 0, 1, 1], [], []>} : vector<16x16xbf16>, vector<16x96xbf16>, vector<16x96xf32> -> vector<16x96xf32>
    %309 = arith.addf %305, %308 : vector<16x96xf32>
    %c120_162 = arith.constant 120 : index
    %c0_163 = arith.constant 0 : index
    %310 = vector.load %arg3[%c120_162, %c0_163] : memref<184x1xf32, #tpu.memory_space<vmem>>, vector<16x1xf32>
    %311 = vector.broadcast %310 : vector<16x1xf32> to vector<16x96xf32>
    %312 = arith.addf %309, %311 : vector<16x96xf32>
    %cst_164 = arith.constant 0.000000e+00 : f32
    %313 = vector.broadcast %cst_164 : f32 to vector<16x96xf32>
    %314 = arith.maximumf %312, %313 : vector<16x96xf32>
    %cst_165 = arith.constant dense<0.000000e+00> : vector<16xf32>
    %315 = vector.multi_reduction <add>, %314, %cst_165 [1] : vector<16x96xf32> to vector<16xf32>
    %316 = vector.shape_cast %315 : vector<16xf32> to vector<16x1xf32>
    %cst_166 = arith.constant 9.600000e+01 : f32
    %317 = vector.broadcast %cst_166 : f32 to vector<16x1xf32>
    %318 = arith.divf %316, %317 : vector<16x1xf32>
    %c392 = arith.constant 392 : index
    %c0_167 = arith.constant 0 : index
    %319 = vector.load %arg2[%c392, %c0_167] : memref<504x32xbf16, #tpu.memory_space<vmem>>, vector<8x16xbf16>
    %320 = arith.truncf %318 : vector<16x1xf32> to vector<16x1xbf16>
    %cst_168 = arith.constant dense<0.000000e+00> : vector<8x1xf32>
    %321 = tpu.matmul %319, %320, %cst_168 {dimension_numbers = #tpu.dot_dimension_numbers<[1], [0], [0], [1], [0, 0, 1, 1], [], []>} : vector<8x16xbf16>, vector<16x1xbf16>, vector<8x1xf32> -> vector<8x1xf32>
    %c136_169 = arith.constant 136 : index
    %c0_170 = arith.constant 0 : index
    %322 = vector.load %arg3[%c136_169, %c0_170] : memref<184x1xf32, #tpu.memory_space<vmem>>, vector<8x1xf32>
    %323 = arith.addf %321, %322 : vector<8x1xf32>
    %cst_171 = arith.constant 0.000000e+00 : f32
    %324 = vector.broadcast %cst_171 : f32 to vector<8x1xf32>
    %325 = arith.maximumf %323, %324 : vector<8x1xf32>
    %c400 = arith.constant 400 : index
    %c0_172 = arith.constant 0 : index
    %326 = vector.load %arg2[%c400, %c0_172] : memref<504x32xbf16, #tpu.memory_space<vmem>>, vector<16x8xbf16>
    %327 = arith.truncf %325 : vector<8x1xf32> to vector<8x1xbf16>
    %cst_173 = arith.constant dense<0.000000e+00> : vector<16x1xf32>
    %328 = tpu.matmul %326, %327, %cst_173 {dimension_numbers = #tpu.dot_dimension_numbers<[1], [0], [0], [1], [0, 0, 1, 1], [], []>} : vector<16x8xbf16>, vector<8x1xbf16>, vector<16x1xf32> -> vector<16x1xf32>
    %c144_174 = arith.constant 144 : index
    %c0_175 = arith.constant 0 : index
    %329 = vector.load %arg3[%c144_174, %c0_175] : memref<184x1xf32, #tpu.memory_space<vmem>>, vector<16x1xf32>
    %330 = arith.addf %328, %329 : vector<16x1xf32>
    %cst_176 = arith.constant 0.000000e+00 : f32
    %331 = vector.broadcast %cst_176 : f32 to vector<16x1xf32>
    %332 = arith.subf %331, %330 : vector<16x1xf32>
    %333 = math.exp %332 : vector<16x1xf32>
    %cst_177 = arith.constant 1.000000e+00 : f32
    %334 = vector.broadcast %cst_177 : f32 to vector<16x1xf32>
    %335 = arith.addf %334, %333 : vector<16x1xf32>
    %cst_178 = arith.constant 1.000000e+00 : f32
    %336 = vector.broadcast %cst_178 : f32 to vector<16x1xf32>
    %337 = arith.divf %336, %335 : vector<16x1xf32>
    %338 = vector.broadcast %337 : vector<16x1xf32> to vector<16x96xf32>
    %339 = arith.mulf %314, %338 : vector<16x96xf32>
    %340 = arith.addf %274, %339 : vector<16x96xf32>
    %341 = arith.truncf %340 : vector<16x96xf32> to vector<16x96xbf16>
    %c0_179 = arith.constant 0 : index
    %c0_180 = arith.constant 0 : index
    %342 = vector.load %arg4[%c0_179, %c0_180] : memref<96x192xbf16, #tpu.memory_space<vmem>>, vector<96x192xbf16>
    %cst_181 = arith.constant dense<0.000000e+00> : vector<16x192xf32>
    %343 = tpu.matmul %341, %342, %cst_181 {dimension_numbers = #tpu.dot_dimension_numbers<[1], [0], [0], [1], [0, 0, 1, 1], [], []>} : vector<16x96xbf16>, vector<96x192xbf16>, vector<16x192xf32> -> vector<16x192xf32>
    %344 = tpu.concatenate %343, %246 in 0 : vector<16x192xf32>, vector<8x192xf32> -> vector<24x192xf32>
    %345 = arith.truncf %344 : vector<24x192xf32> to vector<24x192xbf16>
    %cst_182 = arith.constant 0.000000e+00 : bf16
    %346 = vector.broadcast %cst_182 : bf16 to vector<24x1xbf16>
    %cst_183 = arith.constant 0.000000e+00 : bf16
    %347 = vector.broadcast %cst_183 : bf16 to vector<24x2xbf16>
    %348 = tpu.concatenate %346, %345, %347 in 1 : vector<24x1xbf16>, vector<24x192xbf16>, vector<24x2xbf16> -> vector<24x195xbf16>
    %c416 = arith.constant 416 : index
    %c0_184 = arith.constant 0 : index
    %349 = vector.load %arg2[%c416, %c0_184] : memref<504x32xbf16, #tpu.memory_space<vmem>>, vector<8x24xbf16>
    %350 = vector.extract_strided_slice %348 {offsets = [0, 0], sizes = [24, 192], strides = [1, 1]} : vector<24x195xbf16> to vector<24x192xbf16>
    %cst_185 = arith.constant dense<0.000000e+00> : vector<8x192xf32>
    %351 = tpu.matmul %349, %350, %cst_185 {dimension_numbers = #tpu.dot_dimension_numbers<[1], [0], [0], [1], [0, 0, 1, 1], [], []>} : vector<8x24xbf16>, vector<24x192xbf16>, vector<8x192xf32> -> vector<8x192xf32>
    %c424 = arith.constant 424 : index
    %c0_186 = arith.constant 0 : index
    %352 = vector.load %arg2[%c424, %c0_186] : memref<504x32xbf16, #tpu.memory_space<vmem>>, vector<8x24xbf16>
    %353 = vector.extract_strided_slice %348 {offsets = [0, 1], sizes = [24, 192], strides = [1, 1]} : vector<24x195xbf16> to vector<24x192xbf16>
    %cst_187 = arith.constant dense<0.000000e+00> : vector<8x192xf32>
    %354 = tpu.matmul %352, %353, %cst_187 {dimension_numbers = #tpu.dot_dimension_numbers<[1], [0], [0], [1], [0, 0, 1, 1], [], []>} : vector<8x24xbf16>, vector<24x192xbf16>, vector<8x192xf32> -> vector<8x192xf32>
    %355 = arith.addf %351, %354 : vector<8x192xf32>
    %c432 = arith.constant 432 : index
    %c0_188 = arith.constant 0 : index
    %356 = vector.load %arg2[%c432, %c0_188] : memref<504x32xbf16, #tpu.memory_space<vmem>>, vector<8x24xbf16>
    %357 = vector.extract_strided_slice %348 {offsets = [0, 2], sizes = [24, 192], strides = [1, 1]} : vector<24x195xbf16> to vector<24x192xbf16>
    %cst_189 = arith.constant dense<0.000000e+00> : vector<8x192xf32>
    %358 = tpu.matmul %356, %357, %cst_189 {dimension_numbers = #tpu.dot_dimension_numbers<[1], [0], [0], [1], [0, 0, 1, 1], [], []>} : vector<8x24xbf16>, vector<24x192xbf16>, vector<8x192xf32> -> vector<8x192xf32>
    %359 = arith.addf %355, %358 : vector<8x192xf32>
    %c440 = arith.constant 440 : index
    %c0_190 = arith.constant 0 : index
    %360 = vector.load %arg2[%c440, %c0_190] : memref<504x32xbf16, #tpu.memory_space<vmem>>, vector<8x24xbf16>
    %361 = vector.extract_strided_slice %348 {offsets = [0, 3], sizes = [24, 192], strides = [1, 1]} : vector<24x195xbf16> to vector<24x192xbf16>
    %cst_191 = arith.constant dense<0.000000e+00> : vector<8x192xf32>
    %362 = tpu.matmul %360, %361, %cst_191 {dimension_numbers = #tpu.dot_dimension_numbers<[1], [0], [0], [1], [0, 0, 1, 1], [], []>} : vector<8x24xbf16>, vector<24x192xbf16>, vector<8x192xf32> -> vector<8x192xf32>
    %363 = arith.addf %359, %362 : vector<8x192xf32>
    %c160_192 = arith.constant 160 : index
    %c0_193 = arith.constant 0 : index
    %364 = vector.load %arg3[%c160_192, %c0_193] : memref<184x1xf32, #tpu.memory_space<vmem>>, vector<8x1xf32>
    %365 = vector.broadcast %364 : vector<8x1xf32> to vector<8x192xf32>
    %366 = arith.addf %363, %365 : vector<8x192xf32>
    %cst_194 = arith.constant 0.000000e+00 : f32
    %367 = vector.broadcast %cst_194 : f32 to vector<8x192xf32>
    %368 = arith.maximumf %366, %367 : vector<8x192xf32>
    %369 = arith.truncf %368 : vector<8x192xf32> to vector<8x192xbf16>
    %c0_195 = arith.constant 0 : index
    %c0_196 = arith.constant 0 : index
    %370 = vector.load %arg5[%c0_195, %c0_196] : memref<192x384xbf16, #tpu.memory_space<vmem>>, vector<192x384xbf16>
    %cst_197 = arith.constant dense<0.000000e+00> : vector<8x384xf32>
    %371 = tpu.matmul %369, %370, %cst_197 {dimension_numbers = #tpu.dot_dimension_numbers<[1], [0], [0], [1], [0, 0, 1, 1], [], []>} : vector<8x192xbf16>, vector<192x384xbf16>, vector<8x384xf32> -> vector<8x384xf32>
    %372 = tpu.concatenate %371, %137 in 0 : vector<8x384xf32>, vector<8x384xf32> -> vector<16x384xf32>
    %373 = arith.truncf %372 : vector<16x384xf32> to vector<16x384xbf16>
    %cst_198 = arith.constant 0.000000e+00 : bf16
    %374 = vector.broadcast %cst_198 : bf16 to vector<16x1xbf16>
    %cst_199 = arith.constant 0.000000e+00 : bf16
    %375 = vector.broadcast %cst_199 : bf16 to vector<16x2xbf16>
    %376 = tpu.concatenate %374, %373, %375 in 1 : vector<16x1xbf16>, vector<16x384xbf16>, vector<16x2xbf16> -> vector<16x387xbf16>
    %c448 = arith.constant 448 : index
    %c0_200 = arith.constant 0 : index
    %377 = vector.load %arg2[%c448, %c0_200] : memref<504x32xbf16, #tpu.memory_space<vmem>>, vector<8x16xbf16>
    %378 = vector.extract_strided_slice %376 {offsets = [0, 0], sizes = [16, 384], strides = [1, 1]} : vector<16x387xbf16> to vector<16x384xbf16>
    %cst_201 = arith.constant dense<0.000000e+00> : vector<8x384xf32>
    %379 = tpu.matmul %377, %378, %cst_201 {dimension_numbers = #tpu.dot_dimension_numbers<[1], [0], [0], [1], [0, 0, 1, 1], [], []>} : vector<8x16xbf16>, vector<16x384xbf16>, vector<8x384xf32> -> vector<8x384xf32>
    %c456 = arith.constant 456 : index
    %c0_202 = arith.constant 0 : index
    %380 = vector.load %arg2[%c456, %c0_202] : memref<504x32xbf16, #tpu.memory_space<vmem>>, vector<8x16xbf16>
    %381 = vector.extract_strided_slice %376 {offsets = [0, 1], sizes = [16, 384], strides = [1, 1]} : vector<16x387xbf16> to vector<16x384xbf16>
    %cst_203 = arith.constant dense<0.000000e+00> : vector<8x384xf32>
    %382 = tpu.matmul %380, %381, %cst_203 {dimension_numbers = #tpu.dot_dimension_numbers<[1], [0], [0], [1], [0, 0, 1, 1], [], []>} : vector<8x16xbf16>, vector<16x384xbf16>, vector<8x384xf32> -> vector<8x384xf32>
    %383 = arith.addf %379, %382 : vector<8x384xf32>
    %c464 = arith.constant 464 : index
    %c0_204 = arith.constant 0 : index
    %384 = vector.load %arg2[%c464, %c0_204] : memref<504x32xbf16, #tpu.memory_space<vmem>>, vector<8x16xbf16>
    %385 = vector.extract_strided_slice %376 {offsets = [0, 2], sizes = [16, 384], strides = [1, 1]} : vector<16x387xbf16> to vector<16x384xbf16>
    %cst_205 = arith.constant dense<0.000000e+00> : vector<8x384xf32>
    %386 = tpu.matmul %384, %385, %cst_205 {dimension_numbers = #tpu.dot_dimension_numbers<[1], [0], [0], [1], [0, 0, 1, 1], [], []>} : vector<8x16xbf16>, vector<16x384xbf16>, vector<8x384xf32> -> vector<8x384xf32>
    %387 = arith.addf %383, %386 : vector<8x384xf32>
    %c472 = arith.constant 472 : index
    %c0_206 = arith.constant 0 : index
    %388 = vector.load %arg2[%c472, %c0_206] : memref<504x32xbf16, #tpu.memory_space<vmem>>, vector<8x16xbf16>
    %389 = vector.extract_strided_slice %376 {offsets = [0, 3], sizes = [16, 384], strides = [1, 1]} : vector<16x387xbf16> to vector<16x384xbf16>
    %cst_207 = arith.constant dense<0.000000e+00> : vector<8x384xf32>
    %390 = tpu.matmul %388, %389, %cst_207 {dimension_numbers = #tpu.dot_dimension_numbers<[1], [0], [0], [1], [0, 0, 1, 1], [], []>} : vector<8x16xbf16>, vector<16x384xbf16>, vector<8x384xf32> -> vector<8x384xf32>
    %391 = arith.addf %387, %390 : vector<8x384xf32>
    %c168_208 = arith.constant 168 : index
    %c0_209 = arith.constant 0 : index
    %392 = vector.load %arg3[%c168_208, %c0_209] : memref<184x1xf32, #tpu.memory_space<vmem>>, vector<8x1xf32>
    %393 = vector.broadcast %392 : vector<8x1xf32> to vector<8x384xf32>
    %394 = arith.addf %391, %393 : vector<8x384xf32>
    %cst_210 = arith.constant 0.000000e+00 : f32
    %395 = vector.broadcast %cst_210 : f32 to vector<8x384xf32>
    %396 = arith.maximumf %394, %395 : vector<8x384xf32>
    %397 = arith.truncf %396 : vector<8x384xf32> to vector<8x384xbf16>
    %cst_211 = arith.constant 0.000000e+00 : bf16
    %398 = vector.broadcast %cst_211 : bf16 to vector<8x1xbf16>
    %cst_212 = arith.constant 0.000000e+00 : bf16
    %399 = vector.broadcast %cst_212 : bf16 to vector<8x1xbf16>
    %400 = tpu.concatenate %398, %397, %399 in 1 : vector<8x1xbf16>, vector<8x384xbf16>, vector<8x1xbf16> -> vector<8x386xbf16>
    %c480 = arith.constant 480 : index
    %c0_213 = arith.constant 0 : index
    %401 = vector.load %arg2[%c480, %c0_213] : memref<504x32xbf16, #tpu.memory_space<vmem>>, vector<1x8xbf16>
    %402 = vector.extract_strided_slice %400 {offsets = [0, 0], sizes = [8, 384], strides = [1, 1]} : vector<8x386xbf16> to vector<8x384xbf16>
    %cst_214 = arith.constant dense<0.000000e+00> : vector<1x384xf32>
    %403 = tpu.matmul %401, %402, %cst_214 {dimension_numbers = #tpu.dot_dimension_numbers<[1], [0], [0], [1], [0, 0, 1, 1], [], []>} : vector<1x8xbf16>, vector<8x384xbf16>, vector<1x384xf32> -> vector<1x384xf32>
    %c488 = arith.constant 488 : index
    %c0_215 = arith.constant 0 : index
    %404 = vector.load %arg2[%c488, %c0_215] : memref<504x32xbf16, #tpu.memory_space<vmem>>, vector<1x8xbf16>
    %405 = vector.extract_strided_slice %400 {offsets = [0, 1], sizes = [8, 384], strides = [1, 1]} : vector<8x386xbf16> to vector<8x384xbf16>
    %cst_216 = arith.constant dense<0.000000e+00> : vector<1x384xf32>
    %406 = tpu.matmul %404, %405, %cst_216 {dimension_numbers = #tpu.dot_dimension_numbers<[1], [0], [0], [1], [0, 0, 1, 1], [], []>} : vector<1x8xbf16>, vector<8x384xbf16>, vector<1x384xf32> -> vector<1x384xf32>
    %407 = arith.addf %403, %406 : vector<1x384xf32>
    %c496 = arith.constant 496 : index
    %c0_217 = arith.constant 0 : index
    %408 = vector.load %arg2[%c496, %c0_217] : memref<504x32xbf16, #tpu.memory_space<vmem>>, vector<1x8xbf16>
    %409 = vector.extract_strided_slice %400 {offsets = [0, 2], sizes = [8, 384], strides = [1, 1]} : vector<8x386xbf16> to vector<8x384xbf16>
    %cst_218 = arith.constant dense<0.000000e+00> : vector<1x384xf32>
    %410 = tpu.matmul %408, %409, %cst_218 {dimension_numbers = #tpu.dot_dimension_numbers<[1], [0], [0], [1], [0, 0, 1, 1], [], []>} : vector<1x8xbf16>, vector<8x384xbf16>, vector<1x384xf32> -> vector<1x384xf32>
    %411 = arith.addf %407, %410 : vector<1x384xf32>
    %c176_219 = arith.constant 176 : index
    %c0_220 = arith.constant 0 : index
    %412 = vector.load %arg3[%c176_219, %c0_220] : memref<184x1xf32, #tpu.memory_space<vmem>>, vector<1x1xf32>
    %413 = vector.broadcast %412 : vector<1x1xf32> to vector<1x384xf32>
    %414 = arith.addf %411, %413 : vector<1x384xf32>
    %c0_221 = arith.constant 0 : index
    %c0_222 = arith.constant 0 : index
    %c0_223 = arith.constant 0 : index
    %415 = vector.load %arg9[%c0_221, %c0_222, %c0_223] : memref<1x1x384xf32, #tpu.memory_space<vmem>>, vector<1x1x384xf32>
    %416 = vector.shape_cast %415 : vector<1x1x384xf32> to vector<1x384xf32>
    %417 = vector.shape_cast %414 : vector<1x384xf32> to vector<1x1x384xf32>
    tpu.vector_store %arg9[%c0_221, %c0_222, %c0_223], %417 {strides = array<i32>} : memref<1x1x384xf32, #tpu.memory_space<vmem>>, vector<1x1x384xf32>,
    return
  }
  func.func @transform_0(%arg0: i32) -> (i32, i32, i32) {
    %c0_i32 = arith.constant 0 : i32
    %c0_i32_0 = arith.constant 0 : i32
    %c0_i32_1 = arith.constant 0 : i32
    return %arg0, %c0_i32, %c0_i32_0 : i32, i32, i32
  }
  func.func @transform_1(%arg0: i32) -> (i32, i32) {
    %c0_i32 = arith.constant 0 : i32
    %c0_i32_0 = arith.constant 0 : i32
    %c0_i32_1 = arith.constant 0 : i32
    return %c0_i32, %c0_i32_0 : i32, i32
  }
  func.func @transform_2(%arg0: i32) -> (i32, i32) {
    %c0_i32 = arith.constant 0 : i32
    %c0_i32_0 = arith.constant 0 : i32
    %c0_i32_1 = arith.constant 0 : i32
    return %c0_i32, %c0_i32_0 : i32, i32
  }
  func.func @transform_3(%arg0: i32) -> (i32, i32) {
    %c0_i32 = arith.constant 0 : i32
    %c0_i32_0 = arith.constant 0 : i32
    %c0_i32_1 = arith.constant 0 : i32
    return %c0_i32, %c0_i32_0 : i32, i32
  }
  func.func @transform_4(%arg0: i32) -> (i32, i32) {
    %c0_i32 = arith.constant 0 : i32
    %c0_i32_0 = arith.constant 0 : i32
    %c0_i32_1 = arith.constant 0 : i32
    return %c0_i32, %c0_i32_0 : i32, i32
  }
  func.func @transform_5(%arg0: i32) -> (i32, i32) {
    %c0_i32 = arith.constant 0 : i32
    %c0_i32_0 = arith.constant 0 : i32
    %c0_i32_1 = arith.constant 0 : i32
    return %c0_i32, %c0_i32_0 : i32, i32
  }
  func.func @transform_6(%arg0: i32) -> (i32, i32) {
    %c0_i32 = arith.constant 0 : i32
    %c0_i32_0 = arith.constant 0 : i32
    %c0_i32_1 = arith.constant 0 : i32
    return %c0_i32, %c0_i32_0 : i32, i32
  }
  func.func @transform_7(%arg0: i32) -> (i32, i32) {
    %c0_i32 = arith.constant 0 : i32
    %c0_i32_0 = arith.constant 0 : i32
    %c0_i32_1 = arith.constant 0 : i32
    return %c0_i32, %c0_i32_0 : i32, i32
  }
  func.func @transform_8(%arg0: i32) -> (i32, i32, i32) {
    %c0_i32 = arith.constant 0 : i32
    %c0_i32_0 = arith.constant 0 : i32
    %c0_i32_1 = arith.constant 0 : i32
    return %arg0, %c0_i32, %c0_i32_0 : i32, i32, i32
  }
}

</mosaic_0001>

<bundles_post_ra>
// kernel: _lambda_.1
= control target key start
LH: loop header
LB: loop body
LE: loop exit
PB: predicated region body
PF: predicated region fallthrough
CT: control target
= control target key end

     0   :  { %13 = vsyncpa [#allocation3], 0  ;;  %s11373_s0 = inlined_call_operand.vmem [shape: f32[2,2,768], index: 0, kind: input, shape index: {}]   ;;  %s11374_s1 = inlined_call_operand.vmem [shape: bf16[504,32], index: 1, kind: input, shape index: {}]   ;;  %s11375_s2 = inlined_call_operand.vmem [shape: f32[184,1], index: 2, kind: input, shape index: {}]   ;;  %s11376_s3 = inlined_call_operand.hbm [shape: bf16[96,192], index: 3, kind: input, shape index: {}]   ;;  %s11377_s4 = inlined_call_operand.hbm [shape: bf16[192,384], index: 4, kind: input, shape index: {}]   ;;  %s11378_s5 = inlined_call_operand.vmem [shape: bf16[767,384], index: 5, kind: input, shape index: {}]   ;;  %s11379_s6 = inlined_call_operand.vmem [shape: bf16[383,192], index: 6, kind: input, shape index: {}]   ;;  %s11380_s7 = inlined_call_operand.hbm [shape: bf16[191,96], index: 7, kind: input, shape index: {}]   ;;  %s11381_s8 = inlined_call_operand.vmem [shape: f32[2,1,384], index: 8, kind: output, shape index: {}]  }
   0x1   :  { %14 = vsyncpa [#allocation5], 0  ;;  %s9392_s27 = smov 0  }
   0x2 LB: > { %s9326_s28 = smov [#allocation4]   ;;  %s9398_s30 = sadd.s32 4294967295, %s9324_s27   ;;  %s9324_s27 = sphi %s9392_s27, %s20_s27  }
   0x3   : > { %s255_s29 = sshll.u32 %s9326_s28, 4  ;;  %p8073_p0 = scmp.ge.s32.totalorder %s9324_s27, 1  ;;  %s256_s29 = int_to_ptr.vmem [resolvable:$true] %s255_s29 }
   0x4   : > { %p224_p1 = scmp.lt.s32.totalorder %s9324_s27, 3  ;;  %p8824_p2 = scmp.eq.s32.totalorder %s9398_s30, 0 }
   0x5   : > { %s9327_s10 = smov [#allocation2]   ;;  %s9328_s13 = smov [#allocation6]  }
   0x6   : > { %p9403_p3 = pnand %p8073_p0, %p224_p1  ;;  %s242_s11 = sshll.u32 %s9327_s10, 4  ;;  %s9409_s11 = int_to_ptr.vmem [resolvable:$true] %s242_s11 }
   0x7   : > { %s9417_s14 = sshll.u32 %s9328_s13, 4  ;;  %s9243_s15 = scalar_lea.vmem %s256_s29, 4608  ;;  %s275_s14 = int_to_ptr.vmem [resolvable:$true] %s9417_s14 }
   0x8   : > { %p8814_p4 = pneg %p9403_p3  ;;  %p9244_p7 = scmp.ne.s32.totalorder %s256_s29, %s9243_s15 }
   0x9   : > { %p9251_p10 = scmp.lt.s32.totalorder %s256_s29, %s256_s29  ;;  %p9252_p11 = scmp.lt.s32.totalorder %s9243_s15, %s9243_s15 }
   0xa   : > { %p9413_p5 = pnand %p8824_p2, %p8814_p4 }
   0xb   : > { %p9253_p12 = por %p9252_p11, %p9251_p10 }
   0xc   : > { %p9234_p6 = pneg %p9413_p5 }
   0xe   : > { %p9246_p8 = pnand %p9244_p7, %p9234_p6 }
  0x10   : > { %p9247_p9 = pneg %p9246_p8 }
  0x12   : > { %p9254_p13 = pnand %p9253_p12, %p9247_p9 }
  0x14   : > { %9257 = shalt.err (!%p9254_p13)
}
  0x15   : > { %s9329_s16 = smov 192   ;;  %s9330_s17 = smov 12  }
  0x16   : > { %8820 = dma.hbm_to_vmem [thread:$0]  (!%p9413_p5), %s11377_s4, 4608, %s256_s29, [#allocation5], %s9329_s16, %s9329_s16, %s9330_s17  }
  0x17   : > { %s9269_s20 = scalar_lea.vmem %s9409_s11, 1536  ;;  %p9277_p7 = scmp.lt.s32.totalorder %s9409_s11, %s9409_s11 }
  0x18   : > { %p9270_p0 = scmp.ne.s32.totalorder %s9409_s11, %s9269_s20  ;;  %p9278_p8 = scmp.lt.s32.totalorder %s9269_s20, %s9269_s20 }
  0x1a   : > { %p9272_p1 = pnand %p9270_p0, %p9234_p6  ;;  %p9279_p9 = por %p9278_p8, %p9277_p7 }
  0x1c   : > { %p9273_p4 = pneg %p9272_p1 }
  0x1e   : > { %p9280_p10 = pnand %p9279_p9, %p9273_p4 }
  0x20   : > { %9283 = shalt.err (!%p9280_p10)
}
  0x21   : > { %s9331_s21 = smov 128   ;;  %s9332_s22 = smov 8  }
  0x22   : > { %8817 = dma.hbm_to_vmem [thread:$0]  (!%p9413_p5), %s11376_s3, 1536, %s9409_s11, [#allocation3], %s9331_s21, %s9331_s21, %s9332_s22  }
  0x23   : > { %s9295_s25 = scalar_lea.vmem %s275_s14, 1536  ;;  %p9303_p0 = scmp.lt.s32.totalorder %s275_s14, %s275_s14 }
  0x24   : > { %p9296_p11 = scmp.ne.s32.totalorder %s275_s14, %s9295_s25  ;;  %p9304_p1 = scmp.lt.s32.totalorder %s9295_s25, %s9295_s25 }
  0x26   : > { %p9298_p12 = pnand %p9296_p11, %p9234_p6  ;;  %p9305_p4 = por %p9304_p1, %p9303_p0 }
  0x28   : > { %p9299_p13 = pneg %p9298_p12 }
  0x2a   : > { %p9306_p7 = pnand %p9305_p4, %p9299_p13 }
  0x2c   : > { %9309 = shalt.err (!%p9306_p7)
}
  0x2d   : > { %s9333_s26 = smov 64   ;;  %s9334_s28 = smov 4  }
  0x2e   : > { %8823 = dma.hbm_to_vmem [thread:$0]  (!%p9413_p5), %s11380_s7, 1536, %s275_s14, [#allocation5], %s9333_s26, %s9333_s26, %s9334_s28  }
  0x2f   : > { %298 = sbr.rel (%p9403_p3) target bundleno = 9324 (0x246c), region = 52 }
  0x34   : > { %9315 = dma.done.wait (%p8824_p2), [#allocation3], 1536  }
  0x35   : > { %9317 = vsyncadd (%p8824_p2), [#allocation3], 4294965760 }
  0x36   : > { %9319 = dma.done.wait (%p8824_p2), [#allocation5], 6144  }
  0x37   : > { %9321 = vsyncadd (%p8824_p2), [#allocation5], 4294961152  ;;  %p339_p6 = scmp.lt.s32.totalorder %s9398_s30, 1  ;;  %v357_v0 = vlaneseq  ;;  %v9335_v1 = vmov 1983009808   ;;  %s9336_s14 = smov 2  }
  0x38   : > { %v355_v2 = vunpack.c.l.s4 %v9335_v1  ;;  %v9337_v20 = vmov 0   ;;  %vm408_vm0 = vcmask 15360   ;;  %s9338_s15 = smov 127   ;;  %s9339_s16 = smov 126   ;;  %v1249_v34 = vld [vmem:[%s11375_s2] sm:$0xf] }
  0x39   : > { %s11387_s30 = smov (!%p339_p6, %s9398_s30), 1  ;;  %v9466_v3 = vshrl.u32 %v357_v0, 7  ;;  %499 = vmatprep.mubr.bf16.mxu0 %v9337_v20  ;;  %540 = vmatprep.mubr.bf16.mxu1 %v9337_v20  ;;  %s9340_s17 = smov 125   ;;  %vm438_vm1 = vcmask 1039360   ;;  %vm448_vm2 = vcmask 1040384   ;;  %vm748_vm3 = vcmask 1031168  }
  0x3a   : > { %v356_v4 = vunpack.c.0.s8 %v355_v2  ;;  %s8800_s9 = smul.u32 12, %s11387_s30  ;;  %8859 = vset.pattern.permute.xlu0 %v9337_v20  ;;  %8860 = vset.pattern.permute.xlu1 %v9337_v20  ;;  %s9341_s18 = smov 124   ;;  %v421_v41 = vld [vmem:[%s11374_s1 + $0x4] sm:$0x3]  ;;  %v420_v56 = vld [vmem:[%s11374_s1] sm:$0x3] }
  0x3b   : > { %vm920_vm4 = vcmask 1022976   ;;  %vm1092_vm5 = vcmask 1014784   ;;  %s9342_s11 = smov 1   ;;  %vm1291_vm6 = vcmask 7168   ;;  %vm1326_vm7 = vcmask 1041408   ;;  %s8801_s21 = smul.u32 3, %s11387_s30 }
  0x3c   : > { %v359_v5 = vsub.s32 %v356_v4, %v9466_v3  ;;  %s9473_s13 = scalar_lea.vmem %s11373_s0, %s8800_s9  ;;  %vm1322_vm8 = vcmask 31744   ;;  %vm3050_vm9 = vcmask 1046528   ;;  %vm3051_vm10 = vcmask 1047552  }
  0x3d   : > { %v349_v6 = vld [vmem:[%s9473_s13] sm:$0xff]  ;;  %v8083_v9 = vld.sshfl [vmem:[%s9473_s13 + $0x8] sm:$0x33 pattern:$0x76325410]  ;;  %vm3364_vm11 = vcmask 1043456   ;;  %s347_s24 = scalar_lea.vmem %s11381_s8, %s8801_s21 }
  0x3e   : > { %v9476_v7 = vrot.slane %v349_v6, %v359_v5  ;;  %v353_v8 = vcombine.high %v349_v6, %v349_v6  ;;  %v9497_v17 = vcombine.high %v8083_v9, %v8083_v9  ;;  %v388_v18 = vpack.c.bf16 %v8083_v9, %v8083_v9 }
  0x3f   : > { %vm3360_vm12 = vcmask 64512   ;;  %vm9345_vm13 = vmmov 0   ;;  %vm4160_vm14 = vcmask 1044480   ;;  %vm4156_vm15 = vcmask 80896  }
  0x40   : > { %v384_v10 = vpack.c.bf16 %v9476_v7, %v9476_v7  ;;  %v9481_v11 = vrot.slane %v353_v8, %v359_v5  ;;  %v9485_v12 = vcombine.high %v9476_v7, %v9476_v7  ;;  %v389_v19 = vpack.c.bf16 %v9497_v17, %v9497_v17 }
  0x42   : > { %396 = vrot.lane.b32.xlu0 %v384_v10, %s9336_s14  ;;  %v386_v13 = vpack.c.bf16 %v9481_v11, %v9481_v11  ;;  %v385_v14 = vpack.c.bf16 %v9485_v12, %v9485_v12  ;;  %v9493_v15 = vcombine.high %v9481_v11, %v9481_v11 }
  0x44   : > { %400 = vrot.lane.b32.xlu1 %v386_v13, %s9336_s14  ;;  %v387_v16 = vpack.c.bf16 %v9493_v15, %v9493_v15  ;;  %v733_v13 = vld [vmem:[%s11374_s1 + $0x8] sm:$0x3] }
  0x46   : > { %398 = vrot.lane.b32.xlu0 %v385_v14, %s9336_s14 }
  0x48   : > { %402 = vrot.lane.b32.xlu1 %v387_v16, %s9336_s14 }
  0x4a   : > { %404 = vrot.lane.b32.xlu0 %v388_v18, %s9336_s14 }
  0x4c   : > { %406 = vrot.lane.b32.xlu1 %v389_v19, %s9336_s14 }
  0xb4   : > { %v397_v21 = vpop.permute.xlu0 %396 }
  0xb5   : > { %v9506_v22 = vsel %vm408_vm0, 0, %v397_v21 }
  0xb6   : > { %424 = vrot.lane.b32.xlu0 %v9506_v22, %s9338_s15  ;;  %v401_v23 = vpop.permute.xlu1 %400  ;;  %v593_v52 = vsel %vm448_vm2, %v9506_v22, 0 }
  0xb8   : > { %v399_v24 = vpop.permute.xlu0 %398 }
  0xb9   : > { %v409_v25 = vsel %vm408_vm0, %v397_v21, %v399_v24  ;;  %v9512_v26 = vsel %vm408_vm0, %v399_v24, %v401_v23 }
  0xba   : > { %428 = vrot.lane.b32.xlu0 %v9512_v26, %s9338_s15  ;;  %426 = vrot.lane.b32.xlu1 %v409_v25, %s9338_s15  ;;  %v403_v27 = vpop.permute.xlu1 %402  ;;  %v599_v55 = vsel %vm448_vm2, %v9512_v26, 0 }
  0xbb   : > { %v9518_v29 = vsel %vm408_vm0, %v401_v23, %v403_v27 }
  0xbc   : > { %v405_v28 = vpop.permute.xlu0 %404 }
  0xbd   : > { %v9521_v30 = vsel %vm408_vm0, %v403_v27, %v405_v28 }
  0xbe   : > { %432 = vrot.lane.b32.xlu0 %v9521_v30, %s9338_s15  ;;  %430 = vrot.lane.b32.xlu1 %v9518_v29, %s9338_s15  ;;  %v407_v31 = vpop.permute.xlu1 %406  ;;  %v605_v60 = vsel %vm448_vm2, %v9521_v30, 0 }
  0xbf   : > { %v419_v32 = vsel %vm408_vm0, %v407_v31, 0  ;;  %v413_v33 = vsel %vm408_vm0, %v405_v28, %v407_v31 }
  0xc2   : > { %436 = vrot.lane.b32.xlu0 %v419_v32, %s9338_s15  ;;  %434 = vrot.lane.b32.xlu1 %v413_v33, %s9338_s15 }
  0xc6   : > { %736 = vrot.lane.b32.xlu0 %v409_v25, %s9339_s16  ;;  %734 = vrot.lane.b32.xlu1 %v9506_v22, %s9339_s16 }
  0xca   : > { %744 = vrot.lane.b32.xlu0 %v413_v33, %s9339_s16  ;;  %738 = vrot.lane.b32.xlu1 %v9512_v26, %s9339_s16 }
  0xce   : > { %740 = vrot.lane.b32.xlu0 %v9518_v29, %s9339_s16  ;;  %746 = vrot.lane.b32.xlu1 %v419_v32, %s9339_s16 }
  0xd2   : > { %906 = vrot.lane.b32.xlu0 %v9506_v22, %s9340_s17  ;;  %742 = vrot.lane.b32.xlu1 %v9521_v30, %s9339_s16 }
  0xd6   : > { %910 = vrot.lane.b32.xlu0 %v9512_v26, %s9340_s17  ;;  %908 = vrot.lane.b32.xlu1 %v409_v25, %s9340_s17 }
  0xda   : > { %914 = vrot.lane.b32.xlu0 %v9521_v30, %s9340_s17  ;;  %916 = vrot.lane.b32.xlu1 %v413_v33, %s9340_s17 }
  0xde   : > { %918 = vrot.lane.b32.xlu0 %v419_v32, %s9340_s17  ;;  %912 = vrot.lane.b32.xlu1 %v9518_v29, %s9340_s17 }
  0xe2   : > { %1080 = vrot.lane.b32.xlu0 %v409_v25, %s9341_s18  ;;  %1078 = vrot.lane.b32.xlu1 %v9506_v22, %s9341_s18 }
  0xe6   : > { %1084 = vrot.lane.b32.xlu0 %v9518_v29, %s9341_s18  ;;  %1082 = vrot.lane.b32.xlu1 %v9512_v26, %s9341_s18 }
  0xea   : > { %1088 = vrot.lane.b32.xlu0 %v413_v33, %s9341_s18  ;;  %1086 = vrot.lane.b32.xlu1 %v9521_v30, %s9341_s18 }
  0xee   : > { %1090 = vrot.lane.b32.xlu1 %v419_v32, %s9341_s18  ;;  %1252 = vperm.xlu0 %8859, %v1249_v34   ;;  %v905_v32 = vld [vmem:[%s11374_s1 + $0xc] sm:$0x3] }
 0x128   : > { %v425_v35 = vpop.permute.xlu0 %424 }
 0x12c   : > { %v429_v36 = vpop.permute.xlu0 %428  ;;  %v427_v37 = vpop.permute.xlu1 %426 }
 0x12d   : > { %v440_v38 = vsel %vm438_vm1, %v427_v37, %v429_v36  ;;  %v439_v39 = vsel %vm438_vm1, %v425_v35, %v427_v37 }
 0x12e   : > { %8084 = vmatprep.subr.msk.bf16.mxu0 %vm448_vm2, %v440_v38  ;;  %v450_v40 = vsel %vm448_vm2, %v439_v39, 0 }
 0x12f   : > { %482 = vmatpush1.bf16.msra.mxu0 %v450_v40 }
 0x130   : > { %v433_v42 = vpop.permute.xlu0 %432  ;;  %v431_v43 = vpop.permute.xlu1 %430 }
 0x131   : > { %v442_v44 = vsel %vm438_vm1, %v431_v43, %v433_v42  ;;  %v441_v45 = vsel %vm438_vm1, %v429_v36, %v431_v43 }
 0x132   : > { %8085 = vmatmul.mubr.msk.bf16.vlgmr.msra.gmra.mxu0 %vm408_vm0, %v421_v41  ;;  %8086 = vmatprep.subr.msk.bf16.mxu1 %vm448_vm2, %v442_v44  ;;  %v456_v46 = vsel %vm448_vm2, %v441_v45, 0 }
 0x133   : > { %523 = vmatpush1.bf16.msra.mxu1 %v456_v46  ;;  %581 = vmatprep.mubr.bf16.mxu0 %v9337_v20 }
 0x134   : > { %v437_v47 = vpop.permute.xlu0 %436  ;;  %8090 = vmatprep.subr.msk.bf16.mxu1 %vm448_vm2, %v409_v25  ;;  %v435_v48 = vpop.permute.xlu1 %434 }
 0x135   : > { %v443_v49 = vsel %vm438_vm1, %v433_v42, %v435_v48  ;;  %v444_v50 = vsel %vm438_vm1, %v435_v48, %v437_v47  ;;  %v1077_v47 = vld [vmem:[%s11374_s1 + $0x10] sm:$0x3] }
 0x136   : > { %8087 = vmatmul.mubr.msk.bf16.vlgmr.msra.gmra.mxu1 %vm408_vm0, %v421_v41  ;;  %8088 = vmatprep.subr.msk.bf16.mxu0 %vm448_vm2, %v444_v50  ;;  %v462_v51 = vsel %vm448_vm2, %v443_v49, 0 }
 0x137   : > { %564 = vmatpush1.bf16.msra.mxu0 %v462_v51  ;;  %625 = vmatpush1.bf16.msra.mxu1 %v593_v52 }
 0x138   : > { %v737_v53 = vpop.permute.xlu0 %736  ;;  %8092 = vmatprep.subr.msk.bf16.mxu0 %vm448_vm2, %v9518_v29  ;;  %8094 = vmatprep.subr.msk.bf16.mxu1 %vm448_vm2, %v413_v33  ;;  %v735_v54 = vpop.permute.xlu1 %734 }
 0x139   : > { %642 = vmatprep.mubr.bf16.mxu1 %v9337_v20  ;;  %v749_v61 = vsel %vm748_vm3, %v735_v54, %v737_v53 }
 0x13a   : > { %8089 = vmatmul.mubr.msk.bf16.vlgmr.msra.gmra.mxu0 %vm408_vm0, %v421_v41  ;;  %v759_v2 = vsel %vm448_vm2, %v749_v61, 0 }
 0x13b   : > { %666 = vmatpush1.bf16.msra.mxu0 %v599_v55  ;;  %683 = vmatprep.mubr.bf16.mxu0 %v9337_v20 }
 0x13c   : > { %v745_v57 = vpop.permute.xlu0 %744  ;;  %v739_v58 = vpop.permute.xlu1 %738 }
 0x13d   : > { %v750_v59 = vsel %vm748_vm3, %v737_v53, %v739_v58 }
 0x13e   : > { %8091 = vmatmul.mubr.msk.bf16.vlgmr.msra.gmra.mxu1 %vm408_vm0, %v420_v56  ;;  %8096 = vmatprep.subr.msk.bf16.mxu0 %vm448_vm2, %v750_v59 }
 0x13f   : > { %707 = vmatpush1.bf16.msra.mxu1 %v605_v60  ;;  %724 = vmatprep.mubr.bf16.mxu1 %v9337_v20 }
 0x140   : > { %v741_v62 = vpop.permute.xlu0 %740  ;;  %v747_v63 = vpop.permute.xlu1 %746 }
 0x141   : > { %v754_v1 = vsel %vm748_vm3, %v745_v57, %v747_v63  ;;  %v751_v4 = vsel %vm748_vm3, %v739_v58, %v741_v62 }
 0x142   : > { %8093 = vmatmul.mubr.msk.bf16.vlgmr.msra.gmra.mxu0 %vm408_vm0, %v420_v56  ;;  %v765_v9 = vsel %vm448_vm2, %v751_v4, 0 }
 0x143   : > { %791 = vmatpush1.bf16.msra.mxu0 %v759_v2  ;;  %808 = vmatprep.mubr.bf16.mxu0 %v9337_v20 }
 0x144   : > { %8100 = vmatprep.subr.msk.bf16.mxu0 %vm448_vm2, %v754_v1  ;;  %v907_v5 = vpop.permute.xlu0 %906  ;;  %v743_v6 = vpop.permute.xlu1 %742 }
 0x145   : > { %v752_v8 = vsel %vm748_vm3, %v741_v62, %v743_v6  ;;  %v753_v10 = vsel %vm748_vm3, %v743_v6, %v745_v57 }
 0x146   : > { %8095 = vmatmul.mubr.msk.bf16.vlgmr.msra.gmra.mxu1 %vm408_vm0, %v420_v56  ;;  %8098 = vmatprep.subr.msk.bf16.mxu1 %vm448_vm2, %v752_v8  ;;  %v771_v19 = vsel %vm448_vm2, %v753_v10, 0 }
 0x147   : > { %832 = vmatpush1.bf16.msra.mxu1 %v765_v9  ;;  %849 = vmatprep.mubr.bf16.mxu1 %v9337_v20 }
 0x148   : > { %v911_v14 = vpop.permute.xlu0 %910  ;;  %v909_v16 = vpop.permute.xlu1 %908 }
 0x149   : > { %v922_v18 = vsel %vm920_vm4, %v909_v16, %v911_v14  ;;  %v921_v21 = vsel %vm920_vm4, %v907_v5, %v909_v16 }
 0x14a   : > { %8097 = vmatmul.mubr.msk.bf16.vlgmr.msra.gmra.mxu0 %vm408_vm0, %v733_v13  ;;  %8102 = vmatprep.subr.msk.bf16.mxu1 %vm448_vm2, %v922_v18  ;;  %v931_v24 = vsel %vm448_vm2, %v921_v21, 0 }
 0x14b   : > { %873 = vmatpush1.bf16.msra.mxu0 %v771_v19  ;;  %890 = vmatprep.mubr.bf16.mxu0 %v9337_v20 }
 0x14c   : > { %v915_v22 = vpop.permute.xlu0 %914  ;;  %v917_v23 = vpop.permute.xlu1 %916 }
 0x14d   : > { %v925_v31 = vsel %vm920_vm4, %v915_v22, %v917_v23 }
 0x14e   : > { %8099 = vmatmul.mubr.msk.bf16.vlgmr.msra.gmra.mxu1 %vm408_vm0, %v733_v13  ;;  %v943_v35 = vsel %vm448_vm2, %v925_v31, 0 }
 0x14f   : > { %963 = vmatpush1.bf16.msra.mxu1 %v931_v24  ;;  %980 = vmatprep.mubr.bf16.mxu1 %v9337_v20 }
 0x150   : > { %v919_v25 = vpop.permute.xlu0 %918  ;;  %v913_v26 = vpop.permute.xlu1 %912 }
 0x151   : > { %v926_v27 = vsel %vm920_vm4, %v917_v23, %v919_v25  ;;  %v923_v28 = vsel %vm920_vm4, %v911_v14, %v913_v26  ;;  %v924_v29 = vsel %vm920_vm4, %v913_v26, %v915_v22 }
 0x152   : > { %8101 = vmatmul.mubr.msk.bf16.vlgmr.msra.gmra.mxu0 %vm408_vm0, %v733_v13  ;;  %8104 = vmatprep.subr.msk.bf16.mxu0 %vm448_vm2, %v924_v29  ;;  %v937_v30 = vsel %vm448_vm2, %v923_v28, 0 }
 0x153   : > { %8106 = vmatprep.subr.msk.bf16.mxu1 %vm448_vm2, %v926_v27  ;;  %1004 = vmatpush1.bf16.msra.mxu0 %v937_v30 }
 0x154   : > { %v1081_v33 = vpop.permute.xlu0 %1080  ;;  %v1079_v34 = vpop.permute.xlu1 %1078  ;;  %1021 = vmatprep.mubr.bf16.mxu0 %v9337_v20 }
 0x155   : > { %v1093_v36 = vsel %vm1092_vm5, %v1079_v34, %v1081_v33 }
 0x156   : > { %8103 = vmatmul.mubr.msk.bf16.vlgmr.msra.gmra.mxu1 %vm408_vm0, %v905_v32  ;;  %v1103_v40 = vsel %vm448_vm2, %v1093_v36, 0 }
 0x157   : > { %1045 = vmatpush1.bf16.msra.mxu1 %v943_v35  ;;  %1062 = vmatprep.mubr.bf16.mxu1 %v9337_v20 }
 0x158   : > { %v1085_v37 = vpop.permute.xlu0 %1084  ;;  %v1083_v38 = vpop.permute.xlu1 %1082 }
 0x159   : > { %v1094_v39 = vsel %vm1092_vm5, %v1081_v33, %v1083_v38  ;;  %v1095_v41 = vsel %vm1092_vm5, %v1083_v38, %v1085_v37 }
 0x15a   : > { %8105 = vmatmul.mubr.msk.bf16.vlgmr.msra.gmra.mxu0 %vm408_vm0, %v905_v32  ;;  %8108 = vmatprep.subr.msk.bf16.mxu0 %vm448_vm2, %v1094_v39  ;;  %v1109_v45 = vsel %vm448_vm2, %v1095_v41, 0 }
 0x15b   : > { %1135 = vmatpush1.bf16.msra.mxu0 %v1103_v40  ;;  %1152 = vmatprep.mubr.bf16.mxu0 %v9337_v20 }
 0x15c   : > { %v1089_v42 = vpop.permute.xlu0 %1088  ;;  %v1087_v43 = vpop.permute.xlu1 %1086 }
 0x15d   : > { %v1096_v44 = vsel %vm1092_vm5, %v1085_v37, %v1087_v43  ;;  %v1097_v46 = vsel %vm1092_vm5, %v1087_v43, %v1089_v42 }
 0x15e   : > { %8107 = vmatmul.mubr.msk.bf16.vlgmr.msra.gmra.mxu1 %vm408_vm0, %v905_v32  ;;  %8110 = vmatprep.subr.msk.bf16.mxu1 %vm448_vm2, %v1096_v44  ;;  %v1115_v50 = vsel %vm448_vm2, %v1097_v46, 0 }
 0x15f   : > { %1176 = vmatpush1.bf16.msra.mxu1 %v1109_v45  ;;  %1193 = vmatprep.mubr.bf16.mxu1 %v9337_v20 }
 0x160   : > { %v1091_v48 = vpop.permute.xlu1 %1090 }
 0x161   : > { %v1098_v49 = vsel %vm1092_vm5, %v1089_v42, %v1091_v48  ;;  %vm5903_vm5 = vcmask 515072  }
 0x162   : > { %8109 = vmatmul.mubr.msk.bf16.vlgmr.msra.gmra.mxu0 %vm408_vm0, %v1077_v47  ;;  %8112 = vmatprep.subr.msk.bf16.mxu0 %vm448_vm2, %v1098_v49  ;;  %vm5401_vm2 = vcmask 523264  }
 0x163   : > { %1217 = vmatpush1.bf16.msra.mxu0 %v1115_v50  ;;  %1234 = vmatprep.mubr.bf16.mxu0 %v9337_v20 }
 0x166   : > { %8111 = vmatmul.mubr.msk.bf16.vlgmr.msra.gmra.mxu1 %vm408_vm0, %v1077_v47 }
 0x167   : > { %1377 = vmatprep.mubr.bf16.mxu1 %v9337_v20 }
 0x16a   : > { %8113 = vmatmul.mubr.msk.bf16.vlgmr.msra.gmra.mxu0 %vm408_vm0, %v1077_v47  ;;  %vm5035_vm0 = vcmask 531456  }
 0x16b   : > { %1418 = vmatprep.mubr.bf16.mxu0 %v9337_v20 }
 0x1f2   : > { %v501_v51 = vpop.f32.mrf.mxu0 }
 0x1f4   : > { %v503_v52 = vpop.f32.mrf.mxu0 }
 0x1f6   : > { %v505_v53 = vpop.f32.mrf.mxu0  ;;  %v542_v54 = vpop.f32.mrf.mxu1 }
 0x1f8   : > { %v506_v55 = vpop.f32.mrf.mxu0  ;;  %v544_v56 = vpop.f32.mrf.mxu1 }
 0x1fa   : > { %v546_v57 = vpop.f32.mrf.mxu1  ;;  %v583_v58 = vpop.f32.mrf.mxu0 }
 0x1fc   : > { %v547_v59 = vpop.f32.mrf.mxu1  ;;  %v585_v60 = vpop.f32.mrf.mxu0 }
 0x1fe   : > { %v587_v61 = vpop.f32.mrf.mxu0  ;;  %v644_v62 = vpop.f32.mrf.mxu1 }
 0x1ff   : > { %v645_v40 = vadd.f32 %v644_v62, %v501_v51 }
 0x200   : > { %v588_v63 = vpop.f32.mrf.mxu0  ;;  %v646_v1 = vpop.f32.mrf.mxu1 }
 0x201   : > { %v647_v39 = vadd.f32 %v646_v1, %v503_v52 }
 0x202   : > { %v648_v2 = vpop.f32.mrf.mxu1  ;;  %v685_v4 = vpop.f32.mrf.mxu0 }
 0x203   : > { %v686_v43 = vadd.f32 %v685_v4, %v542_v54  ;;  %v1253_v2 = vpop.permute.xlu0 %1252 }
 0x204   : > { %v649_v5 = vpop.f32.mrf.mxu1  ;;  %v687_v6 = vpop.f32.mrf.mxu0 }
 0x205   : > { %v688_v48 = vadd.f32 %v687_v6, %v544_v56 }
 0x206   : > { %v689_v8 = vpop.f32.mrf.mxu0  ;;  %v726_v9 = vpop.f32.mrf.mxu1 }
 0x207   : > { %v727_v59 = vadd.f32 %v726_v9, %v583_v58 }
 0x208   : > { %v690_v10 = vpop.f32.mrf.mxu0  ;;  %v728_v13 = vpop.f32.mrf.mxu1 }
 0x209   : > { %v729_v52 = vadd.f32 %v728_v13, %v585_v60 }
 0x20a   : > { %v730_v14 = vpop.f32.mrf.mxu1  ;;  %v810_v16 = vpop.f32.mrf.mxu0 }
 0x20b   : > { %v899_v45 = vadd.f32 %v810_v16, %v645_v40 }
 0x20c   : > { %v731_v18 = vpop.f32.mrf.mxu1  ;;  %v812_v19 = vpop.f32.mrf.mxu0 }
 0x20d   : > { %v900_v44 = vadd.f32 %v812_v19, %v647_v39 }
 0x20e   : > { %v814_v21 = vpop.f32.mrf.mxu0  ;;  %v851_v22 = vpop.f32.mrf.mxu1 }
 0x20f   : > { %v901_v49 = vadd.f32 %v851_v22, %v686_v43 }
 0x210   : > { %v815_v23 = vpop.f32.mrf.mxu0  ;;  %v853_v24 = vpop.f32.mrf.mxu1 }
 0x211   : > { %v902_v61 = vadd.f32 %v853_v24, %v688_v48 }
 0x212   : > { %v855_v25 = vpop.f32.mrf.mxu1  ;;  %v892_v26 = vpop.f32.mrf.mxu0 }
 0x213   : > { %v903_v54 = vadd.f32 %v892_v26, %v727_v59 }
 0x214   : > { %v856_v27 = vpop.f32.mrf.mxu1  ;;  %v894_v28 = vpop.f32.mrf.mxu0 }
 0x215   : > { %v904_v14 = vadd.f32 %v894_v28, %v729_v52 }
 0x216   : > { %v896_v29 = vpop.f32.mrf.mxu0  ;;  %v982_v30 = vpop.f32.mrf.mxu1 }
 0x217   : > { %v1071_v53 = vadd.f32 %v982_v30, %v899_v45 }
 0x218   : > { %v897_v31 = vpop.f32.mrf.mxu0  ;;  %v984_v32 = vpop.f32.mrf.mxu1 }
 0x219   : > { %v1072_v50 = vadd.f32 %v984_v32, %v900_v44 }
 0x21a   : > { %v986_v33 = vpop.f32.mrf.mxu1  ;;  %v1023_v34 = vpop.f32.mrf.mxu0 }
 0x21b   : > { %v1073_v63 = vadd.f32 %v1023_v34, %v901_v49 }
 0x21c   : > { %v987_v35 = vpop.f32.mrf.mxu1  ;;  %v1025_v36 = vpop.f32.mrf.mxu0 }
 0x21d   : > { %v1074_v4 = vadd.f32 %v1025_v36, %v902_v61  ;;  %v9231_v61 = vld.sshfl [vmem:[%s9473_s13 + $0x8] sm:$0x33 pattern:$0x76325410] }
 0x21e   : > { %v1027_v37 = vpop.f32.mrf.mxu0  ;;  %v1064_v38 = vpop.f32.mrf.mxu1 }
 0x21f   : > { %v1075_v16 = vadd.f32 %v1064_v38, %v903_v54 }
 0x220   : > { %v1028_v41 = vpop.f32.mrf.mxu0  ;;  %v1066_v42 = vpop.f32.mrf.mxu1 }
 0x221   : > { %v1076_v58 = vadd.f32 %v1066_v42, %v904_v14 }
 0x222   : > { %v1068_v46 = vpop.f32.mrf.mxu1  ;;  %v1154_v47 = vpop.f32.mrf.mxu0 }
 0x223   : > { %v1243_v51 = vadd.f32 %v1154_v47, %v1071_v53 }
 0x224   : > { %v1069_v55 = vpop.f32.mrf.mxu1  ;;  %v1156_v57 = vpop.f32.mrf.mxu0 }
 0x225   : > { %v1244_v5 = vadd.f32 %v1156_v57, %v1072_v50  ;;  %v1255_v23 = vadd.f32 %v1253_v2, %v1243_v51 }
 0x226   : > { %v1158_v62 = vpop.f32.mrf.mxu0  ;;  %v1195_v1 = vpop.f32.mrf.mxu1 }
 0x227   : > { %v1256_v8 = vadd.f32 %v1253_v2, %v1244_v5  ;;  %v1245_v10 = vadd.f32 %v1195_v1, %v1073_v63  ;;  %v1261_v32 = vmax.f32 %v1255_v23, 0.0 }
 0x228   : > { %v1159_v56 = vpop.f32.mrf.mxu0  ;;  %v1197_v6 = vpop.f32.mrf.mxu1 }
 0x229   : > { %v1262_v18 = vmax.f32 %v1256_v8, 0.0  ;;  %v1257_v19 = vadd.f32 %v1253_v2, %v1245_v10  ;;  %v1246_v21 = vadd.f32 %v1197_v6, %v1074_v4  ;;  %v1267_v40 = vpack.c.bf16 %v1261_v32, %v1261_v32 }
 0x22a   : > { %v1199_v9 = vpop.f32.mrf.mxu1  ;;  %v1236_v22 = vpop.f32.mrf.mxu0 }
 0x22b   : > { %v1268_v24 = vpack.c.bf16 %v1262_v18, %v1262_v18  ;;  %v1263_v60 = vmax.f32 %v1257_v19, 0.0  ;;  %v1258_v13 = vadd.f32 %v1253_v2, %v1246_v21  ;;  %v1247_v25 = vadd.f32 %v1236_v22, %v1075_v16  ;;  %v1302_v16 = vld [vmem:[%s11374_s1 + $0x14] sm:$0xf] }
 0x22c   : > { %v1200_v27 = vpop.f32.mrf.mxu1  ;;  %v1238_v26 = vpop.f32.mrf.mxu0 }
 0x22d   : > { %v1264_v29 = vmax.f32 %v1258_v13, 0.0  ;;  %v1259_v30 = vadd.f32 %v1253_v2, %v1247_v25  ;;  %v1248_v31 = vadd.f32 %v1238_v26, %v1076_v58  ;;  %1281 = vrot.lane.b32.xlu1 %v1268_v24, %s9342_s11  ;;  %v1269_v33 = vpack.c.bf16 %v1263_v60, %v1263_v60 }
 0x22e   : > { %v1240_v28 = vpop.f32.mrf.mxu0 }
 0x22f   : > { %v1270_v34 = vpack.c.bf16 %v1264_v29, %v1264_v29  ;;  %v1265_v35 = vmax.f32 %v1259_v30, 0.0  ;;  %v1260_v36 = vadd.f32 %v1253_v2, %v1248_v31 }
 0x230   : > { %v1241_v37 = vpop.f32.mrf.mxu0 }
 0x231   : > { %1283 = vrot.lane.b32.xlu1 %v1269_v33, %s9342_s11  ;;  %1285 = vrot.lane.b32.xlu0 %v1270_v34, %s9342_s11  ;;  %v1271_v38 = vpack.c.bf16 %v1265_v35, %v1265_v35  ;;  %v1266_v39 = vmax.f32 %v1260_v36, 0.0  ;;  %v1611_v34 = vld [vmem:[%s11374_s1 + $0x1c] sm:$0xf] }
 0x233   : > { %v1272_v41 = vpack.c.bf16 %v1266_v39, %v1266_v39 }
 0x235   : > { %1279 = vrot.lane.b32.xlu0 %v1267_v40, %s9342_s11  ;;  %1287 = vrot.lane.b32.xlu1 %v1271_v38, %s9342_s11 }
 0x239   : > { %1289 = vrot.lane.b32.xlu1 %v1272_v41, %s9342_s11 }
 0x29f   : > { %v1282_v42 = vpop.permute.xlu1 %1281 }
 0x2a3   : > { %v1286_v43 = vpop.permute.xlu0 %1285  ;;  %v1284_v44 = vpop.permute.xlu1 %1283 }
 0x2a4   : > { %v9670_v45 = vsel %vm1291_vm6, %v1284_v44, %v1286_v43  ;;  %v9673_v46 = vsel %vm1291_vm6, %v1282_v42, %v1284_v44 }
 0x2a5   : > { %1311 = vrot.lane.b32.xlu1 %v9670_v45, %s9338_s15  ;;  %1309 = vrot.lane.b32.xlu0 %v9673_v46, %s9338_s15  ;;  %v1477_v24 = vsel %vm1326_vm7, %v9673_v46, 0 }
 0x2a7   : > { %v1280_v47 = vpop.permute.xlu0 %1279  ;;  %v1288_v48 = vpop.permute.xlu1 %1287 }
 0x2a8   : > { %v1299_v49 = vsel %vm1291_vm6, 0, %v1280_v47  ;;  %v9681_v50 = vsel %vm1291_vm6, %v1286_v43, %v1288_v48  ;;  %v1292_v55 = vsel %vm1291_vm6, %v1280_v47, %v1282_v42 }
 0x2a9   : > { %1305 = vrot.lane.b32.xlu1 %v1299_v49, %s9338_s15  ;;  %1313 = vrot.lane.b32.xlu0 %v9681_v50, %s9338_s15  ;;  %v1471_v8 = vsel %vm1326_vm7, %v1299_v49, 0  ;;  %v1483_v58 = vsel %vm1326_vm7, %v9681_v50, 0 }
 0x2ab   : > { %v1290_v53 = vpop.permute.xlu1 %1289 }
 0x2ac   : > { %v1296_v57 = vsel %vm1291_vm6, %v1288_v48, %v1290_v53  ;;  %v1301_v59 = vsel %vm1291_vm6, %v1290_v53, 0 }
 0x2ad   : > { %1307 = vrot.lane.b32.xlu0 %v1292_v55, %s9338_s15  ;;  %1315 = vrot.lane.b32.xlu1 %v1296_v57, %s9338_s15 }
 0x2b1   : > { %1617 = vrot.lane.b32.xlu0 %v9673_v46, %s9339_s16  ;;  %1619 = vrot.lane.b32.xlu1 %v9670_v45, %s9339_s16 }
 0x2b5   : > { %1621 = vrot.lane.b32.xlu0 %v9681_v50, %s9339_s16  ;;  %1613 = vrot.lane.b32.xlu1 %v1299_v49, %s9339_s16 }
 0x2b9   : > { %1615 = vrot.lane.b32.xlu0 %v1292_v55, %s9339_s16  ;;  %1784 = vrot.lane.b32.xlu1 %v1299_v49, %s9340_s17 }
 0x2bd   : > { %1786 = vrot.lane.b32.xlu0 %v1292_v55, %s9340_s17  ;;  %1788 = vrot.lane.b32.xlu1 %v9673_v46, %s9340_s17 }
 0x2c1   : > { %1623 = vrot.lane.b32.xlu0 %v1296_v57, %s9339_s16  ;;  %1625 = vrot.lane.b32.xlu1 %v1301_v59, %s9339_s16 }
 0x2c5   : > { %1790 = vrot.lane.b32.xlu0 %v9670_v45, %s9340_s17  ;;  %1792 = vrot.lane.b32.xlu1 %v9681_v50, %s9340_s17 }
 0x2c9   : > { %1794 = vrot.lane.b32.xlu0 %v1296_v57, %s9340_s17  ;;  %1796 = vrot.lane.b32.xlu1 %v1301_v59, %s9340_s17 }
 0x2cd   : > { %2146 = vrot.lane.b32.xlu0 %v9476_v7, %s9342_s11  ;;  %2148 = vrot.lane.b32.xlu1 %v9485_v12, %s9342_s11 }
 0x2d1   : > { %2150 = vrot.lane.b32.xlu0 %v9481_v11, %s9342_s11  ;;  %2152 = vrot.lane.b32.xlu1 %v9493_v15, %s9342_s11  ;;  %v1303_v11 = vld [vmem:[%s11374_s1 + $0x18] sm:$0xf] }
 0x2d5   : > { %2154 = vrot.lane.b32.xlu0 %v9231_v61, %s9342_s11  ;;  %v8864_v61 = vld [vmem:[%s11378_s5 + $0xac] ss:$12 sps:$4 sm:$0xff]  }
 0x317   : > { %v1310_v63 = vpop.permute.xlu0 %1309  ;;  %v1312_v2 = vpop.permute.xlu1 %1311 }
 0x318   : > { %v1319_v5 = vsel %vm438_vm1, %v1310_v63, %v1312_v2 }
 0x319   : > { %v1334_v12 = vsel %vm1326_vm7, %v1319_v5, 0  ;;  %v8865_v5 = vld [vmem:[%s11378_s5 + $0x90] ss:$12 sps:$4 sm:$0xff]  }
 0x31b   : > { %v1314_v52 = vpop.permute.xlu0 %1313  ;;  %v1306_v51 = vpop.permute.xlu1 %1305 }
 0x31c   : > { %v1320_v7 = vsel %vm438_vm1, %v1312_v2, %v1314_v52  ;;  %v8867_v2 = vld [vmem:[%s11378_s5 + $0x94] ss:$12 sps:$4 sm:$0xff]  }
 0x31d   : > { %8116 = vmatprep.subr.msk.bf16.mxu0 %vm1326_vm7, %v1320_v7  ;;  %v8868_v7 = vld [vmem:[%s11378_s5 + $0x78] ss:$12 sps:$4 sm:$0xff]  }
 0x31e   : > { %1401 = vmatpush1.bf16.msra.mxu0 %v1334_v12 }
 0x31f   : > { %v1308_v15 = vpop.permute.xlu0 %1307  ;;  %8120 = vmatprep.subr.msk.bf16.mxu0 %vm1326_vm7, %v1292_v55  ;;  %v1316_v62 = vpop.permute.xlu1 %1315 }
 0x320   : > { %v1317_v1 = vsel %vm438_vm1, %v1306_v51, %v1308_v15  ;;  %v1318_v54 = vsel %vm438_vm1, %v1308_v15, %v1310_v63  ;;  %v1321_v10 = vsel %vm438_vm1, %v1314_v52, %v1316_v62  ;;  %v8862_v63 = vld [vmem:[%s11378_s5 + $0xa8] ss:$12 sps:$4 sm:$0xff]  }
 0x321   : > { %8114 = vmatprep.subr.msk.bf16.mxu1 %vm1326_vm7, %v1318_v54  ;;  %8117 = vmatmul.mubr.msk.bf16.vlgmr.msra.gmra.mxu0 %vm1322_vm8, %v1303_v11  ;;  %v1328_v4 = vsel %vm1326_vm7, %v1317_v1, 0  ;;  %v1340_v6 = vsel %vm1326_vm7, %v1321_v10, 0  ;;  %v8870_v52 = vld [vmem:[%s11378_s5 + $0x7c] ss:$12 sps:$4 sm:$0xff]   ;;  %v8879_v54 = vld [vmem:[%s11378_s5 + $0x214] ss:$12 sps:$4 sm:$0xff]  }
 0x322   : > { %1360 = vmatpush1.bf16.msra.mxu1 %v1328_v4  ;;  %1503 = vmatpush1.bf16.msra.mxu0 %v1471_v8  ;;  %v8871_v15 = vld [vmem:[%s11378_s5 + $0x228] ss:$12 sps:$4 sm:$0xff]   ;;  %v8877_v8 = vld [vmem:[%s11378_s5 + $0x210] ss:$12 sps:$4 sm:$0xff]   ;;  %v8882_v10 = vld [vmem:[%s11378_s5 + $0x4c] ss:$12 sps:$4 sm:$0xff]  }
 0x323   : > { %v1618_v14 = vpop.permute.xlu0 %1617  ;;  %8118 = vmatprep.subr.msk.bf16.mxu1 %vm1326_vm7, %v1316_v62  ;;  %8124 = vmatprep.subr.msk.bf16.mxu0 %vm1326_vm7, %v1296_v57  ;;  %v1620_v56 = vpop.permute.xlu1 %1619  ;;  %v8876_v62 = vld [vmem:[%s11378_s5 + $0x64] ss:$12 sps:$4 sm:$0xff]  }
 0x324   : > { %1520 = vmatprep.mubr.bf16.mxu0 %v9337_v20  ;;  %v1629_v60 = vsel %vm748_vm3, %v1618_v14, %v1620_v56 }
 0x325   : > { %8115 = vmatmul.mubr.msk.bf16.vlgmr.msra.gmra.mxu1 %vm1322_vm8, %v1303_v11  ;;  %v1643_v26 = vsel %vm1326_vm7, %v1629_v60, 0  ;;  %v8898_v60 = vld [vmem:[%s11378_s5] ss:$12 sps:$4 sm:$0xff]  }
 0x326   : > { %1442 = vmatpush1.bf16.msra.mxu1 %v1340_v6  ;;  %1459 = vmatprep.mubr.bf16.mxu1 %v9337_v20  ;;  %v8883_v6 = vld [vmem:[%s11378_s5 + $0x1f8] ss:$12 sps:$4 sm:$0xff]  }
 0x327   : > { %v1622_v18 = vpop.permute.xlu0 %1621  ;;  %8122 = vmatprep.subr.msk.bf16.mxu1 %vm1326_vm7, %v9670_v45  ;;  %v1614_v19 = vpop.permute.xlu1 %1613  ;;  %v1783_v45 = vld [vmem:[%s11374_s1 + $0x20] sm:$0xf] }
 0x328   : > { %v1630_v21 = vsel %vm748_vm3, %v1620_v56, %v1622_v18  ;;  %v8880_v56 = vld [vmem:[%s11378_s5 + $0x48] ss:$12 sps:$4 sm:$0xff]  }
 0x329   : > { %8121 = vmatmul.mubr.msk.bf16.vlgmr.msra.gmra.mxu0 %vm1322_vm8, %v1302_v16 }
 0x32a   : > { %1585 = vmatpush1.bf16.msra.mxu0 %v1483_v58  ;;  %1602 = vmatprep.mubr.bf16.mxu0 %v9337_v20  ;;  %v8894_v58 = vld [vmem:[%s11378_s5 + $0x1c] ss:$12 sps:$4 sm:$0xff]  }
 0x32b   : > { %8128 = vmatprep.subr.msk.bf16.mxu0 %vm1326_vm7, %v1630_v21  ;;  %v1616_v9 = vpop.permute.xlu0 %1615  ;;  %v1785_v22 = vpop.permute.xlu1 %1784  ;;  %v8889_v21 = vld [vmem:[%s11378_s5 + $0x1e0] ss:$12 sps:$4 sm:$0xff]  }
 0x32c   : > { %v1628_v23 = vsel %vm748_vm3, %v1616_v9, %v1618_v14  ;;  %v1627_v29 = vsel %vm748_vm3, %v1614_v19, %v1616_v9  ;;  %v8885_v14 = vld [vmem:[%s11378_s5 + $0x1fc] ss:$12 sps:$4 sm:$0xff]   ;;  %v8892_v9 = vld [vmem:[%s11378_s5 + $0x18] ss:$12 sps:$4 sm:$0xff]  }
 0x32d   : > { %8119 = vmatmul.mubr.msk.bf16.vlgmr.msra.gmra.mxu1 %vm1322_vm8, %v1303_v11  ;;  %v1637_v32 = vsel %vm1326_vm7, %v1627_v29, 0  ;;  %v8873_v11 = vld [vmem:[%s11378_s5 + $0x22c] ss:$12 sps:$4 sm:$0xff]   ;;  %v8886_v19 = vld [vmem:[%s11378_s5 + $0x30] ss:$12 sps:$4 sm:$0xff]  }
 0x32e   : > { %1544 = vmatpush1.bf16.msra.mxu1 %v1477_v24  ;;  %1561 = vmatprep.mubr.bf16.mxu1 %v9337_v20  ;;  %v8900_v24 = vld [vmem:[%s11378_s5 + $0x4] ss:$12 sps:$4 sm:$0xff]   ;;  %v8909_v29 = vld [vmem:[%s11378_s5 + $0x19c] ss:$12 sps:$4 sm:$0xff]  }
 0x32f   : > { %8126 = vmatprep.subr.msk.bf16.mxu1 %vm1326_vm7, %v1628_v23  ;;  %v1787_v13 = vpop.permute.xlu0 %1786  ;;  %v1789_v25 = vpop.permute.xlu1 %1788  ;;  %v8897_v23 = vld [vmem:[%s11378_s5 + $0x1cc] ss:$12 sps:$4 sm:$0xff]  }
 0x330   : > { %v1799_v27 = vsel %vm920_vm4, %v1787_v13, %v1789_v25  ;;  %v1798_v33 = vsel %vm920_vm4, %v1785_v22, %v1787_v13  ;;  %v8895_v22 = vld [vmem:[%s11378_s5 + $0x1c8] ss:$12 sps:$4 sm:$0xff]   ;;  %v8901_v13 = vld [vmem:[%s11378_s5 + $0x1b0] ss:$12 sps:$4 sm:$0xff]  }
 0x331   : > { %8125 = vmatmul.mubr.msk.bf16.vlgmr.msra.gmra.mxu0 %vm1322_vm8, %v1302_v16  ;;  %v1808_v37 = vsel %vm1326_vm7, %v1798_v33, 0  ;;  %v8915_v33 = vld [vmem:[%s11378_s5 + $0x184] ss:$12 sps:$4 sm:$0xff]  }
 0x332   : > { %1710 = vmatpush1.bf16.msra.mxu0 %v1643_v26  ;;  %1727 = vmatprep.mubr.bf16.mxu0 %v9337_v20  ;;  %v8904_v26 = vld [vmem:[%s11378_s5 + $0x168] ss:$12 sps:$4 sm:$0xff]  }
 0x333   : > { %8132 = vmatprep.subr.msk.bf16.mxu0 %vm1326_vm7, %v1799_v27  ;;  %v1624_v30 = vpop.permute.xlu0 %1623  ;;  %v1626_v31 = vpop.permute.xlu1 %1625  ;;  %v8906_v27 = vld [vmem:[%s11378_s5 + $0x16c] ss:$12 sps:$4 sm:$0xff]  }
 0x334   : > { %v1632_v28 = vsel %vm748_vm3, %v1624_v30, %v1626_v31  ;;  %v1631_v38 = vsel %vm748_vm3, %v1622_v18, %v1624_v30  ;;  %v8891_v18 = vld [vmem:[%s11378_s5 + $0x1e4] ss:$12 sps:$4 sm:$0xff]   ;;  %v8912_v31 = vld [vmem:[%s11378_s5 + $0x154] ss:$12 sps:$4 sm:$0xff]  }
 0x335   : > { %8123 = vmatmul.mubr.msk.bf16.vlgmr.msra.gmra.mxu1 %vm1322_vm8, %v1302_v16  ;;  %v1649_v42 = vsel %vm1326_vm7, %v1631_v38, 0  ;;  %v8888_v16 = vld [vmem:[%s11378_s5 + $0x34] ss:$12 sps:$4 sm:$0xff]   ;;  %v8907_v30 = vld [vmem:[%s11378_s5 + $0x198] ss:$12 sps:$4 sm:$0xff]  }
 0x336   : > { %1669 = vmatpush1.bf16.msra.mxu1 %v1637_v32  ;;  %1686 = vmatprep.mubr.bf16.mxu1 %v9337_v20  ;;  %v8913_v32 = vld [vmem:[%s11378_s5 + $0x180] ss:$12 sps:$4 sm:$0xff]   ;;  %v8924_v38 = vld [vmem:[%s11378_s5 + $0x124] ss:$12 sps:$4 sm:$0xff]  }
 0x337   : > { %8130 = vmatprep.subr.msk.bf16.mxu1 %vm1326_vm7, %v1632_v28  ;;  %v1791_v35 = vpop.permute.xlu0 %1790  ;;  %v1793_v36 = vpop.permute.xlu1 %1792  ;;  %v8910_v28 = vld [vmem:[%s11378_s5 + $0x150] ss:$12 sps:$4 sm:$0xff]  }
 0x338   : > { %v1801_v44 = vsel %vm920_vm4, %v1791_v35, %v1793_v36  ;;  %v1800_v50 = vsel %vm920_vm4, %v1789_v25, %v1791_v35  ;;  %v8903_v25 = vld [vmem:[%s11378_s5 + $0x1b4] ss:$12 sps:$4 sm:$0xff]   ;;  %v8916_v35 = vld [vmem:[%s11378_s5 + $0x138] ss:$12 sps:$4 sm:$0xff]  }
 0x339   : > { %8129 = vmatmul.mubr.msk.bf16.vlgmr.msra.gmra.mxu0 %vm1322_vm8, %v1611_v34  ;;  %v1814_v57 = vsel %vm1326_vm7, %v1800_v50, 0  ;;  %v8937_v50 = vld [vmem:[%s11378_s5 + $0x2a0] ss:$12 sps:$4 sm:$0xff]  }
 0x33a   : > { %1840 = vmatpush1.bf16.msra.mxu0 %v1808_v37  ;;  %1857 = vmatprep.mubr.bf16.mxu0 %v9337_v20  ;;  %v8919_v37 = vld [vmem:[%s11378_s5 + $0x2e8] ss:$12 sps:$4 sm:$0xff]  }
 0x33b   : > { %v1795_v39 = vpop.permute.xlu0 %1794  ;;  %v1797_v40 = vpop.permute.xlu1 %1796 }
 0x33c   : > { %v1803_v41 = vsel %vm920_vm4, %v1795_v39, %v1797_v40  ;;  %v1802_v43 = vsel %vm920_vm4, %v1793_v36, %v1795_v39  ;;  %v8921_v36 = vld [vmem:[%s11378_s5 + $0x2ec] ss:$12 sps:$4 sm:$0xff]   ;;  %v8927_v40 = vld [vmem:[%s11378_s5 + $0x2d4] ss:$12 sps:$4 sm:$0xff]  }
 0x33d   : > { %8127 = vmatmul.mubr.msk.bf16.vlgmr.msra.gmra.mxu1 %vm1322_vm8, %v1611_v34  ;;  %8136 = vmatprep.subr.msk.bf16.mxu0 %vm1326_vm7, %v1803_v41  ;;  %v1820_v49 = vsel %vm1326_vm7, %v1802_v43, 0  ;;  %v8922_v39 = vld [vmem:[%s11378_s5 + $0x120] ss:$12 sps:$4 sm:$0xff]   ;;  %v8925_v41 = vld [vmem:[%s11378_s5 + $0x2d0] ss:$12 sps:$4 sm:$0xff]  }
 0x33e   : > { %1751 = vmatpush1.bf16.msra.mxu1 %v1649_v42  ;;  %1768 = vmatprep.mubr.bf16.mxu1 %v9337_v20  ;;  %v8930_v42 = vld [vmem:[%s11378_s5 + $0x10c] ss:$12 sps:$4 sm:$0xff]   ;;  %v8928_v43 = vld [vmem:[%s11378_s5 + $0x108] ss:$12 sps:$4 sm:$0xff]  }
 0x33f   : > { %8134 = vmatprep.subr.msk.bf16.mxu1 %vm1326_vm7, %v1801_v44  ;;  %v2147_v46 = vpop.permute.xlu0 %2146  ;;  %v2149_v47 = vpop.permute.xlu1 %2148  ;;  %v8933_v44 = vld [vmem:[%s11378_s5 + $0x2bc] ss:$12 sps:$4 sm:$0xff]  }
 0x340   : > { %v9791_v48 = vsel %vm1291_vm6, %v2147_v46, %v2149_v47  ;;  %v9807_v59 = vsel %vm1291_vm6, 0.0, %v2147_v46  ;;  %v8936_v46 = vld [vmem:[%s11378_s5 + $0xf4] ss:$12 sps:$4 sm:$0xff]  }
 0x341   : > { %8133 = vmatmul.mubr.msk.bf16.vlgmr.msra.gmra.mxu0 %vm1322_vm8, %v1783_v45  ;;  %2175 = vrot.lane.b32.xlu1 %v9791_v48, %s9338_s15 }
 0x342   : > { %1922 = vmatpush1.bf16.msra.mxu0 %v1820_v49  ;;  %1939 = vmatprep.mubr.bf16.mxu0 %v9337_v20  ;;  %v8939_v49 = vld [vmem:[%s11378_s5 + $0x2a4] ss:$12 sps:$4 sm:$0xff]  }
 0x343   : > { %v2151_v53 = vpop.permute.xlu0 %2150  ;;  %v2153_v51 = vpop.permute.xlu1 %2152  ;;  %3106 = vmatprep.subr.bf16.mxu0 %v8873_v11  ;;  %v8957_v11 = vld [vmem:[%s11378_s5 + $0x25c] ss:$12 sps:$4 sm:$0xff]  }
 0x344   : > { %v9800_v55 = vsel %vm1291_vm6, %v2149_v47, %v2151_v53  ;;  %v9858_v1 = vsel %vm1291_vm6, %v2151_v53, %v2153_v51  ;;  %v8934_v47 = vld [vmem:[%s11378_s5 + $0xf0] ss:$12 sps:$4 sm:$0xff]  }
 0x345   : > { %8131 = vmatmul.mubr.msk.bf16.vlgmr.msra.gmra.mxu1 %vm1322_vm8, %v1611_v34  ;;  %2177 = vrot.lane.b32.xlu0 %v9800_v55, %s9338_s15  ;;  %v8918_v34 = vld [vmem:[%s11378_s5 + $0x13c] ss:$12 sps:$4 sm:$0xff]  }
 0x346   : > { %1881 = vmatpush1.bf16.msra.mxu1 %v1814_v57  ;;  %2173 = vrot.lane.b32.xlu1 %v9807_v59, %s9338_s15  ;;  %v8942_v53 = vld [vmem:[%s11378_s5 + $0xdc] ss:$12 sps:$4 sm:$0xff]   ;;  %v8940_v57 = vld [vmem:[%s11378_s5 + $0xd8] ss:$12 sps:$4 sm:$0xff]  }
 0x347   : > { %1898 = vmatprep.mubr.bf16.mxu1 %v9337_v20  ;;  %3063 = vmatprep.subr.bf16.mxu1 %v8864_v61  ;;  %v9844_v12 = vpop.permute.xlu0 %2154  ;;  %v8945_v61 = vld [vmem:[%s11378_s5 + $0x28c] ss:$12 sps:$4 sm:$0xff]  }
 0x348   : > { %v9867_v4 = vsel %vm1291_vm6, %v2153_v51, %v9844_v12  ;;  %v8949_v51 = vld [vmem:[%s11378_s5 + $0x270] ss:$12 sps:$4 sm:$0xff]  }
 0x349   : > { %8137 = vmatmul.mubr.msk.bf16.vlgmr.msra.gmra.mxu0 %vm1322_vm8, %v1783_v45  ;;  %2206 = vrot.lane.b32.xlu0 %v9791_v48, %s9339_s16 }
 0x34a   : > { %2208 = vrot.lane.b32.xlu1 %v9800_v55, %s9339_s16  ;;  %3107 = vmatpush1.bf16.msra.mxu0 %v8871_v15  ;;  %v8955_v15 = vld [vmem:[%s11378_s5 + $0x258] ss:$12 sps:$4 sm:$0xff]  }
 0x34b   : > { %3108 = vmatprep.subr.bf16.mxu0 %v8879_v54  ;;  %v8961_v54 = vld [vmem:[%s11378_s5 + $0x240] ss:$12 sps:$4 sm:$0xff]  }
 0x34d   : > { %8135 = vmatmul.mubr.msk.bf16.vlgmr.msra.gmra.mxu1 %vm1322_vm8, %v1783_v45  ;;  %2204 = vrot.lane.b32.xlu0 %v9807_v59, %s9339_s16  ;;  %v8931_v45 = vld [vmem:[%s11378_s5 + $0x2b8] ss:$12 sps:$4 sm:$0xff]  }
 0x34e   : > { %2239 = vrot.lane.b32.xlu1 %v9791_v48, %s9340_s17  ;;  %3064 = vmatpush1.bf16.msra.mxu1 %v8862_v63  ;;  %v8943_v63 = vld [vmem:[%s11378_s5 + $0x288] ss:$12 sps:$4 sm:$0xff]  }
 0x34f   : > { %3065 = vmatprep.subr.bf16.mxu1 %v8867_v2  ;;  %3109 = vmatpush1.bf16.msra.mxu0 %v8877_v8  ;;  %v8948_v2 = vld [vmem:[%s11378_s5 + $0xc4] ss:$12 sps:$4 sm:$0xff]  }
 0x350   : > { %3110 = vmatprep.subr.bf16.mxu0 %v8885_v14 }
 0x351   : > { %2241 = vrot.lane.b32.xlu0 %v9800_v55, %s9340_s17 }
 0x352   : > { %2237 = vrot.lane.b32.xlu1 %v9807_v59, %s9340_s17  ;;  %3066 = vmatpush1.bf16.msra.mxu1 %v8865_v5  ;;  %v8946_v5 = vld [vmem:[%s11378_s5 + $0xc0] ss:$12 sps:$4 sm:$0xff]  }
 0x353   : > { %3067 = vmatprep.subr.bf16.mxu1 %v8870_v52  ;;  %3111 = vmatpush1.bf16.msra.mxu0 %v8883_v6  ;;  %v8951_v52 = vld [vmem:[%s11378_s5 + $0x274] ss:$12 sps:$4 sm:$0xff]  }
 0x354   : > { %3112 = vmatprep.subr.bf16.mxu0 %v8891_v18 }
 0x355   : > { %2156 = vrot.lane.b32.xlu0 %v9497_v17, %s9342_s11  ;;  %v8874_v17 = vld [vmem:[%s11378_s5 + $0x60] ss:$12 sps:$4 sm:$0xff]  }
 0x356   : > { %2179 = vrot.lane.b32.xlu1 %v9858_v1, %s9338_s15  ;;  %3068 = vmatpush1.bf16.msra.mxu1 %v8868_v7  ;;  %v8954_v7 = vld [vmem:[%s11378_s5 + $0x3ac] ss:$12 sps:$4 sm:$0xff]  }
 0x357   : > { %3069 = vmatprep.subr.bf16.mxu1 %v8876_v62  ;;  %3113 = vmatpush1.bf16.msra.mxu0 %v8889_v21  ;;  %v8963_v62 = vld [vmem:[%s11378_s5 + $0x244] ss:$12 sps:$4 sm:$0xff]  }
 0x358   : > { %3114 = vmatprep.subr.bf16.mxu0 %v8897_v23 }
 0x359   : > { %2181 = vrot.lane.b32.xlu0 %v9867_v4, %s9338_s15 }
 0x35a   : > { %2210 = vrot.lane.b32.xlu1 %v9858_v1, %s9339_s16  ;;  %3070 = vmatpush1.bf16.msra.mxu1 %v8874_v17  ;;  %v8967_v17 = vld [vmem:[%s11378_s5 + $0x170] ss:$12 sps:$4 sm:$0xff]  }
 0x35b   : > { %3071 = vmatprep.subr.bf16.mxu1 %v8882_v10  ;;  %3115 = vmatpush1.bf16.msra.mxu0 %v8895_v22 }
 0x35c   : > { %3116 = vmatprep.subr.bf16.mxu0 %v8903_v25 }
 0x35d   : > { %2212 = vrot.lane.b32.xlu0 %v9867_v4, %s9339_s16 }
 0x35e   : > { %2243 = vrot.lane.b32.xlu1 %v9858_v1, %s9340_s17  ;;  %3072 = vmatpush1.bf16.msra.mxu1 %v8880_v56 }
 0x35f   : > { %3073 = vmatprep.subr.bf16.mxu1 %v8888_v16  ;;  %3117 = vmatpush1.bf16.msra.mxu0 %v8901_v13 }
 0x360   : > { %3118 = vmatprep.subr.bf16.mxu0 %v8909_v29 }
 0x361   : > { %2245 = vrot.lane.b32.xlu0 %v9867_v4, %s9340_s17 }
 0x362   : > { %3074 = vmatpush1.bf16.msra.mxu1 %v8886_v19  ;;  %v3315_v19 = vld [vmem:[%s11375_s2 + $0x8] sm:$0xff] }
 0x363   : > { %3075 = vmatprep.subr.bf16.mxu1 %v8894_v58  ;;  %3119 = vmatpush1.bf16.msra.mxu0 %v8907_v30 }
 0x364   : > { %3120 = vmatprep.subr.bf16.mxu0 %v8915_v33 }
 0x366   : > { %3076 = vmatpush1.bf16.msra.mxu1 %v8892_v9 }
 0x367   : > { %3077 = vmatprep.subr.bf16.mxu1 %v8900_v24  ;;  %3121 = vmatpush1.bf16.msra.mxu0 %v8913_v32 }
 0x368   : > { %3122 = vmatprep.subr.bf16.mxu0 %v8921_v36 }
 0x36a   : > { %3078 = vmatpush1.bf16.msra.mxu1 %v8898_v60 }
 0x36b   : > { %3079 = vmatprep.subr.bf16.mxu1 %v8906_v27  ;;  %3123 = vmatpush2.bf16.msra.mxu0 %v8919_v37 }
 0x36c   : > { %3124 = vmatprep.subr.bf16.mxu0 %v8927_v40 }
 0x36e   : > { %3080 = vmatpush2.bf16.msra.mxu1 %v8904_v26 }
 0x36f   : > { %3081 = vmatprep.subr.bf16.mxu1 %v8912_v31  ;;  %3125 = vmatpush2.bf16.msra.mxu0 %v8925_v41 }
 0x370   : > { %3126 = vmatprep.subr.bf16.mxu0 %v8933_v44 }
 0x372   : > { %3082 = vmatpush2.bf16.msra.mxu1 %v8910_v28 }
 0x373   : > { %3083 = vmatprep.subr.bf16.mxu1 %v8918_v34  ;;  %3127 = vmatpush2.bf16.msra.mxu0 %v8931_v45 }
 0x374   : > { %3128 = vmatprep.subr.bf16.mxu0 %v8939_v49 }
 0x376   : > { %3084 = vmatpush2.bf16.msra.mxu1 %v8916_v35 }
 0x377   : > { %3085 = vmatprep.subr.bf16.mxu1 %v8924_v38  ;;  %3129 = vmatpush2.bf16.msra.mxu0 %v8937_v50 }
 0x378   : > { %3130 = vmatprep.subr.bf16.mxu0 %v8945_v61 }
 0x37a   : > { %3086 = vmatpush2.bf16.msra.mxu1 %v8922_v39 }
 0x37b   : > { %3087 = vmatprep.subr.bf16.mxu1 %v8930_v42  ;;  %3131 = vmatpush2.bf16.msra.mxu0 %v8943_v63 }
 0x37c   : > { %3132 = vmatprep.subr.bf16.mxu0 %v8951_v52 }
 0x37e   : > { %3088 = vmatpush2.bf16.msra.mxu1 %v8928_v43 }
 0x37f   : > { %3089 = vmatprep.subr.bf16.mxu1 %v8936_v46  ;;  %3133 = vmatpush2.bf16.msra.mxu0 %v8949_v51 }
 0x380   : > { %3134 = vmatprep.subr.bf16.mxu0 %v8957_v11 }
 0x382   : > { %3090 = vmatpush2.bf16.msra.mxu1 %v8934_v47 }
 0x383   : > { %3091 = vmatprep.subr.bf16.mxu1 %v8942_v53  ;;  %3135 = vmatpush2.bf16.msra.mxu0 %v8955_v15 }
 0x384   : > { %3136 = vmatprep.subr.bf16.mxu0 %v8963_v62 }
 0x386   : > { %3092 = vmatpush2.bf16.msra.mxu1 %v8940_v57 }
 0x387   : > { %3093 = vmatprep.subr.bf16.mxu1 %v8948_v2  ;;  %3137 = vmatpush2.bf16.msra.mxu0 %v8961_v54 }
 0x388   : > { %8502 = vmatprep.subr.bf16.mxu0 %v8967_v17 }
 0x38a   : > { %3094 = vmatpush2.bf16.msra.mxu1 %v8946_v5 }
 0x38b   : > { %3149 = vmatprep.subr.bf16.mxu1 %v8954_v7 }
 0x3b7   : > { %v10047_v8 = vpop.permute.xlu0 %2177 }
 0x3bb   : > { %v2207_v10 = vpop.permute.xlu0 %2206 }
 0x3bf   : > { %v2205_v14 = vpop.permute.xlu0 %2204 }
 0x3c0   : > { %v2219_v5 = vsel %vm748_vm3, %v2205_v14, %v2207_v10 }
 0x3c3   : > { %v10049_v56 = vpop.permute.xlu0 %2241 }
 0x3c7   : > { %v2157_v6 = vpop.permute.xlu0 %2156 }
 0x3c8   : > { %v10053_v16 = vsel %vm1291_vm6, %v9844_v12, %v2157_v6  ;;  %v2171_v18 = vsel %vm1291_vm6, %v2157_v6, 0.0  ;;  %v2176_v12 = vpop.permute.xlu1 %2175 }
 0x3c9   : > { %2214 = vrot.lane.b32.xlu0 %v10053_v16, %s9339_s16  ;;  %2183 = vrot.lane.b32.xlu1 %v10053_v16, %s9338_s15  ;;  %v2187_v45 = vsel %vm438_vm1, %v2176_v12, %v10047_v8 }
 0x3ca   : > { %v2198_v2 = vadd.f32 %v2187_v45, %v9791_v48 }
 0x3cb   : > { %v10084_v53 = vpop.permute.xlu0 %2181 }
 0x3cc   : > { %v2174_v58 = vpop.permute.xlu1 %2173 }
 0x3cd   : > { %2247 = vrot.lane.b32.xlu0 %v10053_v16, %s9340_s17  ;;  %2216 = vrot.lane.b32.xlu1 %v2171_v18, %s9339_s16  ;;  %v2186_v49 = vsel %vm438_vm1, %v2174_v58, %v2176_v12 }
 0x3ce   : > { %v2197_v52 = vadd.f32 %v2186_v49, %v9807_v59 }
 0x3cf   : > { %v10096_v58 = vpop.permute.xlu0 %2212 }
 0x3d0   : > { %v10071_v13 = vpop.permute.xlu1 %2208  ;;  %v2231_v54 = vadd.f32 %v2219_v5, %v2197_v52 }
 0x3d1   : > { %3318 = vperm.xlu0 %8859, %v3315_v19   ;;  %2249 = vrot.lane.b32.xlu1 %v2171_v18, %s9340_s17  ;;  %v2220_v57 = vsel %vm748_vm3, %v2207_v10, %v10071_v13 }
 0x3d2   : > { %v2232_v15 = vadd.f32 %v2220_v57, %v2198_v2 }
 0x3d4   : > { %v2240_v28 = vpop.permute.xlu1 %2239 }
 0x3d5   : > { %v2253_v51 = vsel %vm920_vm4, %v2240_v28, %v10049_v56 }
 0x3d6   : > { %v2265_v19 = vadd.f32 %v2253_v51, %v2232_v15 }
 0x3d8   : > { %v2238_v39 = vpop.permute.xlu1 %2237 }
 0x3d9   : > { %v2252_v62 = vsel %vm920_vm4, %v2238_v39, %v2240_v28 }
 0x3da   : > { %v2264_v10 = vadd.f32 %v2252_v62, %v2231_v54 }
 0x3dc   : > { %v2180_v50 = vpop.permute.xlu1 %2179  ;;  %v2270_v28 = vmul.f32 0.25, %v2264_v10 }
 0x3e0   : > { %v2211_v12 = vpop.permute.xlu1 %2210 }
 0x3e1   : > { %v10067_v21 = vpop.f32.mrf.mxu0  ;;  %v2222_v39 = vsel %vm748_vm3, %v2211_v12, %v10096_v58 }
 0x3e3   : > { %v10069_v9 = vpop.f32.mrf.mxu0 }
 0x3e5   : > { %v1379_v22 = vpop.f32.mrf.mxu1  ;;  %v1424_v23 = vpop.f32.mrf.mxu0 }
 0x3e7   : > { %v1381_v24 = vpop.f32.mrf.mxu1  ;;  %v1425_v60 = vpop.f32.mrf.mxu0 }
 0x3e9   : > { %v1383_v25 = vpop.f32.mrf.mxu1  ;;  %v1522_v27 = vpop.f32.mrf.mxu0 }
 0x3ea   : > { %v1523_v17 = vadd.f32 %v1522_v27, %v1379_v22  ;;  %v2189_v22 = vsel %vm438_vm1, %v2180_v50, %v10084_v53 }
 0x3eb   : > { %v1384_v26 = vpop.f32.mrf.mxu1  ;;  %v1524_v29 = vpop.f32.mrf.mxu0 }
 0x3ec   : > { %v1525_v48 = vadd.f32 %v1524_v29, %v1381_v24  ;;  %v2244_v24 = vpop.permute.xlu1 %2243  ;;  %v10102_v29 = vpop.permute.xlu0 %2245 }
 0x3ed   : > { %v1461_v30 = vpop.f32.mrf.mxu1  ;;  %v1526_v31 = vpop.f32.mrf.mxu0  ;;  %v2254_v5 = vsel %vm920_vm4, %v10049_v56, %v2244_v24 }
 0x3ef   : > { %v1463_v32 = vpop.f32.mrf.mxu1  ;;  %v1527_v33 = vpop.f32.mrf.mxu0 }
 0x3f1   : > { %v1465_v34 = vpop.f32.mrf.mxu1  ;;  %v1604_v35 = vpop.f32.mrf.mxu0 }
 0x3f2   : > { %v1605_v36 = vadd.f32 %v1604_v35, %v1461_v30  ;;  %v2188_v34 = vsel %vm438_vm1, %v10047_v8, %v2180_v50  ;;  %v8960_v8 = vld [vmem:[%s11378_s5 + $0x394] ss:$12 sps:$4 sm:$0xff]   ;;  %v2255_v50 = vsel %vm920_vm4, %v2244_v24, %v10102_v29  ;;  %v9343_v24 = vmov 65535  }
 0x3f3   : > { %v1466_v37 = vpop.f32.mrf.mxu1  ;;  %v1606_v38 = vpop.f32.mrf.mxu0  ;;  %v2199_v49 = vadd.f32 %v2188_v34, %v9800_v55  ;;  %v8983_v34 = vld [vmem:[%s11378_s5 + $0x68] ss:$12 sps:$4 sm:$0xff]  }
 0x3f4   : > { %v10073_v40 = vadd.f32 %v1606_v38, %v1463_v32  ;;  %v2271_v32 = vmul.f32 0.25, %v2265_v19  ;;  %v8952_v38 = vld [vmem:[%s11378_s5 + $0x3a8] ss:$12 sps:$4 sm:$0xff]   ;;  %v8971_v19 = vld [vmem:[%s11378_s5 + $0x364] ss:$12 sps:$4 sm:$0xff]  }
 0x3f5   : > { %v10075_v41 = vpop.f32.mrf.mxu1  ;;  %v1608_v42 = vpop.f32.mrf.mxu0 }
 0x3f6   : > { %v1564_v55 = vadd.f32 %v10075_v41, %v10067_v21  ;;  %v8964_v21 = vld [vmem:[%s11378_s5 + $0x378] ss:$12 sps:$4 sm:$0xff]  }
 0x3f7   : > { %v10077_v43 = vpop.f32.mrf.mxu1  ;;  %v1609_v44 = vpop.f32.mrf.mxu0 }
 0x3f8   : > { %v1566_v56 = vadd.f32 %v10077_v43, %v10069_v9 }
 0x3f9   : > { %v1567_v46 = vpop.f32.mrf.mxu1  ;;  %v10081_v47 = vpop.f32.mrf.mxu0 }
 0x3fa   : > { %v2200_v46 = vadd.f32 %v2189_v22, %v9858_v1  ;;  %v8958_v1 = vld [vmem:[%s11378_s5 + $0x390] ss:$12 sps:$4 sm:$0xff]   ;;  %v1779_v62 = vadd.f32 %v10081_v47, %v1564_v55  ;;  %v9001_v55 = vld [vmem:[%s11378_s5 + $0x454] ss:$12 sps:$4 sm:$0xff]  }
 0x3fb   : > { %v1568_v61 = vpop.f32.mrf.mxu1  ;;  %v10088_v63 = vpop.f32.mrf.mxu0  ;;  %v8979_v22 = vld [vmem:[%s11378_s5 + $0x330] ss:$12 sps:$4 sm:$0xff]  }
 0x3fc   : > { %v2234_v2 = vadd.f32 %v2222_v39, %v2200_v46  ;;  %v8987_v39 = vld [vmem:[%s11378_s5 + $0x110] ss:$12 sps:$4 sm:$0xff]  }
 0x3fd   : > { %v1688_v7 = vpop.f32.mrf.mxu1  ;;  %v1733_v11 = vpop.f32.mrf.mxu0 }
 0x3fe   : > { %v1777_v14 = vadd.f32 %v1688_v7, %v1523_v17  ;;  %v8966_v7 = vld [vmem:[%s11378_s5 + $0x37c] ss:$12 sps:$4 sm:$0xff]   ;;  %v2267_v11 = vadd.f32 %v2255_v50, %v2234_v2  ;;  %v8992_v50 = vld [vmem:[%s11378_s5 + $0xf8] ss:$12 sps:$4 sm:$0xff]  }
 0x3ff   : > { %v1690_v6 = vpop.f32.mrf.mxu1  ;;  %v1734_v18 = vpop.f32.mrf.mxu0 }
 0x400   : > { %v1778_v60 = vadd.f32 %v1690_v6, %v1525_v48  ;;  %v1780_v6 = vadd.f32 %v10088_v63, %v1566_v56  ;;  %v8968_v63 = vld [vmem:[%s11378_s5 + $0xb0] ss:$12 sps:$4 sm:$0xff]  }
 0x401   : > { %v1692_v59 = vpop.f32.mrf.mxu1  ;;  %v1859_v23 = vpop.f32.mrf.mxu0  ;;  %v9006_v56 = vld [vmem:[%s11378_s5 + $0x43c] ss:$12 sps:$4 sm:$0xff]  }
 0x402   : > { %v1948_v25 = vadd.f32 %v1859_v23, %v1777_v14  ;;  %v8969_v59 = vld [vmem:[%s11378_s5 + $0x360] ss:$12 sps:$4 sm:$0xff]   ;;  %v8972_v23 = vld [vmem:[%s11378_s5 + $0x158] ss:$12 sps:$4 sm:$0xff]  }
 0x403   : > { %v1693_v26 = vpop.f32.mrf.mxu1  ;;  %v1861_v30 = vpop.f32.mrf.mxu0 }
 0x404   : > { %v1949_v31 = vadd.f32 %v1861_v30, %v1778_v60  ;;  %v10111_v42 = vpack.c.bf16 %v2270_v28, %v1948_v25  ;;  %v8976_v25 = vld [vmem:[%s11378_s5 + $0x34c] ss:$12 sps:$4 sm:$0xff]   ;;  %v8974_v30 = vld [vmem:[%s11378_s5 + $0x348] ss:$12 sps:$4 sm:$0xff]  }
 0x405   : > { %v1770_v27 = vpop.f32.mrf.mxu1  ;;  %v1863_v33 = vpop.f32.mrf.mxu0  ;;  %v8973_v26 = vld [vmem:[%s11378_s5 + $0x98] ss:$12 sps:$4 sm:$0xff]   ;;  %v8978_v28 = vld [vmem:[%s11378_s5 + $0x80] ss:$12 sps:$4 sm:$0xff]  }
 0x406   : > { %v2277_v35 = vpack.c.bf16 %v2271_v32, %v1949_v31  ;;  %v10104_v37 = vadd.f32 %v1770_v27, %v1605_v36  ;;  %v2221_v36 = vsel %vm748_vm3, %v10071_v13, %v2211_v12  ;;  %v2273_v12 = vmul.f32 0.25, %v2267_v11  ;;  %v8977_v31 = vld [vmem:[%s11378_s5 + $0x140] ss:$12 sps:$4 sm:$0xff]   ;;  %v8982_v27 = vld [vmem:[%s11378_s5 + $0x128] ss:$12 sps:$4 sm:$0xff]  }
 0x407   : > { %v10113_v44 = vpop.f32.mrf.mxu1  ;;  %v1864_v45 = vpop.f32.mrf.mxu0  ;;  %v2233_v13 = vadd.f32 %v2221_v36, %v2199_v49  ;;  %v8981_v32 = vld [vmem:[%s11378_s5 + $0x334] ss:$12 sps:$4 sm:$0xff]   ;;  %v8986_v33 = vld [vmem:[%s11378_s5 + $0x31c] ss:$12 sps:$4 sm:$0xff]  }
 0x408   : > { %3095 = vmatprep.mubr.bf16.mxu1 %v2277_v35  ;;  %v8991_v45 = vld [vmem:[%s11378_s5 + $0x304] ss:$12 sps:$4 sm:$0xff]   ;;  %v8989_v49 = vld [vmem:[%s11378_s5 + $0x300] ss:$12 sps:$4 sm:$0xff]   ;;  %v9002_v11 = vld [vmem:[%s11378_s5 + $0xc8] ss:$12 sps:$4 sm:$0xff]  }
 0x409   : > { %v1774_v57 = vpop.f32.mrf.mxu1  ;;  %v10124_v61 = vpop.f32.mrf.mxu0  ;;  %3096 = vmatmul.mubr.bf16.vlgmr.msra.gmra.mxu1 %v10111_v42  ;;  %v2266_v15 = vadd.f32 %v2254_v5, %v2233_v13  ;;  %v8988_v36 = vld [vmem:[%s11378_s5 + $0x50] ss:$12 sps:$4 sm:$0xff]   ;;  %v8993_v5 = vld [vmem:[%s11378_s5 + $0x38] ss:$12 sps:$4 sm:$0xff]   ;;  %v8997_v13 = vld [vmem:[%s11378_s5 + $0xe0] ss:$12 sps:$4 sm:$0xff]  }
 0x40a   : > { %3150 = vmatpush1.bf16.msra.mxu1 %v8952_v38  ;;  %v8984_v38 = vld [vmem:[%s11378_s5 + $0x318] ss:$12 sps:$4 sm:$0xff]   ;;  %v8994_v57 = vld [vmem:[%s11378_s5 + $0x468] ss:$12 sps:$4 sm:$0xff]  }
 0x40b   : > { %v1775_v52 = vpop.f32.mrf.mxu1  ;;  %v10134_v51 = vpop.f32.mrf.mxu0  ;;  %3151 = vmatprep.subr.bf16.mxu1 %v8960_v8  ;;  %v2272_v47 = vmul.f32 0.25, %v2266_v15  ;;  %v8996_v8 = vld [vmem:[%s11378_s5 + $0x46c] ss:$12 sps:$4 sm:$0xff]   ;;  %v9003_v15 = vld [vmem:[%s11378_s5 + $0x8] ss:$12 sps:$4 sm:$0xff]  }
 0x40c   : > { %v8998_v52 = vld [vmem:[%s11378_s5 + $0x20] ss:$12 sps:$4 sm:$0xff]  }
 0x40d   : > { %v1900_v54 = vpop.f32.mrf.mxu1  ;;  %v1945_v17 = vpop.f32.mrf.mxu0 }
 0x40e   : > { %3152 = vmatpush1.bf16.msra.mxu1 %v8958_v1  ;;  %v1950_v41 = vadd.f32 %v1900_v54, %v1779_v62  ;;  %v9004_v62 = vld [vmem:[%s11378_s5 + $0x438] ss:$12 sps:$4 sm:$0xff]   ;;  %v9007_v54 = vld [vmem:[%s11378_s5 + $0x2f0] ss:$12 sps:$4 sm:$0xff]  }
 0x40f   : > { %v1902_v18 = vpop.f32.mrf.mxu1  ;;  %3153 = vmatprep.subr.bf16.mxu1 %v8966_v7  ;;  %v1946_v9 = vpop.f32.mrf.mxu0  ;;  %v8999_v7 = vld [vmem:[%s11378_s5 + $0x450] ss:$12 sps:$4 sm:$0xff]  }
 0x410   : > { %v1951_v43 = vadd.f32 %v1902_v18, %v1780_v6  ;;  %v10154_v14 = vpack.c.bf16 %v2272_v47, %v1950_v41  ;;  %v9011_v17 = vld [vmem:[%s11378_s5 + $0x424] ss:$12 sps:$4 sm:$0xff]   ;;  %v9016_v18 = vld [vmem:[%s11378_s5 + $0x40c] ss:$12 sps:$4 sm:$0xff]   ;;  %v9014_v9 = vld [vmem:[%s11378_s5 + $0x408] ss:$12 sps:$4 sm:$0xff]  }
 0x411   : > { %v1904_v48 = vpop.f32.mrf.mxu1  ;;  %v9008_v6 = vld [vmem:[%s11378_s5 + $0x230] ss:$12 sps:$4 sm:$0xff]   ;;  %v9012_v41 = vld [vmem:[%s11378_s5 + $0x2d8] ss:$12 sps:$4 sm:$0xff]  }
 0x412   : > { %v10149_v10 = vpack.c.bf16 %v2273_v12, %v1951_v43  ;;  %3154 = vmatpush1.bf16.msra.mxu1 %v8964_v21  ;;  %v9009_v21 = vld [vmem:[%s11378_s5 + $0x420] ss:$12 sps:$4 sm:$0xff]  }
 0x413   : > { %3155 = vmatprep.subr.bf16.mxu1 %v8971_v19  ;;  %v1905_v60 = vpop.f32.mrf.mxu1  ;;  %v9013_v19 = vld [vmem:[%s11378_s5 + $0x218] ss:$12 sps:$4 sm:$0xff]   ;;  %v9017_v43 = vld [vmem:[%s11378_s5 + $0x2c0] ss:$12 sps:$4 sm:$0xff]  }
 0x414   : > { %3138 = vmatprep.mubr.bf16.mxu0 %v10149_v10  ;;  %v9018_v12 = vld [vmem:[%s11378_s5 + $0x200] ss:$12 sps:$4 sm:$0xff]  }
 0x415   : > { %3139 = vmatmul.mubr.bf16.vlgmr.msra.gmra.mxu0 %v10154_v14 }
 0x416   : > { %8503 = vmatpush3.bf16.msra.mxu0 %v8968_v63  ;;  %3224 = vmatprep.mubr.bf16.mxu0 %v2277_v35  ;;  %v3052_v35 = vsel %vm3050_vm9, 4294967295, %v9343_v24  ;;  %v9022_v63 = vld [vmem:[%s11378_s5 + $0x2a8] ss:$12 sps:$4 sm:$0xff]   ;;  %v9028_v24 = vld [vmem:[%s11378_s5 + $0x1d0] ss:$12 sps:$4 sm:$0xff]   ;;  %vm6327_vm9 = vcmask 785408  }
 0x417   : > { %3156 = vmatpush1.bf16.msra.mxu1 %v8969_v59  ;;  %8504 = vmatprep.subr.bf16.mxu0 %v8972_v23  ;;  %v10206_v46 = vsel %vm3051_vm10, %v3052_v35, 0  ;;  %v9026_v23 = vld [vmem:[%s11378_s5 + $0x3dc] ss:$12 sps:$4 sm:$0xff]   ;;  %vm6632_vm10 = vcmask 195584  }
 0x418   : > { %3157 = vmatprep.subr.bf16.mxu1 %v8976_v25  ;;  %v3058_v2 = vand.u32 %v8996_v8, %v10206_v46  ;;  %v3055_v1 = vand.u32 %v8994_v57, %v10206_v46  ;;  %v1782_v8 = vadd.f32 %v10113_v44, %v10073_v40  ;;  %v9036_v44 = vld [vmem:[%s11378_s5 + $0x3b0] ss:$12 sps:$4 sm:$0xff]  }
 0x41a   : > { %8505 = vmatpush3.bf16.msra.mxu0 %v8973_v26  ;;  %v9023_v26 = vld [vmem:[%s11378_s5 + $0x1e8] ss:$12 sps:$4 sm:$0xff]   ;;  %v1953_v57 = vadd.f32 %v10134_v51, %v1782_v8  ;;  %v9037_v51 = vld [vmem:[%s11378_s5 + $0x1a0] ss:$12 sps:$4 sm:$0xff]  }
 0x41b   : > { %3158 = vmatpush1.bf16.msra.mxu1 %v8974_v30  ;;  %8506 = vmatprep.subr.bf16.mxu0 %v8977_v31 }
 0x41c   : > { %3159 = vmatprep.subr.bf16.mxu1 %v8981_v32 }
 0x41e   : > { %8507 = vmatpush3.bf16.msra.mxu0 %v8978_v28 }
 0x41f   : > { %3160 = vmatpush1.bf16.msra.mxu1 %v8979_v22  ;;  %8508 = vmatprep.subr.bf16.mxu0 %v8982_v27  ;;  %v9031_v22 = vld [vmem:[%s11378_s5 + $0x3c4] ss:$12 sps:$4 sm:$0xff]  }
 0x420   : > { %3161 = vmatprep.subr.bf16.mxu1 %v8986_v33  ;;  %v9034_v27 = vld [vmem:[%s11378_s5 + $0x470] ss:$12 sps:$4 sm:$0xff]  }
 0x422   : > { %8509 = vmatpush3.bf16.msra.mxu0 %v8983_v34 }
 0x423   : > { %3162 = vmatpush1.bf16.msra.mxu1 %v8984_v38  ;;  %8510 = vmatprep.subr.bf16.mxu0 %v8987_v39  ;;  %v9029_v38 = vld [vmem:[%s11378_s5 + $0x3c0] ss:$12 sps:$4 sm:$0xff]   ;;  %v9032_v39 = vld [vmem:[%s11378_s5 + $0x278] ss:$12 sps:$4 sm:$0xff]  }
 0x424   : > { %3163 = vmatprep.subr.bf16.mxu1 %v8991_v45  ;;  %v3061_v45 = vand.u32 %v9034_v27, %v10206_v46 }
 0x426   : > { %8511 = vmatpush3.bf16.msra.mxu0 %v8988_v36 }
 0x427   : > { %3164 = vmatpush1.bf16.msra.mxu1 %v8989_v49  ;;  %8512 = vmatprep.subr.bf16.mxu0 %v8992_v50  ;;  %v9033_v50 = vld [vmem:[%s11378_s5 + $0x1b8] ss:$12 sps:$4 sm:$0xff]  }
 0x428   : > { %3165 = vmatprep.subr.bf16.mxu1 %v3058_v2 }
 0x42a   : > { %8513 = vmatpush3.bf16.msra.mxu0 %v8993_v5  ;;  %v9035_v5 = vld [vmem:[%s11378_s5 + $0x260] ss:$12 sps:$4 sm:$0xff]  }
 0x42b   : > { %3166 = vmatpush2.bf16.msra.mxu1 %v3055_v1  ;;  %8514 = vmatprep.subr.bf16.mxu0 %v8997_v13  ;;  %v1952_v1 = vadd.f32 %v10124_v61, %v10104_v37  ;;  %v9039_v37 = vld [vmem:[%s11378_s5 + $0x248] ss:$12 sps:$4 sm:$0xff]   ;;  %v9040_v61 = vld [vmem:[%s11378_s5 + $0x398] ss:$12 sps:$4 sm:$0xff]  }
 0x42c   : > { %3167 = vmatprep.subr.bf16.mxu1 %v9001_v55  ;;  %v9038_v55 = vld [vmem:[%s11378_s5 + $0x458] ss:$12 sps:$4 sm:$0xff]  }
 0x42e   : > { %8515 = vmatpush3.bf16.msra.mxu0 %v8998_v52  ;;  %v9041_v52 = vld [vmem:[%s11378_s5 + $0x188] ss:$12 sps:$4 sm:$0xff]  }
 0x42f   : > { %3168 = vmatpush2.bf16.msra.mxu1 %v8999_v7  ;;  %8516 = vmatprep.subr.bf16.mxu0 %v9002_v11  ;;  %v9042_v7 = vld [vmem:[%s11378_s5 + $0x440] ss:$12 sps:$4 sm:$0xff]  }
 0x430   : > { %3169 = vmatprep.subr.bf16.mxu1 %v9006_v56  ;;  %v9043_v11 = vld [vmem:[%s11378_s5 + $0x380] ss:$12 sps:$4 sm:$0xff]   ;;  %v9044_v56 = vld [vmem:[%s11378_s5 + $0x428] ss:$12 sps:$4 sm:$0xff]  }
 0x432   : > { %8517 = vmatpush3.bf16.msra.mxu0 %v9003_v15  ;;  %v9045_v15 = vld [vmem:[%s11378_s5 + $0x368] ss:$12 sps:$4 sm:$0xff]  }
 0x433   : > { %3170 = vmatpush2.bf16.msra.mxu1 %v9004_v62  ;;  %8524 = vmatprep.subr.bf16.mxu0 %v9007_v54  ;;  %v9046_v62 = vld [vmem:[%s11378_s5 + $0x410] ss:$12 sps:$4 sm:$0xff]  }
 0x434   : > { %3171 = vmatprep.subr.bf16.mxu1 %v9011_v17  ;;  %v9047_v54 = vld [vmem:[%s11378_s5 + $0x350] ss:$12 sps:$4 sm:$0xff]   ;;  %v9049_v17 = vld [vmem:[%s11378_s5 + $0x338] ss:$12 sps:$4 sm:$0xff]  }
 0x435   : > { %3225 = vmatmul.mubr.bf16.vlgmr.msra.gmra.mxu0 %v10111_v42  ;;  %v9021_v42 = vld [vmem:[%s11378_s5 + $0x3f4] ss:$12 sps:$4 sm:$0xff]  }
 0x436   : > { %8525 = vmatpush3.bf16.msra.mxu0 %v9008_v6  ;;  %3265 = vmatprep.mubr.bf16.mxu0 %v10149_v10  ;;  %v9019_v10 = vld [vmem:[%s11378_s5 + $0x3f0] ss:$12 sps:$4 sm:$0xff]   ;;  %v9050_v6 = vld [vmem:[%s11378_s5 + $0x3e0] ss:$12 sps:$4 sm:$0xff]  }
 0x437   : > { %3172 = vmatpush2.bf16.msra.mxu1 %v9009_v21  ;;  %8526 = vmatprep.subr.bf16.mxu0 %v9012_v41  ;;  %v9051_v21 = vld [vmem:[%s11378_s5 + $0x320] ss:$12 sps:$4 sm:$0xff]   ;;  %v9052_v41 = vld [vmem:[%s11378_s5 + $0x3c8] ss:$12 sps:$4 sm:$0xff]  }
 0x438   : > { %3173 = vmatprep.subr.bf16.mxu1 %v9016_v18  ;;  %v9053_v18 = vld [vmem:[%s11378_s5 + $0x308] ss:$12 sps:$4 sm:$0xff]  }
 0x43a   : > { %8527 = vmatpush3.bf16.msra.mxu0 %v9013_v19 }
 0x43b   : > { %v2215_v47 = vpop.permute.xlu0 %2214  ;;  %v2184_v48 = vpop.permute.xlu1 %2183  ;;  %3174 = vmatpush2.bf16.msra.mxu1 %v9014_v9  ;;  %8528 = vmatprep.subr.bf16.mxu0 %v9017_v43 }
 0x43c   : > { %v2190_v59 = vsel %vm438_vm1, %v10084_v53, %v2184_v48  ;;  %3175 = vmatprep.subr.bf16.mxu1 %v9021_v42  ;;  %v2223_v25 = vsel %vm748_vm3, %v10096_v58, %v2215_v47  ;;  %v9024_v53 = vld [vmem:[%s11378_s5 + $0x3d8] ss:$12 sps:$4 sm:$0xff]   ;;  %v2202_v33 = vadd.f32 %v2184_v48, %v10053_v16 }
 0x43d   : > { %v2201_v60 = vadd.f32 %v2190_v59, %v9867_v4  ;;  %v9027_v4 = vld [vmem:[%s11378_s5 + $0x290] ss:$12 sps:$4 sm:$0xff]  }
 0x43e   : > { %8529 = vmatpush3.bf16.msra.mxu0 %v9018_v12 }
 0x43f   : > { %v2248_v30 = vpop.permute.xlu0 %2247  ;;  %v2235_v31 = vadd.f32 %v2223_v25, %v2201_v60  ;;  %v2217_v32 = vpop.permute.xlu1 %2216  ;;  %3176 = vmatpush2.bf16.msra.mxu1 %v9019_v10  ;;  %8530 = vmatprep.subr.bf16.mxu0 %v9022_v63 }
 0x440   : > { %v2256_v58 = vsel %vm920_vm4, %v10102_v29, %v2248_v30  ;;  %v2224_v28 = vsel %vm748_vm3, %v2215_v47, %v2217_v32  ;;  %3177 = vmatprep.subr.bf16.mxu1 %v9026_v23 }
 0x441   : > { %v2268_v34 = vadd.f32 %v2256_v58, %v2235_v31  ;;  %v2236_v29 = vadd.f32 %v2224_v28, %v2202_v33 }
 0x442   : > { %8531 = vmatpush3.bf16.msra.mxu0 %v9023_v26 }
 0x443   : > { %v2250_v35 = vpop.permute.xlu1 %2249  ;;  %3178 = vmatpush2.bf16.msra.mxu1 %v9024_v53  ;;  %8532 = vmatprep.subr.bf16.mxu0 %v9027_v4  ;;  %v2274_v49 = vmul.f32 0.25, %v2268_v34 }
 0x444   : > { %v2257_v16 = vsel %vm920_vm4, %v2248_v30, %v2250_v35  ;;  %3179 = vmatprep.subr.bf16.mxu1 %v9031_v22 }
 0x445   : > { %v2269_v36 = vadd.f32 %v2257_v16, %v2236_v29  ;;  %v2280_v13 = vpack.c.bf16 %v2274_v49, %v1952_v1 }
 0x446   : > { %8533 = vmatpush3.bf16.msra.mxu0 %v9028_v24 }
 0x447   : > { %v2275_v2 = vmul.f32 0.25, %v2269_v36  ;;  %3180 = vmatpush2.bf16.msra.mxu1 %v9029_v38  ;;  %8534 = vmatprep.subr.bf16.mxu0 %v9032_v39 }
 0x448   : > { %8546 = vmatprep.subr.bf16.mxu1 %v3061_v45 }
 0x449   : > { %v2281_v40 = vpack.c.bf16 %v2275_v2, %v1953_v57 }
 0x44a   : > { %8535 = vmatpush3.bf16.msra.mxu0 %v9033_v50 }
 0x44b   : > { %8282 = vmatprep.mubr.msk.bf16.mxu1 %vm438_vm1, %v2281_v40  ;;  %8536 = vmatprep.subr.bf16.mxu0 %v9035_v5 }
 0x44c   : > { %3182 = vmatmul.mubr.bf16.vlgmr.msra.gmra.mxu1 %v2280_v13  ;;  %v3319_v31 = vpop.permute.xlu0 %3318 }
 0x44d   : > { %8547 = vmatpush3.bf16.msra.mxu1 %v9036_v44  ;;  %8283 = vmatprep.mubr.msk.bf16.mxu1 %vm438_vm1, %v2281_v40 }
 0x44e   : > { %8537 = vmatpush3.bf16.msra.mxu0 %v9037_v51  ;;  %8548 = vmatprep.subr.bf16.mxu1 %v9038_v55 }
 0x44f   : > { %8538 = vmatprep.subr.bf16.mxu0 %v9039_v37 }
 0x451   : > { %8549 = vmatpush3.bf16.msra.mxu1 %v9040_v61 }
 0x452   : > { %8539 = vmatpush3.bf16.msra.mxu0 %v9041_v52  ;;  %8550 = vmatprep.subr.bf16.mxu1 %v9042_v7 }
 0x455   : > { %3266 = vmatmul.mubr.bf16.vlgmr.msra.gmra.mxu0 %v10154_v14  ;;  %8551 = vmatpush3.bf16.msra.mxu1 %v9043_v11  ;;  %v9048_v14 = vld [vmem:[%s11378_s5 + $0x3f8] ss:$12 sps:$4 sm:$0xff]  }
 0x456   : > { %8552 = vmatprep.subr.bf16.mxu1 %v9044_v56  ;;  %3406 = vmatprep.mubr.bf16.mxu0 %v9337_v20 }
 0x459   : > { %8553 = vmatpush3.bf16.msra.mxu1 %v9045_v15 }
 0x45a   : > { %8554 = vmatprep.subr.bf16.mxu1 %v9046_v62 }
 0x45d   : > { %8555 = vmatpush3.bf16.msra.mxu1 %v9047_v54 }
 0x45e   : > { %8556 = vmatprep.subr.bf16.mxu1 %v9048_v14 }
 0x461   : > { %8557 = vmatpush3.bf16.msra.mxu1 %v9049_v17 }
 0x462   : > { %8558 = vmatprep.subr.bf16.mxu1 %v9050_v6 }
 0x465   : > { %8559 = vmatpush3.bf16.msra.mxu1 %v9051_v21  ;;  %v3655_v21 = vld [vmem:[%s11375_s2 + $0x10] sm:$0xff] }
 0x466   : > { %8560 = vmatprep.subr.bf16.mxu1 %v9052_v41 }
 0x469   : > { %8561 = vmatpush3.bf16.msra.mxu1 %v9053_v18 }
 0x46c   : > { %3307 = vmatmul.mubr.bf16.vlgmr.msra.gmra.mxu1 %v2280_v13 }
 0x46d   : > { %3603 = vmatprep.mubr.bf16.mxu1 %v9337_v20 }
 0x4c9   : > { %v3097_v19 = vpop.f32.mrf.mxu1 }
 0x4cb   : > { %v3099_v9 = vpop.f32.mrf.mxu1 }
 0x4cd   : > { %v3101_v12 = vpop.f32.mrf.mxu1 }
 0x4cf   : > { %v10400_v59 = vpop.f32.mrf.mxu1 }
 0x4d5   : > { %v3140_v43 = vpop.f32.mrf.mxu0 }
 0x4d6   : > { %v3141_v23 = vadd.f32 %v3140_v43, %v3097_v19 }
 0x4d7   : > { %v3142_v42 = vpop.f32.mrf.mxu0 }
 0x4d8   : > { %v3143_v26 = vadd.f32 %v3142_v42, %v3099_v9 }
 0x4d9   : > { %v3144_v47 = vpop.f32.mrf.mxu0 }
 0x4da   : > { %v3145_v48 = vadd.f32 %v3144_v47, %v3101_v12 }
 0x4db   : > { %v10398_v10 = vpop.f32.mrf.mxu0 }
 0x4f5   : > { %v8518_v63 = vpop.f32.mrf.mxu0 }
 0x4f7   : > { %v8519_v60 = vpop.f32.mrf.mxu0 }
 0x4f8   : > { %v8520_v5 = vadd.f32 %v8519_v60, %v8518_v63  ;;  %v9344_v60 = vmov 0.0  }
 0x4f9   : > { %v8521_v53 = vpop.f32.mrf.mxu0 }
 0x4fb   : > { %v8522_v34 = vpop.f32.mrf.mxu0 }
 0x4fc   : > { %v8523_v8 = vadd.f32 %v8522_v34, %v8521_v53  ;;  %v3547_v53 = vld [vmem:[%s11374_s1 + $0x2c] sm:$0xf] }
 0x50c   : > { %v3183_v25 = vpop.f32.mrf.mxu1 }
 0x50d   : > { %v3184_v30 = vadd.f32 %v3183_v25, %v3141_v23 }
 0x50e   : > { %v3185_v32 = vpop.f32.mrf.mxu1 }
 0x50f   : > { %v3321_v4 = vadd.f32 %v3319_v31, %v3184_v30  ;;  %v3186_v58 = vadd.f32 %v3185_v32, %v3143_v26 }
 0x510   : > { %v3187_v28 = vpop.f32.mrf.mxu1 }
 0x511   : > { %v10402_v22 = vmax.f32 %v3321_v4, 0.0  ;;  %v3322_v27 = vadd.f32 %v3319_v31, %v3186_v58  ;;  %v10404_v33 = vadd.f32 %v3187_v28, %v3145_v48  ;;  %v3346_v48 = vld [vmem:[%s11374_s1 + $0x28] sm:$0xf]  ;;  %v3345_v58 = vld [vmem:[%s11374_s1 + $0x24] sm:$0xf] }
 0x512   : > { %v10414_v50 = vpop.f32.mrf.mxu1 }
 0x513   : > { %v10406_v24 = vmax.f32 %v3322_v27, 0.0  ;;  %v3327_v29 = vpack.c.bf16 %v10402_v22, %v10402_v22 }
 0x515   : > { %v8540_v35 = vpop.f32.mrf.mxu0  ;;  %3333 = vrot.lane.b32.xlu1 %v3327_v29, %s9342_s11  ;;  %v3328_v38 = vpack.c.bf16 %v10406_v24, %v10406_v24 }
 0x517   : > { %v8541_v39 = vpop.f32.mrf.mxu0  ;;  %3335 = vrot.lane.b32.xlu0 %v3328_v38, %s9342_s11 }
 0x518   : > { %v8542_v57 = vadd.f32 %v8541_v39, %v8540_v35 }
 0x519   : > { %v8543_v16 = vpop.f32.mrf.mxu0 }
 0x51a   : > { %v3268_v40 = vadd.f32 %v8542_v57, %v8520_v5 }
 0x51b   : > { %v8544_v45 = vpop.f32.mrf.mxu0 }
 0x51c   : > { %v8545_v36 = vadd.f32 %v8544_v45, %v8543_v16 }
 0x51e   : > { %v3271_v49 = vadd.f32 %v8545_v36, %v8523_v8 }
 0x52c   : > { %v8562_v2 = vpop.f32.mrf.mxu1 }
 0x52e   : > { %v8563_v1 = vpop.f32.mrf.mxu1 }
 0x52f   : > { %v8564_v44 = vadd.f32 %v8563_v1, %v8562_v2 }
 0x530   : > { %v8565_v13 = vpop.f32.mrf.mxu1 }
 0x531   : > { %v3309_v51 = vadd.f32 %v8564_v44, %v3268_v40 }
 0x532   : > { %v8566_v55 = vpop.f32.mrf.mxu1 }
 0x533   : > { %v3323_v37 = vadd.f32 %v3319_v31, %v3309_v51  ;;  %v8567_v61 = vadd.f32 %v8566_v55, %v8565_v13 }
 0x535   : > { %v10416_v52 = vmax.f32 %v3323_v37, 0.0  ;;  %v10418_v7 = vadd.f32 %v8567_v61, %v3271_v49 }
 0x537   : > { %v3329_v11 = vpack.c.bf16 %v10416_v52, %v10416_v52 }
 0x539   : > { %3337 = vrot.lane.b32.xlu1 %v3329_v11, %s9342_s11 }
 0x587   : > { %v3334_v56 = vpop.permute.xlu1 %3333 }
 0x588   : > { %v3342_v15 = vsel %vm1291_vm6, 0, %v3334_v56 }
 0x589   : > { %v3336_v62 = vpop.permute.xlu0 %3335  ;;  %3349 = vrot.lane.b32.xlu0 %v3342_v15, %s9338_s15  ;;  %v3458_v4 = vsel %vm3364_vm11, %v3342_v15, 0 }
 0x58a   : > { %v3339_v54 = vsel %vm1291_vm6, %v3334_v56, %v3336_v62 }
 0x58b   : > { %3351 = vrot.lane.b32.xlu1 %v3339_v54, %s9338_s15 }
 0x5ab   : > { %v3338_v14 = vpop.permute.xlu1 %3337 }
 0x5ac   : > { %v3344_v17 = vsel %vm1291_vm6, %v3338_v14, 0  ;;  %v3340_v6 = vsel %vm1291_vm6, %v3336_v62, %v3338_v14 }
 0x5ad   : > { %3355 = vrot.lane.b32.xlu1 %v3344_v17, %s9338_s15  ;;  %3353 = vrot.lane.b32.xlu0 %v3340_v6, %s9338_s15  ;;  %v3464_v28 = vsel %vm3364_vm11, %v3340_v6, 0 }
 0x5b1   : > { %3550 = vrot.lane.b32.xlu1 %v3339_v54, %s9339_s16  ;;  %3548 = vrot.lane.b32.xlu0 %v3342_v15, %s9339_s16 }
 0x5b5   : > { %3554 = vrot.lane.b32.xlu1 %v3344_v17, %s9339_s16  ;;  %3552 = vrot.lane.b32.xlu0 %v3340_v6, %s9339_s16 }
 0x5b9   : > { %3658 = vperm.xlu0 %8859, %v3655_v21  }
 0x5fb   : > { %v3350_v41 = vpop.permute.xlu0 %3349 }
 0x5fd   : > { %v3352_v18 = vpop.permute.xlu1 %3351 }
 0x5fe   : > { %v3357_v19 = vsel %vm438_vm1, %v3350_v41, %v3352_v18 }
 0x5ff   : > { %v3366_v12 = vsel %vm3364_vm11, %v3357_v19, 0 }
 0x61f   : > { %v3354_v9 = vpop.permute.xlu0 %3353  ;;  %v3356_v43 = vpop.permute.xlu1 %3355 }
 0x620   : > { %v3358_v42 = vsel %vm438_vm1, %v3352_v18, %v3354_v9  ;;  %v3359_v47 = vsel %vm438_vm1, %v3354_v9, %v3356_v43 }
 0x621   : > { %8284 = vmatprep.subr.msk.bf16.mxu0 %vm3364_vm11, %v3358_v42  ;;  %v3372_v25 = vsel %vm3364_vm11, %v3359_v47, 0 }
 0x622   : > { %3389 = vmatpush1.bf16.msra.mxu0 %v3366_v12 }
 0x623   : > { %v3549_v63 = vpop.permute.xlu0 %3548  ;;  %v3551_v23 = vpop.permute.xlu1 %3550  ;;  %8626 = vmatprep.subr.bf16.mxu0 %v9344_v60 }
 0x624   : > { %v3556_v26 = vsel %vm748_vm3, %v3549_v63, %v3551_v23 }
 0x625   : > { %8285 = vmatmul.mubr.msk.bf16.vlgmr.msra.gmra.mxu0 %vm3360_vm12, %v3346_v48  ;;  %v3563_v32 = vsel %vm3364_vm11, %v3556_v26, 0 }
 0x626   : > { %8627 = vmatpush3.bf16.msra.mxu0 %v3372_v25  ;;  %8628 = vmatprep.mubr.msk.bf16.mxu0 %vm9345_vm13, %v9344_v60 }
 0x627   : > { %v3553_v30 = vpop.permute.xlu0 %3552  ;;  %8287 = vmatprep.subr.msk.bf16.mxu0 %vm3364_vm11, %v3339_v54  ;;  %v3555_v27 = vpop.permute.xlu1 %3554 }
 0x628   : > { %v3557_v31 = vsel %vm748_vm3, %v3551_v23, %v3553_v30  ;;  %v3558_v34 = vsel %vm748_vm3, %v3553_v30, %v3555_v27 }
 0x629   : > { %8290 = vmatprep.subr.msk.bf16.mxu1 %vm3364_vm11, %v3557_v31  ;;  %v3569_v29 = vsel %vm3364_vm11, %v3558_v34, 0 }
 0x62a   : > { %3586 = vmatpush1.bf16.msra.mxu1 %v3563_v32 }
 0x62d   : > { %8629 = vmatmul.mubr.msk.bf16.vlgmr.msra.gmra.mxu0 %vm3360_vm12, %v3346_v48  ;;  %8291 = vmatmul.mubr.msk.bf16.vlgmr.msra.gmra.mxu1 %vm3360_vm12, %v3547_v53 }
 0x62e   : > { %3481 = vmatpush1.bf16.msra.mxu0 %v3458_v4  ;;  %3498 = vmatprep.mubr.bf16.mxu0 %v9337_v20 }
 0x62f   : > { %8632 = vmatprep.subr.bf16.mxu0 %v9344_v60  ;;  %3744 = vmatprep.mubr.bf16.mxu1 %v9337_v20 }
 0x634   : > { %v3659_v37 = vpop.permute.xlu0 %3658 }
 0x635   : > { %8288 = vmatmul.mubr.msk.bf16.vlgmr.msra.gmra.mxu0 %vm3360_vm12, %v3345_v58 }
 0x636   : > { %8633 = vmatpush3.bf16.msra.mxu0 %v3464_v28  ;;  %8634 = vmatprep.mubr.msk.bf16.mxu0 %vm9345_vm13, %v9344_v60  ;;  %v3993_v28 = vld [vmem:[%s11375_s2 + $0x18] sm:$0xff] }
 0x637   : > { %8638 = vmatprep.subr.bf16.mxu0 %v9344_v60 }
 0x63d   : > { %8635 = vmatmul.mubr.msk.bf16.vlgmr.msra.gmra.mxu0 %vm3360_vm12, %v3345_v58 }
 0x63e   : > { %8639 = vmatpush3.bf16.msra.mxu0 %v3569_v29  ;;  %8640 = vmatprep.mubr.msk.bf16.mxu0 %vm9345_vm13, %v9344_v60 }
 0x63f   : > { %8644 = vmatprep.subr.bf16.mxu0 %v9344_v60 }
 0x645   : > { %8641 = vmatmul.mubr.msk.bf16.vlgmr.msra.gmra.mxu0 %vm3360_vm12, %v3547_v53 }
 0x646   : > { %8646 = vmatprep.mubr.msk.bf16.mxu0 %vm9345_vm13, %v9344_v60 }
 0x6e5   : > { %v3408_v35 = vpop.f32.mrf.mxu0 }
 0x6e7   : > { %v3410_v38 = vpop.f32.mrf.mxu0 }
 0x6e9   : > { %v3412_v39 = vpop.f32.mrf.mxu0 }
 0x6eb   : > { %v3413_v16 = vpop.f32.mrf.mxu0 }
 0x6ed   : > { %v3449_v45 = vpop.f32.mrf.mxu0  ;;  %v3605_v8 = vpop.f32.mrf.mxu1 }
 0x6ef   : > { %v8630_v36 = vpop.f32.mrf.mxu0  ;;  %v3607_v49 = vpop.f32.mrf.mxu1 }
 0x6f0   : > { %v3686_v36 = vld [vmem:[%s11374_s1 + $0x34] sm:$0xf] }
 0x6f1   : > { %v3452_v57 = vpop.f32.mrf.mxu0  ;;  %v3609_v2 = vpop.f32.mrf.mxu1 }
 0x6f3   : > { %v8631_v5 = vpop.f32.mrf.mxu0  ;;  %v3610_v1 = vpop.f32.mrf.mxu1 }
 0x6f5   : > { %v3500_v40 = vpop.f32.mrf.mxu0 }
 0x6f6   : > { %v3501_v44 = vadd.f32 %v3500_v40, %v3408_v35 }
 0x6f7   : > { %v3502_v13 = vpop.f32.mrf.mxu0 }
 0x6f8   : > { %v3503_v51 = vadd.f32 %v3502_v13, %v3410_v38  ;;  %v3652_v55 = vadd.f32 %v3605_v8, %v3501_v44 }
 0x6f9   : > { %v3504_v61 = vpop.f32.mrf.mxu0 }
 0x6fa   : > { %v3661_v11 = vadd.f32 %v3659_v37, %v3652_v55  ;;  %v3653_v56 = vadd.f32 %v3607_v49, %v3503_v51  ;;  %v3685_v55 = vld [vmem:[%s11374_s1 + $0x30] sm:$0xf] }
 0x6fb   : > { %v3505_v15 = vpop.f32.mrf.mxu0 }
 0x6fc   : > { %v3664_v62 = vmax.f32 %v3661_v11, 0.0  ;;  %v3662_v54 = vadd.f32 %v3659_v37, %v3653_v56  ;;  %v3885_v11 = vld [vmem:[%s11374_s1 + $0x38] sm:$0xf] }
 0x6fd   : > { %v3541_v14 = vpop.f32.mrf.mxu0 }
 0x6fe   : > { %v3667_v17 = vpack.c.bf16 %v3664_v62, %v3664_v62  ;;  %v3665_v6 = vmax.f32 %v3662_v54, 0.0  ;;  %v3542_v9 = vadd.f32 %v3541_v14, %v3449_v45 }
 0x6ff   : > { %v8636_v21 = vpop.f32.mrf.mxu0 }
 0x700   : > { %v3668_v41 = vpack.c.bf16 %v3665_v6, %v3665_v6  ;;  %3673 = vrot.lane.b32.xlu1 %v3667_v17, %s9342_s11 }
 0x701   : > { %v3544_v18 = vpop.f32.mrf.mxu0 }
 0x702   : > { %3675 = vrot.lane.b32.xlu0 %v3668_v41, %s9342_s11 }
 0x703   : > { %v8637_v19 = vpop.f32.mrf.mxu0 }
 0x705   : > { %v3646_v43 = vpop.f32.mrf.mxu0 }
 0x706   : > { %v3654_v42 = vadd.f32 %v3646_v43, %v3542_v9 }
 0x707   : > { %v8642_v12 = vpop.f32.mrf.mxu0 }
 0x708   : > { %v3663_v47 = vadd.f32 %v3659_v37, %v3654_v42 }
 0x709   : > { %v3649_v48 = vpop.f32.mrf.mxu0 }
 0x70a   : > { %v3666_v63 = vmax.f32 %v3663_v47, 0.0 }
 0x70b   : > { %v8643_v23 = vpop.f32.mrf.mxu0 }
 0x70c   : > { %v3669_v25 = vpack.c.bf16 %v3666_v63, %v3666_v63 }
 0x70e   : > { %3677 = vrot.lane.b32.xlu1 %v3669_v25, %s9342_s11 }
 0x772   : > { %v3674_v26 = vpop.permute.xlu1 %3673 }
 0x773   : > { %v3682_v30 = vsel %vm1291_vm6, 0, %v3674_v26 }
 0x774   : > { %v3676_v31 = vpop.permute.xlu0 %3675  ;;  %3689 = vrot.lane.b32.xlu0 %v3682_v30, %s9338_s15  ;;  %v3796_v2 = vsel %vm3364_vm11, %v3682_v30, 0 }
 0x775   : > { %v3679_v32 = vsel %vm1291_vm6, %v3674_v26, %v3676_v31 }
 0x776   : > { %3691 = vrot.lane.b32.xlu1 %v3679_v32, %s9338_s15 }
 0x780   : > { %v3678_v53 = vpop.permute.xlu1 %3677 }
 0x781   : > { %v3684_v4 = vsel %vm1291_vm6, %v3678_v53, 0  ;;  %v3680_v58 = vsel %vm1291_vm6, %v3676_v31, %v3678_v53 }
 0x782   : > { %3695 = vrot.lane.b32.xlu1 %v3684_v4, %s9338_s15  ;;  %3693 = vrot.lane.b32.xlu0 %v3680_v58, %s9338_s15  ;;  %v3802_v5 = vsel %vm3364_vm11, %v3680_v58, 0 }
 0x786   : > { %3888 = vrot.lane.b32.xlu1 %v3679_v32, %s9339_s16  ;;  %3886 = vrot.lane.b32.xlu0 %v3682_v30, %s9339_s16 }
 0x78a   : > { %3892 = vrot.lane.b32.xlu1 %v3684_v4, %s9339_s16  ;;  %3890 = vrot.lane.b32.xlu0 %v3680_v58, %s9339_s16 }
 0x78e   : > { %3996 = vperm.xlu0 %8859, %v3993_v28  }
 0x7e6   : > { %v3690_v27 = vpop.permute.xlu0 %3689 }
 0x7e8   : > { %v3692_v34 = vpop.permute.xlu1 %3691 }
 0x7e9   : > { %v3697_v29 = vsel %vm438_vm1, %v3690_v27, %v3692_v34 }
 0x7ea   : > { %v3704_v8 = vsel %vm3364_vm11, %v3697_v29, 0 }
 0x7f4   : > { %v3694_v35 = vpop.permute.xlu0 %3693  ;;  %v3696_v38 = vpop.permute.xlu1 %3695 }
 0x7f5   : > { %v3699_v39 = vsel %vm438_vm1, %v3694_v35, %v3696_v38  ;;  %v3698_v16 = vsel %vm438_vm1, %v3692_v34, %v3694_v35 }
 0x7f6   : > { %v3710_v45 = vsel %vm3364_vm11, %v3699_v39, 0  ;;  %8293 = vmatprep.subr.msk.bf16.mxu1 %vm3364_vm11, %v3698_v16 }
 0x7f7   : > { %3727 = vmatpush1.bf16.msra.mxu1 %v3704_v8  ;;  %8645 = vmatpush3.bf16.msra.mxu0 %v3710_v45 }
 0x7f8   : > { %v3887_v49 = vpop.permute.xlu0 %3886  ;;  %8296 = vmatprep.subr.msk.bf16.mxu1 %vm3364_vm11, %v3679_v32  ;;  %v3889_v57 = vpop.permute.xlu1 %3888  ;;  %8650 = vmatprep.subr.bf16.mxu0 %v9344_v60 }
 0x7f9   : > { %v3894_v13 = vsel %vm748_vm3, %v3887_v49, %v3889_v57 }
 0x7fa   : > { %8294 = vmatmul.mubr.msk.bf16.vlgmr.msra.gmra.mxu1 %vm3360_vm12, %v3686_v36  ;;  %8647 = vmatmul.mubr.msk.bf16.vlgmr.msra.gmra.mxu0 %vm3360_vm12, %v3686_v36  ;;  %v3901_v37 = vsel %vm3364_vm11, %v3894_v13, 0 }
 0x7fb   : > { %3819 = vmatpush1.bf16.msra.mxu1 %v3796_v2  ;;  %8651 = vmatpush3.bf16.msra.mxu0 %v3802_v5 }
 0x7fc   : > { %v3891_v1 = vpop.permute.xlu0 %3890  ;;  %v3893_v40 = vpop.permute.xlu1 %3892  ;;  %3836 = vmatprep.mubr.bf16.mxu1 %v9337_v20  ;;  %8652 = vmatprep.mubr.msk.bf16.mxu0 %vm9345_vm13, %v9344_v60 }
 0x7fd   : > { %v3895_v44 = vsel %vm748_vm3, %v3889_v57, %v3891_v1  ;;  %8656 = vmatprep.subr.bf16.mxu0 %v9344_v60  ;;  %v3896_v51 = vsel %vm748_vm3, %v3891_v1, %v3893_v40  ;;  %v4011_v40 = vld [vmem:[%s11374_s1 + $0x3c] sm:$0x3] }
 0x7fe   : > { %8299 = vmatprep.subr.msk.bf16.mxu1 %vm3364_vm11, %v3895_v44  ;;  %v3907_v61 = vsel %vm3364_vm11, %v3896_v51, 0  ;;  %v4013_v44 = vld [vmem:[%s11375_s2 + $0x20] sm:$0xf] }
 0x802   : > { %8297 = vmatmul.mubr.msk.bf16.vlgmr.msra.gmra.mxu1 %vm3360_vm12, %v3685_v55  ;;  %8653 = vmatmul.mubr.msk.bf16.vlgmr.msra.gmra.mxu0 %vm3360_vm12, %v3685_v55 }
 0x803   : > { %3924 = vmatpush1.bf16.msra.mxu1 %v3901_v37  ;;  %8657 = vmatpush3.bf16.msra.mxu0 %v3907_v61 }
 0x804   : > { %3941 = vmatprep.mubr.bf16.mxu1 %v9337_v20  ;;  %8658 = vmatprep.mubr.msk.bf16.mxu0 %vm9345_vm13, %v9344_v60 }
 0x805   : > { %8662 = vmatprep.subr.bf16.mxu1 %v9344_v60  ;;  %8668 = vmatprep.subr.bf16.mxu0 %v9344_v60 }
 0x809   : > { %v3997_v26 = vpop.permute.xlu0 %3996 }
 0x80a   : > { %8300 = vmatmul.mubr.msk.bf16.vlgmr.msra.gmra.mxu1 %vm3360_vm12, %v3885_v11  ;;  %8659 = vmatmul.mubr.msk.bf16.vlgmr.msra.gmra.mxu0 %vm3360_vm12, %v3885_v11 }
 0x80b   : > { %8664 = vmatprep.mubr.msk.bf16.mxu1 %vm9345_vm13, %v9344_v60  ;;  %8670 = vmatprep.mubr.msk.bf16.mxu0 %vm9345_vm13, %v9344_v60 }
 0x8ba   : > { %v3746_v56 = vpop.f32.mrf.mxu1  ;;  %v3787_v15 = vpop.f32.mrf.mxu0 }
 0x8bc   : > { %v3748_v62 = vpop.f32.mrf.mxu1  ;;  %v8648_v54 = vpop.f32.mrf.mxu0 }
 0x8bd   : > { %v4063_v54 = vld [vmem:[%s11375_s2 + $0x28] sm:$0xff] }
 0x8be   : > { %v3750_v14 = vpop.f32.mrf.mxu1  ;;  %v3790_v17 = vpop.f32.mrf.mxu0 }
 0x8c0   : > { %v3751_v6 = vpop.f32.mrf.mxu1  ;;  %v8649_v21 = vpop.f32.mrf.mxu0 }
 0x8c2   : > { %v3838_v41 = vpop.f32.mrf.mxu1  ;;  %v3879_v18 = vpop.f32.mrf.mxu0 }
 0x8c3   : > { %v3839_v48 = vadd.f32 %v3838_v41, %v3746_v56  ;;  %v3880_v63 = vadd.f32 %v3879_v18, %v3787_v15 }
 0x8c4   : > { %v3840_v19 = vpop.f32.mrf.mxu1  ;;  %v8654_v9 = vpop.f32.mrf.mxu0 }
 0x8c5   : > { %v3841_v30 = vadd.f32 %v3840_v19, %v3748_v62  ;;  %v4061_v62 = vld [vmem:[%s11374_s1 + $0x40] sm:$0xf] }
 0x8c6   : > { %v3842_v43 = vpop.f32.mrf.mxu1  ;;  %v3882_v42 = vpop.f32.mrf.mxu0 }
 0x8c8   : > { %v3843_v12 = vpop.f32.mrf.mxu1  ;;  %v8655_v47 = vpop.f32.mrf.mxu0 }
 0x8ca   : > { %v3943_v23 = vpop.f32.mrf.mxu1  ;;  %v3984_v25 = vpop.f32.mrf.mxu0 }
 0x8cb   : > { %v3990_v31 = vadd.f32 %v3943_v23, %v3839_v48  ;;  %v3992_v32 = vadd.f32 %v3984_v25, %v3880_v63  ;;  %v3147_v23 = vadd.f32 %v10398_v10, %v10400_v59 }
 0x8cc   : > { %v3945_v53 = vpop.f32.mrf.mxu1  ;;  %v8660_v4 = vpop.f32.mrf.mxu0 }
 0x8cd   : > { %v3999_v58 = vadd.f32 %v3997_v26, %v3990_v31  ;;  %v3991_v28 = vadd.f32 %v3945_v53, %v3841_v30  ;;  %v4001_v29 = vadd.f32 %v3997_v26, %v3992_v32  ;;  %v3190_v31 = vadd.f32 %v10414_v50, %v3147_v23  ;;  %v9060_v23 = vld [vmem:[%s11379_s6 + $0x50] ss:$8 sps:$4 sm:$0xff]  }
 0x8ce   : > { %v3947_v27 = vpop.f32.mrf.mxu1  ;;  %v3987_v34 = vpop.f32.mrf.mxu0 }
 0x8cf   : > { %v4000_v35 = vadd.f32 %v3997_v26, %v3991_v28  ;;  %v4002_v16 = vmax.f32 %v3999_v58, 0.0  ;;  %v4004_v8 = vmax.f32 %v4001_v29, 0.0 }
 0x8d0   : > { %v3948_v38 = vpop.f32.mrf.mxu1  ;;  %v8661_v39 = vpop.f32.mrf.mxu0 }
 0x8d1   : > { %v4003_v45 = vmax.f32 %v4000_v35, 0.0 }
 0x8d3   : > { %v4005_v36 = vadd.f32 %v4003_v45, %v4002_v16 }
 0x8d5   : > { %v4006_v49 = vadd.f32 %v4005_v36, %v4004_v8 }
 0x8d7   : > { %4007 = vadd.xlane.f32.xlu1 %v4006_v49 }
 0x960   : > { %v4008_v57 = vpop.xlane.xlu1 %4007 }
 0x961   : > { %v4010_v2 = vmul.f32 0.0026041667, %v4008_v57  ;;  %v4145_v57 = vld [vmem:[%s11374_s1 + $0x44] sm:$0xf] }
 0x963   : > { %v4012_v5 = vpack.c.bf16 %v4010_v2, %v4010_v2 }
 0x965   : > { %v4018_v1 = vsel %vm3364_vm11, %v4012_v5, 0 }
 0x966   : > { %8663 = vmatpush3.bf16.msra.mxu1 %v4018_v1 }
 0x969   : > { %8665 = vmatmul.mubr.msk.bf16.vlgmr.msra.gmra.mxu1 %vm3360_vm12, %v4011_v40 }
 0x96a   : > { %4202 = vmatprep.mubr.bf16.mxu1 %v9337_v20 }
 0xa29   : > { %v4054_v13 = vpop.f32.mrf.mxu1 }
 0xa2a   : > { %v4055_v51 = vadd.f32 %v4054_v13, %v4013_v44 }
 0xa2b   : > { %v8666_v55 = vpop.f32.mrf.mxu1 }
 0xa2c   : > { %v4060_v37 = vmax.f32 %v4055_v51, 0.0  ;;  %v4343_v51 = vld [vmem:[%s11374_s1 + $0x4c] sm:$0xf] }
 0xa2d   : > { %v4057_v61 = vpop.f32.mrf.mxu1 }
 0xa2e   : > { %v4062_v11 = vpack.c.bf16 %v4060_v37, %v4060_v37 }
 0xa2f   : > { %v8667_v56 = vpop.f32.mrf.mxu1 }
 0xa30   : > { %v4068_v15 = vsel %vm1326_vm7, %v4062_v11, 0 }
 0xa31   : > { %8669 = vmatpush3.bf16.msra.mxu0 %v4068_v15 }
 0xa32   : > { %8674 = vmatprep.subr.bf16.mxu0 %v9344_v60 }
 0xa34   : > { %8671 = vmatmul.mubr.msk.bf16.vlgmr.msra.gmra.mxu0 %vm1322_vm8, %v4061_v62 }
 0xa35   : > { %8676 = vmatprep.mubr.msk.bf16.mxu0 %vm9345_vm13, %v9344_v60 }
 0xaf4   : > { %v4104_v14 = vpop.f32.mrf.mxu0 }
 0xaf5   : > { %v4105_v17 = vadd.f32 %v4104_v14, %v4063_v54  ;;  %v4452_v14 = vld [vmem:[%s11374_s1 + $0x50] sm:$0xf] }
 0xaf6   : > { %v8672_v6 = vpop.f32.mrf.mxu0 }
 0xaf7   : > { %v4110_v21 = vsub.f32 0.0, %v4105_v17 }
 0xaf8   : > { %v4107_v41 = vpop.f32.mrf.mxu0 }
 0xaf9   : > { %v4111_v18 = vmul.f32 1.442695, %v4110_v21 }
 0xafa   : > { %v8673_v19 = vpop.f32.mrf.mxu0 }
 0xafb   : > { %9215 = vpow2.f32 %v4111_v18 }
 0xb08   : > { %v9216_v9 = vpop.eup %9215 }
 0xb09   : > { %v4113_v43 = vadd.f32 1.0, %v9216_v9  ;;  %v9056_v9 = vld [vmem:[%s11379_s6 + $0x74] ss:$8 sps:$4 sm:$0xff]  }
 0xb0b   : > { %9217 = vrcp.f32 %v4113_v43  ;;  %v9054_v43 = vld [vmem:[%s11379_s6 + $0x70] ss:$8 sps:$4 sm:$0xff]  }
 0xb18   : > { %v9218_v42 = vpop.eup %9217 }
 0xb19   : > { %4118 = vperm.xlu0 %8859, %v9218_v42   ;;  %v9057_v42 = vld [vmem:[%s11379_s6 + $0x60] ss:$8 sps:$4 sm:$0xff]  }
 0xb94   : > { %v4119_v12 = vpop.permute.xlu0 %4118 }
 0xb95   : > { %v4121_v47 = vmul.f32 %v4119_v12, %v4002_v16  ;;  %v4122_v48 = vmul.f32 %v4119_v12, %v4003_v45  ;;  %v4123_v25 = vmul.f32 %v4119_v12, %v4004_v8  ;;  %v9059_v12 = vld [vmem:[%s11379_s6 + $0x64] ss:$8 sps:$4 sm:$0xff]  }
 0xb97   : > { %v10565_v63 = vadd.f32 %v4121_v47, %v10402_v22  ;;  %v10570_v26 = vadd.f32 %v4122_v48, %v10406_v24  ;;  %v10577_v32 = vadd.f32 %v4123_v25, %v10416_v52  ;;  %v9062_v48 = vld [vmem:[%s11379_s6 + $0x54] ss:$8 sps:$4 sm:$0xff]   ;;  %v9063_v25 = vld [vmem:[%s11379_s6 + $0x40] ss:$8 sps:$4 sm:$0xff]  }
 0xb99   : > { %v4127_v30 = vpack.c.bf16 %v10404_v33, %v10565_v63  ;;  %v4128_v22 = vpack.c.bf16 %v3190_v31, %v10570_v26  ;;  %v4129_v10 = vpack.c.bf16 %v10418_v7, %v10577_v32 }
 0xb9b   : > { %4133 = vrot.lane.b32.xlu0 %v4127_v30, %s9342_s11  ;;  %v9065_v30 = vld [vmem:[%s11379_s6 + $0x44] ss:$8 sps:$4 sm:$0xff]  }
 0xb9f   : > { %4135 = vrot.lane.b32.xlu0 %v4128_v22, %s9342_s11  ;;  %v5014_v22 = vld [vmem:[%s11375_s2 + $0x30] sm:$0xff] }
 0xba3   : > { %4137 = vrot.lane.b32.xlu0 %v4129_v10, %s9342_s11  ;;  %v9066_v10 = vld [vmem:[%s11379_s6 + $0x30] ss:$8 sps:$4 sm:$0xff]  }
 0xc0d   : > { %v4134_v59 = vpop.permute.xlu0 %4133 }
 0xc0e   : > { %v4142_v24 = vsel %vm1291_vm6, 0, %v4134_v59 }
 0xc0f   : > { %4148 = vrot.lane.b32.xlu0 %v4142_v24, %s9338_s15  ;;  %v4254_v45 = vsel %vm4160_vm14, %v4142_v24, 0 }
 0xc11   : > { %v4136_v50 = vpop.permute.xlu0 %4135 }
 0xc12   : > { %v4139_v53 = vsel %vm1291_vm6, %v4134_v59, %v4136_v50  ;;  %v9078_v59 = vld [vmem:[%s11379_s6 + $0x170] ss:$8 sps:$4 sm:$0xff]  }
 0xc13   : > { %4150 = vrot.lane.b32.xlu0 %v4139_v53, %s9338_s15 }
 0xc15   : > { %v4138_v52 = vpop.permute.xlu0 %4137 }
 0xc16   : > { %v4140_v4 = vsel %vm1291_vm6, %v4136_v50, %v4138_v52  ;;  %v4144_v58 = vsel %vm1291_vm6, %v4138_v52, 0  ;;  %v9071_v50 = vld [vmem:[%s11379_s6 + $0x24] ss:$8 sps:$4 sm:$0xff]   ;;  %v4923_v52 = vand.u32 %v9078_v59, %v10206_v46 }
 0xc17   : > { %4349 = vrot.lane.b32.xlu1 %v4140_v4, %s9339_s16  ;;  %4152 = vrot.lane.b32.xlu0 %v4140_v4, %s9338_s15  ;;  %v4260_v16 = vsel %vm4160_vm14, %v4140_v4, 0 }
 0xc1b   : > { %4459 = vrot.lane.b32.xlu1 %v4144_v58, %s9340_s17  ;;  %4345 = vrot.lane.b32.xlu0 %v4142_v24, %s9339_s16 }
 0xc1f   : > { %4613 = vrot.lane.b32.xlu1 %v3190_v31, %s9342_s11  ;;  %4347 = vrot.lane.b32.xlu0 %v4139_v53, %s9339_s16  ;;  %v9068_v31 = vld [vmem:[%s11379_s6 + $0x34] ss:$8 sps:$4 sm:$0xff]  }
 0xc23   : > { %4351 = vrot.lane.b32.xlu0 %v4144_v58, %s9339_s16  ;;  %v9074_v58 = vld [vmem:[%s11379_s6 + $0x14] ss:$8 sps:$4 sm:$0xff]  }
 0xc27   : > { %4453 = vrot.lane.b32.xlu0 %v4142_v24, %s9340_s17  ;;  %v9080_v24 = vld [vmem:[%s11379_s6 + $0x174] ss:$8 sps:$4 sm:$0xff]  }
 0xc2b   : > { %4455 = vrot.lane.b32.xlu0 %v4139_v53, %s9340_s17 }
 0xc2f   : > { %4457 = vrot.lane.b32.xlu0 %v4140_v4, %s9340_s17  ;;  %v9069_v4 = vld [vmem:[%s11379_s6 + $0x20] ss:$8 sps:$4 sm:$0xff]  }
 0xc33   : > { %4611 = vrot.lane.b32.xlu0 %v10404_v33, %s9342_s11  ;;  %v4146_v33 = vld [vmem:[%s11374_s1 + $0x48] sm:$0xf] }
 0xc37   : > { %4615 = vrot.lane.b32.xlu0 %v10418_v7, %s9342_s11 }
 0xc81   : > { %v4149_v28 = vpop.permute.xlu0 %4148 }
 0xc85   : > { %v4151_v27 = vpop.permute.xlu0 %4150 }
 0xc86   : > { %v4154_v34 = vsel %vm438_vm1, %v4149_v28, %v4151_v27  ;;  %v9072_v28 = vld [vmem:[%s11379_s6 + $0x10] ss:$8 sps:$4 sm:$0xff]  }
 0xc87   : > { %v4162_v39 = vsel %vm4160_vm14, %v4154_v34, 0  ;;  %v9075_v34 = vld [vmem:[%s11379_s6] ss:$8 sps:$4 sm:$0xff]  }
 0xc89   : > { %v4153_v29 = vpop.permute.xlu0 %4152  ;;  %v4350_v8 = vpop.permute.xlu1 %4349 }
 0xc8a   : > { %v4155_v35 = vsel %vm438_vm1, %v4151_v27, %v4153_v29  ;;  %v4168_v38 = vsel %vm4160_vm14, %v4153_v29, 0  ;;  %v9077_v27 = vld [vmem:[%s11379_s6 + $0x4] ss:$8 sps:$4 sm:$0xff]   ;;  %v9083_v29 = vld [vmem:[%s11379_s6 + $0xf4] ss:$8 sps:$4 sm:$0xff]  }
 0xc8b   : > { %8304 = vmatprep.subr.msk.bf16.mxu1 %vm4160_vm14, %v4155_v35  ;;  %8675 = vmatpush3.bf16.msra.mxu0 %v4168_v38  ;;  %v9081_v35 = vld [vmem:[%s11379_s6 + $0xf0] ss:$8 sps:$4 sm:$0xff]   ;;  %v9086_v38 = vld [vmem:[%s11379_s6 + $0x164] ss:$8 sps:$4 sm:$0xff]  }
 0xc8c   : > { %4185 = vmatpush1.bf16.msra.mxu1 %v4162_v39  ;;  %8680 = vmatprep.subr.bf16.mxu0 %v9344_v60  ;;  %v9084_v39 = vld [vmem:[%s11379_s6 + $0x160] ss:$8 sps:$4 sm:$0xff]  }
 0xc8d   : > { %8307 = vmatprep.subr.msk.bf16.mxu1 %vm4160_vm14, %v4139_v53  ;;  %v4346_v7 = vpop.permute.xlu0 %4345  ;;  %v4460_v37 = vpop.permute.xlu1 %4459  ;;  %v4926_v53 = vand.u32 %v9080_v24, %v10206_v46 }
 0xc8e   : > { %8677 = vmatmul.mubr.msk.bf16.vlgmr.msra.gmra.mxu0 %vm4156_vm15, %v4146_v33 }
 0xc8f   : > { %8305 = vmatmul.mubr.msk.bf16.vlgmr.msra.gmra.mxu1 %vm4156_vm15, %v4146_v33  ;;  %8681 = vmatpush3.bf16.msra.mxu0 %v4260_v16  ;;  %v9089_v33 = vld [vmem:[%s11379_s6 + $0xe4] ss:$8 sps:$4 sm:$0xff]   ;;  %v9092_v16 = vld [vmem:[%s11379_s6 + $0x154] ss:$8 sps:$4 sm:$0xff]  }
 0xc90   : > { %4277 = vmatpush1.bf16.msra.mxu1 %v4254_v45  ;;  %8682 = vmatprep.mubr.msk.bf16.mxu0 %vm9345_vm13, %v9344_v60  ;;  %v9090_v45 = vld [vmem:[%s11379_s6 + $0x150] ss:$8 sps:$4 sm:$0xff]  }
 0xc91   : > { %v4348_v36 = vpop.permute.xlu0 %4347  ;;  %4294 = vmatprep.mubr.bf16.mxu1 %v9337_v20  ;;  %8686 = vmatprep.subr.bf16.mxu0 %v9344_v60  ;;  %v4614_v17 = vpop.permute.xlu1 %4613 }
 0xc92   : > { %v4354_v49 = vsel %vm748_vm3, %v4348_v36, %v4350_v8  ;;  %v4353_v2 = vsel %vm748_vm3, %v4346_v7, %v4348_v36  ;;  %v9087_v7 = vld [vmem:[%s11379_s6 + $0xe0] ss:$8 sps:$4 sm:$0xff]   ;;  %v9093_v36 = vld [vmem:[%s11379_s6 + $0xd0] ss:$8 sps:$4 sm:$0xff]  }
 0xc93   : > { %8310 = vmatprep.subr.msk.bf16.mxu1 %vm4160_vm14, %v4354_v49  ;;  %v4360_v44 = vsel %vm4160_vm14, %v4353_v2, 0  ;;  %v9098_v49 = vld [vmem:[%s11379_s6 + $0x144] ss:$8 sps:$4 sm:$0xff]  }
 0xc94   : > { %v9101_v2 = vld [vmem:[%s11379_s6 + $0xc4] ss:$8 sps:$4 sm:$0xff]  }
 0xc95   : > { %v4352_v5 = vpop.permute.xlu0 %4351 }
 0xc96   : > { %v4355_v1 = vsel %vm748_vm3, %v4350_v8, %v4352_v5  ;;  %8683 = vmatmul.mubr.msk.bf16.vlgmr.msra.gmra.mxu0 %vm4156_vm15, %v4145_v57  ;;  %v9095_v8 = vld [vmem:[%s11379_s6 + $0xd4] ss:$8 sps:$4 sm:$0xff]   ;;  %v9099_v5 = vld [vmem:[%s11379_s6 + $0xc0] ss:$8 sps:$4 sm:$0xff]  }
 0xc97   : > { %v4366_v40 = vsel %vm4160_vm14, %v4355_v1, 0  ;;  %8308 = vmatmul.mubr.msk.bf16.vlgmr.msra.gmra.mxu1 %vm4156_vm15, %v4145_v57  ;;  %8688 = vmatprep.mubr.msk.bf16.mxu0 %vm9345_vm13, %v9344_v60  ;;  %v9096_v57 = vld [vmem:[%s11379_s6 + $0x140] ss:$8 sps:$4 sm:$0xff]   ;;  %v9104_v1 = vld [vmem:[%s11379_s6 + $0x134] ss:$8 sps:$4 sm:$0xff]  }
 0xc98   : > { %4383 = vmatpush1.bf16.msra.mxu1 %v4360_v44  ;;  %8687 = vmatpush3.bf16.msra.mxu0 %v4366_v40  ;;  %v9102_v40 = vld [vmem:[%s11379_s6 + $0x130] ss:$8 sps:$4 sm:$0xff]   ;;  %v9107_v44 = vld [vmem:[%s11379_s6 + $0xb4] ss:$8 sps:$4 sm:$0xff]  }
 0xc99   : > { %v4454_v13 = vpop.permute.xlu0 %4453  ;;  %4400 = vmatprep.mubr.bf16.mxu1 %v9337_v20  ;;  %8692 = vmatprep.subr.bf16.mxu0 %v9344_v60 }
 0xc9d   : > { %v4456_v55 = vpop.permute.xlu0 %4455 }
 0xc9e   : > { %8689 = vmatmul.mubr.msk.bf16.vlgmr.msra.gmra.mxu0 %vm4156_vm15, %v4343_v51  ;;  %v4461_v61 = vsel %vm920_vm4, %v4454_v13, %v4456_v55  ;;  %v9105_v13 = vld [vmem:[%s11379_s6 + $0xb0] ss:$8 sps:$4 sm:$0xff]  }
 0xc9f   : > { %8311 = vmatmul.mubr.msk.bf16.vlgmr.msra.gmra.mxu1 %vm4156_vm15, %v4343_v51  ;;  %8694 = vmatprep.mubr.msk.bf16.mxu0 %vm9345_vm13, %v9344_v60  ;;  %v4468_v62 = vsel %vm4160_vm14, %v4461_v61, 0  ;;  %v9110_v51 = vld [vmem:[%s11379_s6 + $0x124] ss:$8 sps:$4 sm:$0xff]   ;;  %v9111_v61 = vld [vmem:[%s11379_s6 + $0xa0] ss:$8 sps:$4 sm:$0xff]  }
 0xca0   : > { %4508 = vmatprep.mubr.bf16.mxu1 %v9337_v20 }
 0xca1   : > { %v4458_v11 = vpop.permute.xlu0 %4457 }
 0xca2   : > { %v4463_v56 = vsel %vm920_vm4, %v4458_v11, %v4460_v37  ;;  %v4462_v15 = vsel %vm920_vm4, %v4456_v55, %v4458_v11  ;;  %v9108_v55 = vld [vmem:[%s11379_s6 + $0x120] ss:$8 sps:$4 sm:$0xff]   ;;  %v9113_v37 = vld [vmem:[%s11379_s6 + $0xa4] ss:$8 sps:$4 sm:$0xff]   ;;  %v9116_v11 = vld [vmem:[%s11379_s6 + $0x114] ss:$8 sps:$4 sm:$0xff]  }
 0xca3   : > { %8313 = vmatprep.subr.msk.bf16.mxu1 %vm4160_vm14, %v4462_v15  ;;  %v4474_v54 = vsel %vm4160_vm14, %v4463_v56, 0  ;;  %v9114_v56 = vld [vmem:[%s11379_s6 + $0x110] ss:$8 sps:$4 sm:$0xff]   ;;  %v9119_v15 = vld [vmem:[%s11379_s6 + $0x94] ss:$8 sps:$4 sm:$0xff]  }
 0xca4   : > { %4491 = vmatpush1.bf16.msra.mxu1 %v4468_v62  ;;  %8693 = vmatpush3.bf16.msra.mxu0 %v4474_v54  ;;  %v9117_v62 = vld [vmem:[%s11379_s6 + $0x90] ss:$8 sps:$4 sm:$0xff]   ;;  %v9122_v54 = vld [vmem:[%s11379_s6 + $0x104] ss:$8 sps:$4 sm:$0xff]  }
 0xca5   : > { %v4612_v6 = vpop.permute.xlu0 %4611  ;;  %4928 = vmatprep.subr.bf16.mxu1 %v9056_v9  ;;  %4971 = vmatprep.subr.bf16.mxu0 %v4926_v53 }
 0xca6   : > { %v10655_v21 = vsel %vm1291_vm6, %v4612_v6, %v4614_v17  ;;  %v10666_v19 = vsel %vm1291_vm6, 0.0, %v4612_v6  ;;  %v9123_v6 = vld [vmem:[%s11379_s6 + $0x80] ss:$8 sps:$4 sm:$0xff]  }
 0xca7   : > { %8314 = vmatmul.mubr.msk.bf16.vlgmr.msra.gmra.mxu1 %vm4156_vm15, %v4452_v14  ;;  %8695 = vmatmul.mubr.msk.bf16.vlgmr.msra.gmra.mxu0 %vm4156_vm15, %v4452_v14  ;;  %v9120_v14 = vld [vmem:[%s11379_s6 + $0x100] ss:$8 sps:$4 sm:$0xff]  }
 0xca8   : > { %4628 = vrot.lane.b32.xlu1 %v10655_v21, %s9338_s15  ;;  %5003 = vmatprep.mubr.bf16.mxu0 %v9337_v20 }
 0xca9   : > { %v4616_v41 = vpop.permute.xlu0 %4615  ;;  %4929 = vmatpush1.bf16.msra.mxu1 %v9054_v43  ;;  %4972 = vmatpush1.bf16.msra.mxu0 %v4923_v52 }
 0xcaa   : > { %v10663_v18 = vsel %vm1291_vm6, %v4614_v17, %v4616_v41  ;;  %v4624_v47 = vsel %vm1291_vm6, %v4616_v41, 0.0  ;;  %4930 = vmatprep.subr.bf16.mxu1 %v9059_v12  ;;  %4973 = vmatprep.subr.bf16.mxu0 %v9086_v38  ;;  %v9125_v17 = vld [vmem:[%s11379_s6 + $0x84] ss:$8 sps:$4 sm:$0xff]  }
 0xcab   : > { %4630 = vrot.lane.b32.xlu0 %v10663_v18, %s9338_s15 }
 0xcac   : > { %4626 = vrot.lane.b32.xlu1 %v10666_v19, %s9338_s15 }
 0xcad   : > { %4931 = vmatpush1.bf16.msra.mxu1 %v9057_v42  ;;  %4974 = vmatpush1.bf16.msra.mxu0 %v9084_v39 }
 0xcae   : > { %4932 = vmatprep.subr.bf16.mxu1 %v9062_v48  ;;  %4975 = vmatprep.subr.bf16.mxu0 %v9092_v16 }
 0xcaf   : > { %4643 = vrot.lane.b32.xlu0 %v10655_v21, %s9339_s16 }
 0xcb0   : > { %4645 = vrot.lane.b32.xlu1 %v10663_v18, %s9339_s16 }
 0xcb1   : > { %4933 = vmatpush1.bf16.msra.mxu1 %v9060_v23  ;;  %4976 = vmatpush1.bf16.msra.mxu0 %v9090_v45 }
 0xcb2   : > { %4934 = vmatprep.subr.bf16.mxu1 %v9065_v30  ;;  %4977 = vmatprep.subr.bf16.mxu0 %v9098_v49 }
 0xcb3   : > { %4641 = vrot.lane.b32.xlu0 %v10666_v19, %s9339_s16 }
 0xcb4   : > { %4647 = vrot.lane.b32.xlu1 %v4624_v47, %s9339_s16 }
 0xcb5   : > { %4935 = vmatpush1.bf16.msra.mxu1 %v9063_v25  ;;  %4978 = vmatpush1.bf16.msra.mxu0 %v9096_v57 }
 0xcb6   : > { %4936 = vmatprep.subr.bf16.mxu1 %v9068_v31  ;;  %4979 = vmatprep.subr.bf16.mxu0 %v9104_v1 }
 0xcb7   : > { %4660 = vrot.lane.b32.xlu0 %v10655_v21, %s9340_s17 }
 0xcb8   : > { %4662 = vrot.lane.b32.xlu1 %v10663_v18, %s9340_s17 }
 0xcb9   : > { %4937 = vmatpush1.bf16.msra.mxu1 %v9066_v10  ;;  %4980 = vmatpush1.bf16.msra.mxu0 %v9102_v40 }
 0xcba   : > { %4938 = vmatprep.subr.bf16.mxu1 %v9071_v50  ;;  %4981 = vmatprep.subr.bf16.mxu0 %v9110_v51 }
 0xcbb   : > { %4658 = vrot.lane.b32.xlu0 %v10666_v19, %s9340_s17 }
 0xcbc   : > { %4664 = vrot.lane.b32.xlu1 %v4624_v47, %s9340_s17 }
 0xcbd   : > { %4939 = vmatpush1.bf16.msra.mxu1 %v9069_v4  ;;  %4982 = vmatpush1.bf16.msra.mxu0 %v9108_v55 }
 0xcbe   : > { %4940 = vmatprep.subr.bf16.mxu1 %v9074_v58  ;;  %4983 = vmatprep.subr.bf16.mxu0 %v9116_v11 }
 0xcbf   : > { %5017 = vperm.xlu0 %8859, %v5014_v22  }
 0xcc1   : > { %4941 = vmatpush1.bf16.msra.mxu1 %v9072_v28  ;;  %4984 = vmatpush1.bf16.msra.mxu0 %v9114_v56 }
 0xcc2   : > { %4942 = vmatprep.subr.bf16.mxu1 %v9077_v27  ;;  %4985 = vmatprep.subr.bf16.mxu0 %v9122_v54 }
 0xcc5   : > { %4943 = vmatpush1.bf16.msra.mxu1 %v9075_v34  ;;  %4986 = vmatpush1.bf16.msra.mxu0 %v9120_v14 }
 0xcc6   : > { %4944 = vmatprep.subr.bf16.mxu1 %v9083_v29 }
 0xcc9   : > { %4945 = vmatpush2.bf16.msra.mxu1 %v9081_v35 }
 0xcca   : > { %4946 = vmatprep.subr.bf16.mxu1 %v9089_v33 }
 0xccd   : > { %4947 = vmatpush2.bf16.msra.mxu1 %v9087_v7 }
 0xcce   : > { %4948 = vmatprep.subr.bf16.mxu1 %v9095_v8 }
 0xcd1   : > { %4949 = vmatpush2.bf16.msra.mxu1 %v9093_v36 }
 0xcd2   : > { %4950 = vmatprep.subr.bf16.mxu1 %v9101_v2 }
 0xcd5   : > { %4951 = vmatpush2.bf16.msra.mxu1 %v9099_v5 }
 0xcd6   : > { %4952 = vmatprep.subr.bf16.mxu1 %v9107_v44 }
 0xcd9   : > { %4953 = vmatpush2.bf16.msra.mxu1 %v9105_v13 }
 0xcda   : > { %4954 = vmatprep.subr.bf16.mxu1 %v9113_v37 }
 0xcdd   : > { %4955 = vmatpush2.bf16.msra.mxu1 %v9111_v61 }
 0xcde   : > { %4956 = vmatprep.subr.bf16.mxu1 %v9119_v15 }
 0xce1   : > { %4957 = vmatpush2.bf16.msra.mxu1 %v9117_v62 }
 0xce2   : > { %4958 = vmatprep.subr.bf16.mxu1 %v9125_v17 }
 0xce5   : > { %4959 = vmatpush2.bf16.msra.mxu1 %v9123_v6 }
 0xd1a   : > { %v4629_v41 = vpop.permute.xlu1 %4628 }
 0xd1d   : > { %v4631_v43 = vpop.permute.xlu0 %4630 }
 0xd1e   : > { %v4627_v9 = vpop.permute.xlu1 %4626  ;;  %v4633_v33 = vsel %vm438_vm1, %v4629_v41, %v4631_v43  ;;  %v4639_v8 = vadd.f32 %v4631_v43, %v10663_v18 }
 0xd1f   : > { %v4632_v45 = vsel %vm438_vm1, %v4627_v9, %v4629_v41  ;;  %v4638_v1 = vadd.f32 %v4633_v33, %v10655_v21 }
 0xd20   : > { %v4637_v51 = vadd.f32 %v4632_v45, %v10666_v19 }
 0xd21   : > { %v4644_v47 = vpop.permute.xlu0 %4643 }
 0xd22   : > { %v4646_v42 = vpop.permute.xlu1 %4645 }
 0xd23   : > { %v4650_v49 = vsel %vm748_vm3, %v4644_v47, %v4646_v42 }
 0xd24   : > { %v4656_v61 = vadd.f32 %v4650_v49, %v4638_v1 }
 0xd25   : > { %v4642_v59 = vpop.permute.xlu0 %4641 }
 0xd26   : > { %v4648_v30 = vpop.permute.xlu1 %4647  ;;  %v4649_v44 = vsel %vm748_vm3, %v4642_v59, %v4644_v47 }
 0xd27   : > { %v4651_v7 = vsel %vm748_vm3, %v4646_v42, %v4648_v30  ;;  %v4655_v62 = vadd.f32 %v4649_v44, %v4637_v51 }
 0xd28   : > { %v4657_v40 = vadd.f32 %v4651_v7, %v4639_v8 }
 0xd29   : > { %v4661_v27 = vpop.permute.xlu0 %4660 }
 0xd2a   : > { %v4663_v52 = vpop.permute.xlu1 %4662 }
 0xd2b   : > { %v4667_v55 = vsel %vm920_vm4, %v4661_v27, %v4663_v52 }
 0xd2c   : > { %v4673_v17 = vadd.f32 %v4667_v55, %v4656_v61 }
 0xd2d   : > { %v4659_v2 = vpop.permute.xlu0 %4658 }
 0xd2e   : > { %v4665_v38 = vpop.permute.xlu1 %4664  ;;  %v4666_v11 = vsel %vm920_vm4, %v4659_v2, %v4661_v27 }
 0xd2f   : > { %v4668_v57 = vsel %vm920_vm4, %v4663_v52, %v4665_v38  ;;  %v4672_v41 = vadd.f32 %v4666_v11, %v4655_v62 }
 0xd30   : > { %v4674_v18 = vadd.f32 %v4668_v57, %v4657_v40 }
 0xd32   : > { %v4677_v19 = vmul.f32 0.25, %v4674_v18  ;;  %v5039_v18 = vld [vmem:[%s11374_s1 + $0x58] sm:$0xf] }
 0xd4e   : > { %v4245_v12 = vpop.f32.mrf.mxu0 }
 0xd4f   : > { %v4204_v48 = vpop.f32.mrf.mxu1 }
 0xd50   : > { %v8678_v23 = vpop.f32.mrf.mxu0 }
 0xd51   : > { %v4206_v25 = vpop.f32.mrf.mxu1 }
 0xd52   : > { %v4248_v31 = vpop.f32.mrf.mxu0 }
 0xd53   : > { %v4208_v22 = vpop.f32.mrf.mxu1 }
 0xd54   : > { %v8679_v10 = vpop.f32.mrf.mxu0 }
 0xd55   : > { %v4209_v24 = vpop.f32.mrf.mxu1 }
 0xd56   : > { %v4337_v50 = vpop.f32.mrf.mxu0  ;;  %v4675_v24 = vmul.f32 0.25, %v4672_v41 }
 0xd57   : > { %v4296_v53 = vpop.f32.mrf.mxu1  ;;  %v4338_v56 = vadd.f32 %v4337_v50, %v4245_v12  ;;  %v4676_v12 = vmul.f32 0.25, %v4673_v17  ;;  %v5145_v17 = vld [vmem:[%s11374_s1 + $0x5c] sm:$0xf] }
 0xd58   : > { %v8684_v4 = vpop.f32.mrf.mxu0  ;;  %v4297_v54 = vadd.f32 %v4296_v53, %v4204_v48 }
 0xd59   : > { %v4298_v58 = vpop.f32.mrf.mxu1 }
 0xd5a   : > { %v4340_v28 = vpop.f32.mrf.mxu0  ;;  %v4299_v21 = vadd.f32 %v4298_v58, %v4206_v25 }
 0xd5b   : > { %v4300_v34 = vpop.f32.mrf.mxu1 }
 0xd5c   : > { %v8685_v29 = vpop.f32.mrf.mxu0 }
 0xd5d   : > { %v4301_v35 = vpop.f32.mrf.mxu1  ;;  %v5018_v29 = vpop.permute.xlu0 %5017 }
 0xd5e   : > { %v4443_v39 = vpop.f32.mrf.mxu0 }
 0xd5f   : > { %v4402_v16 = vpop.f32.mrf.mxu1  ;;  %v4451_v6 = vadd.f32 %v4443_v39, %v4338_v56 }
 0xd60   : > { %v8690_v36 = vpop.f32.mrf.mxu0  ;;  %v4449_v9 = vadd.f32 %v4402_v16, %v4297_v54  ;;  %v5038_v54 = vld [vmem:[%s11374_s1 + $0x54] sm:$0xf] }
 0xd61   : > { %v4404_v5 = vpop.f32.mrf.mxu1 }
 0xd62   : > { %v4446_v13 = vpop.f32.mrf.mxu0  ;;  %v4450_v47 = vadd.f32 %v4404_v5, %v4299_v21 }
 0xd63   : > { %v4406_v37 = vpop.f32.mrf.mxu1  ;;  %v5203_v13 = vld [vmem:[%s11375_s2 + $0x38] sm:$0xff] }
 0xd64   : > { %v8691_v15 = vpop.f32.mrf.mxu0 }
 0xd65   : > { %v4407_v14 = vpop.f32.mrf.mxu1 }
 0xd67   : > { %v4510_v43 = vpop.f32.mrf.mxu1  ;;  %v4551_v42 = vpop.f32.mrf.mxu0 }
 0xd68   : > { %v4559_v23 = vadd.f32 %v4551_v42, %v4451_v6  ;;  %v4557_v30 = vadd.f32 %v4510_v43, %v4449_v9 }
 0xd69   : > { %v4512_v31 = vpop.f32.mrf.mxu1  ;;  %v8696_v22 = vpop.f32.mrf.mxu0 }
 0xd6a   : > { %v4680_v10 = vpack.c.bf16 %v4677_v19, %v4559_v23  ;;  %v4558_v59 = vadd.f32 %v4512_v31, %v4450_v47  ;;  %v4678_v25 = vpack.c.bf16 %v4675_v24, %v4557_v30 }
 0xd6b   : > { %v4514_v50 = vpop.f32.mrf.mxu1  ;;  %v4554_v48 = vpop.f32.mrf.mxu0 }
 0xd6c   : > { %v4679_v53 = vpack.c.bf16 %v4676_v12, %v4558_v59  ;;  %8364 = vmatmul.mubr.msk.bf16.vlgmr.msra.gmra.mxu0 %vm438_vm1, %v4680_v10 }
 0xd6d   : > { %v4515_v52 = vpop.f32.mrf.mxu1  ;;  %v8697_v4 = vpop.f32.mrf.mxu0  ;;  %5088 = vmatprep.mubr.bf16.mxu0 %v9337_v20 }
 0xd6e   : > { %4960 = vmatprep.mubr.bf16.mxu1 %v4679_v53 }
 0xd6f   : > { %4961 = vmatmul.mubr.bf16.vlgmr.msra.gmra.mxu1 %v4678_v25 }
 0xd70   : > { %5324 = vmatprep.mubr.bf16.mxu1 %v9337_v20 }
 0xe2c   : > { %v5005_v58 = vpop.f32.mrf.mxu0 }
 0xe2e   : > { %v5007_v28 = vpop.f32.mrf.mxu0 }
 0xe2f   : > { %v4962_v27 = vpop.f32.mrf.mxu1 }
 0xe30   : > { %v5006_v34 = vadd.f32 %v5005_v58, %v4962_v27  ;;  %v5009_v33 = vpop.f32.mrf.mxu0 }
 0xe31   : > { %v4964_v35 = vpop.f32.mrf.mxu1 }
 0xe32   : > { %v5020_v38 = vadd.f32 %v5018_v29, %v5006_v34  ;;  %v5008_v39 = vadd.f32 %v5007_v28, %v4964_v35  ;;  %v10895_v21 = vpop.f32.mrf.mxu0 }
 0xe33   : > { %v4966_v7 = vpop.f32.mrf.mxu1 }
 0xe34   : > { %v10850_v16 = vmax.f32 %v5020_v38, 0.0  ;;  %v5021_v45 = vadd.f32 %v5018_v29, %v5008_v39  ;;  %v10852_v8 = vadd.f32 %v5009_v33, %v4966_v7  ;;  %v5226_v33 = vld [vmem:[%s11374_s1 + $0x60] sm:$0xf] }
 0xe35   : > { %v5391_v7 = vld [vmem:[%s11375_s2 + $0x40] sm:$0xff] }
 0xe36   : > { %v5024_v36 = vpack.c.bf16 %v10850_v16, %v10850_v16  ;;  %v10856_v49 = vmax.f32 %v5021_v45, 0.0 }
 0xe38   : > { %v5025_v57 = vpack.c.bf16 %v10856_v49, %v10856_v49  ;;  %5028 = vrot.lane.b32.xlu1 %v5024_v36, %s9342_s11 }
 0xe3a   : > { %5030 = vrot.lane.b32.xlu0 %v5025_v57, %s9342_s11 }
 0xeaa   : > { %v5029_v2 = vpop.permute.xlu1 %5028 }
 0xeab   : > { %v5034_v5 = vsel %vm1291_vm6, 0, %v5029_v2 }
 0xeac   : > { %v5031_v1 = vpop.permute.xlu0 %5030  ;;  %5042 = vrot.lane.b32.xlu1 %v5034_v5, %s9338_s15  ;;  %v5100_v11 = vsel %vm3364_vm11, %v5034_v5, 0 }
 0xead   : > { %v5032_v40 = vsel %vm1291_vm6, %v5029_v2, %v5031_v1 }
 0xeae   : > { %v5037_v44 = vsel %vm5035_vm0, %v5032_v40, 0 }
 0xeaf   : > { %5044 = vrot.lane.b32.xlu0 %v5037_v44, %s9338_s15 }
 0xeb0   : > { %5146 = vrot.lane.b32.xlu1 %v5034_v5, %s9339_s16  ;;  %v5227_v5 = vld [vmem:[%s11374_s1 + $0x64] sm:$0xf] }
 0xeb3   : > { %5148 = vrot.lane.b32.xlu0 %v5037_v44, %s9339_s16 }
 0xeb4   : > { %5206 = vperm.xlu1 %8860, %v5203_v13  }
 0xf1e   : > { %v5043_v51 = vpop.permute.xlu1 %5042 }
 0xf21   : > { %v5045_v55 = vpop.permute.xlu0 %5044 }
 0xf22   : > { %v5046_v37 = vsel %vm438_vm1, %v5043_v51, %v5045_v55  ;;  %8365 = vmatprep.subr.msk.bf16.mxu0 %vm3364_vm11, %v5045_v55  ;;  %v5147_v15 = vpop.permute.xlu1 %5146  ;;  %v5333_v51 = vld [vmem:[%s11374_s1 + $0x68] sm:$0xf]  ;;  %v10936_v55 = vpop.f32.mrf.mxu1 }
 0xf23   : > { %v5051_v61 = vsel %vm3364_vm11, %v5046_v37, 0 }
 0xf24   : > { %5071 = vmatpush1.bf16.msra.mxu0 %v5051_v61 }
 0xf25   : > { %8367 = vmatprep.subr.msk.bf16.mxu0 %vm3364_vm11, %v5037_v44  ;;  %v5149_v56 = vpop.permute.xlu0 %5148 }
 0xf26   : > { %v5150_v62 = vsel %vm748_vm3, %v5147_v15, %v5149_v56 }
 0xf27   : > { %8366 = vmatmul.mubr.msk.bf16.vlgmr.msra.gmra.mxu0 %vm3360_vm12, %v5039_v18  ;;  %v5155_v14 = vsel %vm3364_vm11, %v5150_v62, 0 }
 0xf28   : > { %5119 = vmatpush1.bf16.msra.mxu0 %v5100_v11  ;;  %5136 = vmatprep.mubr.bf16.mxu0 %v9337_v20 }
 0xf29   : > { %8369 = vmatprep.subr.msk.bf16.mxu0 %vm3364_vm11, %v5149_v56 }
 0xf2f   : > { %8368 = vmatmul.mubr.msk.bf16.vlgmr.msra.gmra.mxu0 %vm3360_vm12, %v5038_v54  ;;  %v5207_v22 = vpop.permute.xlu1 %5206 }
 0xf30   : > { %5175 = vmatpush1.bf16.msra.mxu0 %v5155_v14  ;;  %5192 = vmatprep.mubr.bf16.mxu0 %v9337_v20 }
 0xf37   : > { %8370 = vmatmul.mubr.msk.bf16.vlgmr.msra.gmra.mxu0 %vm3360_vm12, %v5145_v17 }
 0xf38   : > { %5276 = vmatprep.mubr.bf16.mxu0 %v9337_v20 }
 0xfe7   : > { %v5090_v6 = vpop.f32.mrf.mxu0 }
 0xfe9   : > { %v5092_v41 = vpop.f32.mrf.mxu0 }
 0xfeb   : > { %v5094_v9 = vpop.f32.mrf.mxu0 }
 0xfed   : > { %v5095_v43 = vpop.f32.mrf.mxu0 }
 0xfef   : > { %v5138_v42 = vpop.f32.mrf.mxu0 }
 0xff0   : > { %v5139_v30 = vadd.f32 %v5138_v42, %v5090_v6 }
 0xff1   : > { %v5140_v19 = vpop.f32.mrf.mxu0 }
 0xff2   : > { %v5141_v10 = vadd.f32 %v5140_v19, %v5092_v41 }
 0xff3   : > { %v5142_v47 = vpop.f32.mrf.mxu0 }
 0xff5   : > { %v5143_v23 = vpop.f32.mrf.mxu0 }
 0xff7   : > { %v5194_v31 = vpop.f32.mrf.mxu0 }
 0xff8   : > { %v5201_v59 = vadd.f32 %v5194_v31, %v5139_v30 }
 0xff9   : > { %v5196_v12 = vpop.f32.mrf.mxu0 }
 0xffa   : > { %v5209_v24 = vadd.f32 %v5207_v22, %v5201_v59  ;;  %v5202_v50 = vadd.f32 %v5196_v12, %v5141_v10  ;;  %v5820_v12 = vld [vmem:[%s11375_s2 + $0x58] sm:$0xff] }
 0xffb   : > { %v5198_v48 = vpop.f32.mrf.mxu0 }
 0xffc   : > { %v5211_v53 = vmax.f32 %v5209_v24, 0.0  ;;  %v5210_v25 = vadd.f32 %v5207_v22, %v5202_v50  ;;  %v6125_v24 = vld [vmem:[%s11375_s2 + $0x68] sm:$0xff] }
 0xffd   : > { %v5199_v52 = vpop.f32.mrf.mxu0 }
 0xffe   : > { %v5213_v4 = vpack.c.bf16 %v5211_v53, %v5211_v53  ;;  %v5212_v58 = vmax.f32 %v5210_v25, 0.0  ;;  %v5408_v52 = vld [vmem:[%s11374_s1 + $0x6c] sm:$0x3] }
0x1000   : > { %v5214_v28 = vpack.c.bf16 %v5212_v58, %v5212_v58  ;;  %5217 = vrot.lane.b32.xlu0 %v5213_v4, %s9342_s11  ;;  %v5410_v4 = vld [vmem:[%s11375_s2 + $0x48] sm:$0xf] }
0x1002   : > { %5219 = vrot.lane.b32.xlu1 %v5214_v28, %s9342_s11 }
0x1072   : > { %v5218_v27 = vpop.permute.xlu0 %5217 }
0x1073   : > { %v5223_v34 = vsel %vm1291_vm6, 0, %v5218_v27 }
0x1074   : > { %5230 = vrot.lane.b32.xlu0 %v5223_v34, %s9338_s15  ;;  %v5220_v29 = vpop.permute.xlu1 %5219  ;;  %v5288_v39 = vsel %vm3364_vm11, %v5223_v34, 0 }
0x1075   : > { %v5221_v35 = vsel %vm1291_vm6, %v5218_v27, %v5220_v29 }
0x1076   : > { %v5225_v38 = vsel %vm5035_vm0, %v5221_v35, 0 }
0x1077   : > { %5232 = vrot.lane.b32.xlu1 %v5225_v38, %s9338_s15  ;;  %8373 = vmatprep.subr.msk.bf16.mxu1 %vm3364_vm11, %v5225_v38 }
0x1078   : > { %5334 = vrot.lane.b32.xlu0 %v5223_v34, %s9339_s16  ;;  %5307 = vmatpush1.bf16.msra.mxu1 %v5288_v39 }
0x1079   : > { %8698 = vmatprep.subr.bf16.mxu1 %v9344_v60 }
0x107b   : > { %5336 = vrot.lane.b32.xlu1 %v5225_v38, %s9339_s16  ;;  %8374 = vmatmul.mubr.msk.bf16.vlgmr.msra.gmra.mxu1 %vm3360_vm12, %v5226_v33  ;;  %v5458_v33 = vld [vmem:[%s11374_s1 + $0x70] sm:$0xf] }
0x107c   : > { %5394 = vperm.xlu0 %8859, %v5391_v7   ;;  %8700 = vmatprep.mubr.msk.bf16.mxu1 %vm9345_vm13, %v9344_v60  ;;  %v5460_v7 = vld [vmem:[%s11375_s2 + $0x50] sm:$0xff] }
0x10e6   : > { %v5231_v45 = vpop.permute.xlu0 %5230 }
0x10e9   : > { %v5233_v36 = vpop.permute.xlu1 %5232 }
0x10ea   : > { %v5234_v57 = vsel %vm438_vm1, %v5231_v45, %v5233_v36  ;;  %8371 = vmatprep.subr.msk.bf16.mxu0 %vm3364_vm11, %v5233_v36  ;;  %v5335_v1 = vpop.permute.xlu0 %5334 }
0x10eb   : > { %v5239_v2 = vsel %vm3364_vm11, %v5234_v57, 0 }
0x10ec   : > { %5259 = vmatpush1.bf16.msra.mxu0 %v5239_v2 }
0x10ed   : > { %v5337_v40 = vpop.permute.xlu1 %5336 }
0x10ee   : > { %v5338_v44 = vsel %vm748_vm3, %v5335_v1, %v5337_v40  ;;  %8375 = vmatprep.subr.msk.bf16.mxu0 %vm3364_vm11, %v5337_v40 }
0x10ef   : > { %v5343_v13 = vsel %vm3364_vm11, %v5338_v44, 0  ;;  %8372 = vmatmul.mubr.msk.bf16.vlgmr.msra.gmra.mxu0 %vm3360_vm12, %v5227_v5 }
0x10f0   : > { %5363 = vmatpush1.bf16.msra.mxu0 %v5343_v13  ;;  %5380 = vmatprep.mubr.bf16.mxu0 %v9337_v20 }
0x10f1   : > { %8704 = vmatprep.subr.bf16.mxu0 %v9344_v60 }
0x10f7   : > { %8376 = vmatmul.mubr.msk.bf16.vlgmr.msra.gmra.mxu0 %vm3360_vm12, %v5333_v51  ;;  %v5395_v43 = vpop.permute.xlu0 %5394 }
0x10f8   : > { %8706 = vmatprep.mubr.msk.bf16.mxu0 %vm9345_vm13, %v9344_v60 }
0x113b   : > { %v5326_v37 = vpop.f32.mrf.mxu1 }
0x113d   : > { %v5328_v61 = vpop.f32.mrf.mxu1 }
0x113f   : > { %v5330_v18 = vpop.f32.mrf.mxu1 }
0x1141   : > { %v5331_v11 = vpop.f32.mrf.mxu1 }
0x11af   : > { %v5278_v56 = vpop.f32.mrf.mxu0 }
0x11b0   : > { %v5327_v14 = vadd.f32 %v5326_v37, %v5278_v56 }
0x11b1   : > { %v5280_v15 = vpop.f32.mrf.mxu0 }
0x11b2   : > { %v5329_v6 = vadd.f32 %v5328_v61, %v5280_v15 }
0x11b3   : > { %v5282_v62 = vpop.f32.mrf.mxu0 }
0x11b4   : > { %v5012_v62 = vadd.f32 %v10895_v21, %v10936_v55  ;;  %v9126_v21 = vld [vmem:[%s11374_s1 + $0x74] sm:$0xff]   ;;  %v5821_v55 = vld [vmem:[%s11375_s2 + $0x60] sm:$0xff] }
0x11b5   : > { %v5283_v54 = vpop.f32.mrf.mxu0 }
0x11b7   : > { %v5382_v17 = vpop.f32.mrf.mxu0 }
0x11b8   : > { %v5389_v41 = vadd.f32 %v5382_v17, %v5327_v14 }
0x11b9   : > { %v5384_v9 = vpop.f32.mrf.mxu0 }
0x11ba   : > { %v5390_v42 = vadd.f32 %v5384_v9, %v5329_v6  ;;  %v5397_v19 = vadd.f32 %v5395_v43, %v5389_v41 }
0x11bb   : > { %v5386_v47 = vpop.f32.mrf.mxu0 }
0x11bc   : > { %v5398_v23 = vadd.f32 %v5395_v43, %v5390_v42  ;;  %v5399_v22 = vmax.f32 %v5397_v19, 0.0  ;;  %v9127_v47 = vld [vmem:[%s11374_s1 + $0x7c] sm:$0xff]  }
0x11bd   : > { %v5387_v30 = vpop.f32.mrf.mxu0 }
0x11be   : > { %v5400_v31 = vmax.f32 %v5398_v23, 0.0 }
0x11c0   : > { %v5402_v10 = vsel %vm5401_vm2, %v5400_v31, 0.0 }
0x11c1   : > { %v5403_v59 = vadd.f32 %v5402_v10, %v5399_v22  ;;  %v9128_v10 = vld [vmem:[%s11374_s1 + $0x84] sm:$0xff]  }
0x11c3   : > { %5404 = vadd.xlane.f32.xlu1 %v5403_v59  ;;  %v9130_v59 = vld [vmem:[#allocation6 + $0x38] sm:$0xff]  }
0x11d4   : > { %5824 = vperm.xlu1 %8860, %v5820_v12  }
0x11d8   : > { %6129 = vperm.xlu1 %8860, %v6125_v24  }
0x124c   : > { %v5405_v50 = vpop.xlane.xlu1 %5404 }
0x124d   : > { %v5407_v48 = vmul.f32 0.0052083335, %v5405_v50 }
0x124f   : > { %v5409_v53 = vpack.c.bf16 %v5407_v48, %v5407_v48  ;;  %v9129_v48 = vld [vmem:[%s11374_s1 + $0x8c] sm:$0xff]  }
0x1251   : > { %v5415_v25 = vsel %vm3364_vm11, %v5409_v53, 0  ;;  %v9131_v53 = vld [vmem:[#allocation6 + $0x30] sm:$0xff]  }
0x1252   : > { %8699 = vmatpush3.bf16.msra.mxu1 %v5415_v25  ;;  %v9132_v25 = vld [vmem:[#allocation6 + $0x28] sm:$0xff]  }
0x1255   : > { %8701 = vmatmul.mubr.msk.bf16.vlgmr.msra.gmra.mxu1 %vm3360_vm12, %v5408_v52  ;;  %v9133_v52 = vld [vmem:[#allocation6 + $0x20] sm:$0xff]  }
0x1256   : > { %5592 = vmatprep.mubr.bf16.mxu1 %v9337_v20 }
0x1315   : > { %v5451_v58 = vpop.f32.mrf.mxu1 }
0x1316   : > { %v5452_v28 = vadd.f32 %v5451_v58, %v5410_v4  ;;  %v9134_v4 = vld [vmem:[#allocation6 + $0x18] sm:$0xff]   ;;  %v9135_v58 = vld [vmem:[#allocation6 + $0x10] sm:$0xff]  }
0x1317   : > { %v8702_v27 = vpop.f32.mrf.mxu1 }
0x1318   : > { %v5457_v34 = vmax.f32 %v5452_v28, 0.0  ;;  %v9136_v28 = vld [vmem:[#allocation6 + $0x8] sm:$0xff]   ;;  %v9137_v27 = vld [vmem:[#allocation6] sm:$0xff]  }
0x1319   : > { %v5454_v29 = vpop.f32.mrf.mxu1 }
0x131a   : > { %v5459_v35 = vpack.c.bf16 %v5457_v34, %v5457_v34  ;;  %v9138_v34 = vld [vmem:[#allocation6 + $0x58] sm:$0xff]  }
0x131b   : > { %v8703_v38 = vpop.f32.mrf.mxu1  ;;  %v5908_v29 = vand.u32 %v9138_v34, %v10206_v46 }
0x131c   : > { %v5465_v39 = vsel %vm1326_vm7, %v5459_v35, 0  ;;  %v9139_v35 = vld [vmem:[#allocation6 + $0x50] sm:$0xff]   ;;  %v9140_v38 = vld [vmem:[#allocation6 + $0x48] sm:$0xff]   ;;  %vm5959_vm7 = vcmask 793600  }
0x131d   : > { %8705 = vmatpush3.bf16.msra.mxu0 %v5465_v39  ;;  %v9141_v39 = vld [vmem:[#allocation6 + $0x40] sm:$0xff]  }
0x1320   : > { %8707 = vmatmul.mubr.msk.bf16.vlgmr.msra.gmra.mxu0 %vm1322_vm8, %v5458_v33  ;;  %vm5975_vm8 = vcmask 130048  }
0x1321   : > { %5647 = vmatprep.mubr.bf16.mxu0 %v9337_v20 }
0x13e0   : > { %v5501_v45 = vpop.f32.mrf.mxu0 }
0x13e1   : > { %v5502_v36 = vadd.f32 %v5501_v45, %v5460_v7 }
0x13e2   : > { %v8708_v57 = vpop.f32.mrf.mxu0 }
0x13e3   : > { %v5507_v2 = vsub.f32 0.0, %v5502_v36 }
0x13e4   : > { %v5504_v5 = vpop.f32.mrf.mxu0 }
0x13e5   : > { %v5508_v1 = vmul.f32 1.442695, %v5507_v2 }
0x13e6   : > { %v8709_v40 = vpop.f32.mrf.mxu0 }
0x13e7   : > { %9219 = vpow2.f32 %v5508_v1 }
0x13f4   : > { %v9220_v44 = vpop.eup %9219 }
0x13f5   : > { %v5510_v13 = vadd.f32 1.0, %v9220_v44 }
0x13f7   : > { %9221 = vrcp.f32 %v5510_v13 }
0x1404   : > { %v9222_v51 = vpop.eup %9221 }
0x1405   : > { %5515 = vperm.xlu0 %8859, %v9222_v51  }
0x1480   : > { %v5516_v37 = vpop.permute.xlu0 %5515 }
0x1481   : > { %v5518_v61 = vmul.f32 %v5516_v37, %v5399_v22  ;;  %v5519_v18 = vmul.f32 %v5516_v37, %v5400_v31 }
0x1483   : > { %v10964_v11 = vadd.f32 %v5518_v61, %v10850_v16  ;;  %v10967_v56 = vadd.f32 %v5519_v18, %v10856_v49 }
0x1485   : > { %v5522_v15 = vpack.c.bf16 %v10852_v8, %v10964_v11  ;;  %v5523_v54 = vpack.c.bf16 %v5012_v62, %v10967_v56 }
0x1487   : > { %5526 = vrot.lane.b32.xlu0 %v5522_v15, %s9342_s11 }
0x148b   : > { %5528 = vrot.lane.b32.xlu0 %v5523_v54, %s9342_s11 }
0x14f9   : > { %v5527_v14 = vpop.permute.xlu0 %5526 }
0x14fa   : > { %v5532_v17 = vsel %vm1291_vm6, 0, %v5527_v14 }
0x14fb   : > { %5546 = vrot.lane.b32.xlu0 %v5532_v17, %s9338_s15  ;;  %v5611_v8 = vsel %vm4160_vm14, %v5532_v17, 0 }
0x14fd   : > { %v5529_v16 = vpop.permute.xlu0 %5528 }
0x14fe   : > { %v5530_v49 = vsel %vm1291_vm6, %v5527_v14, %v5529_v16 }
0x14ff   : > { %v5534_v6 = vsel %vm5035_vm0, %v5530_v49, 0  ;;  %5665 = vrot.lane.b32.xlu0 %v5532_v17, %s9339_s16 }
0x1500   : > { %8383 = vmatprep.subr.msk.bf16.mxu0 %vm4160_vm14, %v5534_v6 }
0x1501   : > { %5630 = vmatpush1.bf16.msra.mxu0 %v5611_v8 }
0x1503   : > { %5548 = vrot.lane.b32.xlu0 %v5534_v6, %s9338_s15 }
0x1504   : > { %8384 = vmatmul.mubr.msk.bf16.vlgmr.msra.gmra.mxu0 %vm4156_vm15, %v9126_v21 }
0x1505   : > { %5779 = vmatprep.mubr.bf16.mxu0 %v9337_v20 }
0x1507   : > { %5733 = vrot.lane.b32.xlu0 %v5532_v17, %s9340_s17 }
0x150b   : > { %5667 = vrot.lane.b32.xlu0 %v5534_v6, %s9339_s16 }
0x150f   : > { %5735 = vrot.lane.b32.xlu0 %v5534_v6, %s9340_s17 }
0x1513   : > { %5829 = vperm.xlu0 %8859, %v5821_v55  }
0x156d   : > { %v5547_v41 = vpop.permute.xlu0 %5546 }
0x1571   : > { %v5666_v9 = vpop.permute.xlu0 %5665 }
0x1575   : > { %v5549_v43 = vpop.permute.xlu0 %5548 }
0x1576   : > { %v5550_v42 = vsel %vm438_vm1, %v5547_v41, %v5549_v43  ;;  %8380 = vmatprep.subr.msk.bf16.mxu1 %vm4160_vm14, %v5549_v43 }
0x1577   : > { %v5555_v19 = vsel %vm4160_vm14, %v5550_v42, 0 }
0x1578   : > { %5575 = vmatpush1.bf16.msra.mxu1 %v5555_v19  ;;  %v5825_v19 = vpop.permute.xlu1 %5824 }
0x1579   : > { %v5734_v23 = vpop.permute.xlu0 %5733 }
0x157b   : > { %8381 = vmatmul.mubr.msk.bf16.vlgmr.msra.gmra.mxu1 %vm4156_vm15, %v9127_v47 }
0x157c   : > { %5711 = vmatprep.mubr.bf16.mxu1 %v9337_v20 }
0x157d   : > { %v5668_v30 = vpop.permute.xlu0 %5667 }
0x157e   : > { %v5669_v31 = vsel %vm748_vm3, %v5666_v9, %v5668_v30  ;;  %8386 = vmatprep.subr.msk.bf16.mxu1 %vm4160_vm14, %v5668_v30 }
0x157f   : > { %v5674_v22 = vsel %vm4160_vm14, %v5669_v31, 0 }
0x1580   : > { %5694 = vmatpush1.bf16.msra.mxu1 %v5674_v22 }
0x1581   : > { %v5736_v12 = vpop.permute.xlu0 %5735  ;;  %5910 = vmatprep.subr.bf16.mxu1 %v9337_v20 }
0x1582   : > { %v5737_v24 = vsel %vm920_vm4, %v5734_v23, %v5736_v12  ;;  %8389 = vmatprep.subr.msk.bf16.mxu0 %vm4160_vm14, %v5736_v12 }
0x1583   : > { %v5742_v50 = vsel %vm4160_vm14, %v5737_v24, 0  ;;  %8387 = vmatmul.mubr.msk.bf16.vlgmr.msra.gmra.mxu1 %vm4156_vm15, %v9128_v10  ;;  %vm11191_vm14 = vmneg %vm1291_vm6 }
0x1584   : > { %5762 = vmatpush1.bf16.msra.mxu0 %v5742_v50  ;;  %5911 = vmatpush1.bf16.msra.mxu1 %v9130_v59 }
0x1585   : > { %5912 = vmatprep.subr.bf16.mxu1 %v9337_v20  ;;  %8710 = vmatprep.subr.bf16.mxu0 %v9344_v60 }
0x1587   : > { %8390 = vmatmul.mubr.msk.bf16.vlgmr.msra.gmra.mxu0 %vm4156_vm15, %v9129_v48 }
0x1588   : > { %5913 = vmatpush1.bf16.msra.mxu1 %v9131_v53  ;;  %8712 = vmatprep.mubr.msk.bf16.mxu0 %vm9345_vm13, %v9344_v60 }
0x1589   : > { %5914 = vmatprep.subr.bf16.mxu1 %v9337_v20 }
0x158c   : > { %5915 = vmatpush1.bf16.msra.mxu1 %v9132_v25  ;;  %v6126_v25 = vld [vmem:[%s11375_s2 + $0x70] sm:$0xff] }
0x158d   : > { %5916 = vmatprep.subr.bf16.mxu1 %v9337_v20 }
0x158e   : > { %v5830_v30 = vpop.permute.xlu0 %5829 }
0x1590   : > { %5917 = vmatpush1.bf16.msra.mxu1 %v9133_v52 }
0x1591   : > { %5918 = vmatprep.subr.bf16.mxu1 %v9337_v20 }
0x1594   : > { %5919 = vmatpush1.bf16.msra.mxu1 %v9134_v4  ;;  %v9142_v4 = vld [vmem:[%s11374_s1 + $0x9c] sm:$0xff]  }
0x1595   : > { %5920 = vmatprep.subr.bf16.mxu1 %v9337_v20 }
0x1598   : > { %5921 = vmatpush1.bf16.msra.mxu1 %v9135_v58  ;;  %v9143_v58 = vld [vmem:[%s11374_s1 + $0x94] sm:$0xff]  }
0x1599   : > { %5922 = vmatprep.subr.bf16.mxu1 %v9337_v20 }
0x159c   : > { %5923 = vmatpush1.bf16.msra.mxu1 %v9136_v28 }
0x159d   : > { %5924 = vmatprep.subr.bf16.mxu1 %v9337_v20 }
0x15a0   : > { %5925 = vmatpush1.bf16.msra.mxu1 %v9137_v27  ;;  %v9144_v27 = vld [vmem:[%s11374_s1 + $0xa4] sm:$0xff]  }
0x15a1   : > { %5934 = vmatprep.subr.bf16.mxu1 %v9337_v20 }
0x15a4   : > { %5935 = vmatpush2.bf16.msra.mxu1 %v5908_v29 }
0x15a5   : > { %5936 = vmatprep.subr.bf16.mxu1 %v9337_v20 }
0x15a8   : > { %5937 = vmatpush2.bf16.msra.mxu1 %v9139_v35 }
0x15a9   : > { %5938 = vmatprep.subr.bf16.mxu1 %v9337_v20 }
0x15ac   : > { %5939 = vmatpush2.bf16.msra.mxu1 %v9140_v38 }
0x15ad   : > { %5940 = vmatprep.subr.bf16.mxu1 %v9337_v20 }
0x15b0   : > { %5941 = vmatpush2.bf16.msra.mxu1 %v9141_v39 }
0x15b1   : > { %8746 = vmatprep.subr.bf16.mxu1 %v9344_v60 }
0x15c4   : > { %v5649_v33 = vpop.f32.mrf.mxu0 }
0x15c6   : > { %v5651_v45 = vpop.f32.mrf.mxu0 }
0x15c8   : > { %v5653_v57 = vpop.f32.mrf.mxu0 }
0x15ca   : > { %v5655_v1 = vpop.f32.mrf.mxu0 }
0x163b   : > { %v5594_v7 = vpop.f32.mrf.mxu1 }
0x163c   : > { %v5650_v62 = vadd.f32 %v5649_v33, %v5594_v7 }
0x163d   : > { %v5596_v36 = vpop.f32.mrf.mxu1 }
0x163e   : > { %v5652_v18 = vadd.f32 %v5651_v45, %v5596_v36 }
0x163f   : > { %v5598_v46 = vpop.f32.mrf.mxu1 }
0x1640   : > { %v5654_v51 = vadd.f32 %v5653_v57, %v5598_v46 }
0x1641   : > { %v5600_v2 = vpop.f32.mrf.mxu1 }
0x1642   : > { %v5656_v15 = vadd.f32 %v5655_v1, %v5600_v2  ;;  %v6130_v1 = vpop.permute.xlu1 %6129 }
0x1643   : > { %v5713_v5 = vpop.f32.mrf.mxu1 }
0x1644   : > { %v5722_v49 = vadd.f32 %v5713_v5, %v5650_v62 }
0x1645   : > { %v5715_v40 = vpop.f32.mrf.mxu1 }
0x1646   : > { %v5723_v17 = vadd.f32 %v5715_v40, %v5652_v18 }
0x1647   : > { %v5717_v44 = vpop.f32.mrf.mxu1  ;;  %v5781_v13 = vpop.f32.mrf.mxu0 }
0x1648   : > { %v5724_v54 = vadd.f32 %v5717_v44, %v5654_v51  ;;  %v5790_v41 = vadd.f32 %v5781_v13, %v5722_v49  ;;  %v6311_v49 = vld [vmem:[%s11375_s2 + $0x78] sm:$0xff] }
0x1649   : > { %v5719_v37 = vpop.f32.mrf.mxu1  ;;  %v5783_v61 = vpop.f32.mrf.mxu0 }
0x164a   : > { %v5725_v16 = vadd.f32 %v5719_v37, %v5656_v15  ;;  %v5791_v21 = vadd.f32 %v5783_v61, %v5723_v17 }
0x164b   : > { %v5785_v14 = vpop.f32.mrf.mxu0 }
0x164c   : > { %v5792_v6 = vadd.f32 %v5785_v14, %v5724_v54 }
0x164d   : > { %v5787_v8 = vpop.f32.mrf.mxu0 }
0x164e   : > { %v5793_v55 = vadd.f32 %v5787_v8, %v5725_v16  ;;  %v5818_v43 = vpack.c.bf16 %v5792_v6, %v5790_v41  ;;  %v6312_v16 = vld [vmem:[%s11375_s2 + $0x80] sm:$0xff]  ;;  %v9145_v8 = vld [vmem:[%s11374_s1 + $0xb4] sm:$0xff]  }
0x164f   : > { %v9147_v41 = vld [vmem:[%s11374_s1 + $0xbc] sm:$0xff]  }
0x1650   : > { %v5819_v9 = vpack.c.bf16 %v5793_v55, %v5791_v21  ;;  %v9146_v21 = vld [vmem:[%s11374_s1 + $0xac] sm:$0xff]  }
0x1652   : > { %8403 = vmatprep.mubr.msk.bf16.mxu1 %vm5903_vm5, %v5819_v9 }
0x1653   : > { %5943 = vmatmul.mubr.bf16.vlgmr.msra.gmra.mxu1 %v5818_v43 }
0x1654   : > { %8748 = vmatprep.mubr.msk.bf16.mxu1 %vm9345_vm13, %v9344_v60 }
0x1713   : > { %v5944_v42 = vpop.f32.mrf.mxu1 }
0x1714   : > { %v11036_v23 = vadd.f32 %v5944_v42, %v5825_v19 }
0x1715   : > { %v5946_v47 = vpop.f32.mrf.mxu1 }
0x1716   : > { %v5951_v59 = vmax.f32 %v11036_v23, 0.0 }
0x1717   : > { %v5947_v31 = vpop.f32.mrf.mxu1 }
0x1718   : > { %v11038_v22 = vadd.f32 %v5947_v31, %v5830_v30 }
0x1719   : > { %v5949_v10 = vpop.f32.mrf.mxu1 }
0x171a   : > { %v5952_v12 = vmax.f32 %v11038_v22, 0.0 }
0x171c   : > { %v5953_v24 = vpack.c.bf16 %v5952_v12, %v5951_v59 }
0x171e   : > { %5955 = vrot.lane.b32.xlu0 %v5953_v24, %s9342_s11 }
0x1790   : > { %v5956_v50 = vpop.permute.xlu0 %5955 }
0x1791   : > { %v5958_v48 = vsel %vm1291_vm6, 0, %v5956_v50 }
0x1792   : > { %v5960_v53 = vsel %vm5959_vm7, %v5958_v48, 0 }
0x1793   : > { %5972 = vrot.lane.b32.xlu0 %v5960_v53, %s9338_s15 }
0x1797   : > { %6076 = vrot.lane.b32.xlu0 %v5960_v53, %s9339_s16 }
0x179b   : > { %6134 = vperm.xlu0 %8859, %v6126_v25  }
0x1805   : > { %v5973_v52 = vpop.permute.xlu0 %5972 }
0x1806   : > { %8711 = vmatpush3.bf16.msra.mxu0 %v5973_v52 }
0x1807   : > { %8716 = vmatprep.subr.bf16.mxu0 %v9344_v60 }
0x1809   : > { %8713 = vmatmul.mubr.msk.bf16.vlgmr.msra.gmra.mxu0 %vm5975_vm8, %v9142_v4  ;;  %v6077_v28 = vpop.permute.xlu0 %6076 }
0x180a   : > { %8717 = vmatpush3.bf16.msra.mxu0 %v5960_v53  ;;  %8718 = vmatprep.mubr.msk.bf16.mxu0 %vm9345_vm13, %v9344_v60 }
0x180b   : > { %8722 = vmatprep.subr.bf16.mxu0 %v9344_v60 }
0x1811   : > { %8719 = vmatmul.mubr.msk.bf16.vlgmr.msra.gmra.mxu0 %vm5975_vm8, %v9143_v58 }
0x1812   : > { %8723 = vmatpush3.bf16.msra.mxu0 %v6077_v28  ;;  %8724 = vmatprep.mubr.msk.bf16.mxu0 %vm9345_vm13, %v9344_v60 }
0x1813   : > { %8728 = vmatprep.subr.bf16.mxu0 %v9344_v60 }
0x1816   : > { %v6135_v51 = vpop.permute.xlu0 %6134 }
0x1819   : > { %8725 = vmatmul.mubr.msk.bf16.vlgmr.msra.gmra.mxu0 %vm5975_vm8, %v9144_v27 }
0x181a   : > { %8730 = vmatprep.mubr.msk.bf16.mxu0 %vm9345_vm13, %v9344_v60 }
0x18c9   : > { %v6013_v34 = vpop.f32.mrf.mxu0 }
0x18cb   : > { %v8714_v29 = vpop.f32.mrf.mxu0 }
0x18cd   : > { %v6016_v35 = vpop.f32.mrf.mxu0 }
0x18cf   : > { %v8715_v38 = vpop.f32.mrf.mxu0 }
0x18d1   : > { %v6062_v39 = vpop.f32.mrf.mxu0 }
0x18d2   : > { %v6063_v36 = vadd.f32 %v6062_v39, %v6013_v34 }
0x18d3   : > { %v8720_v33 = vpop.f32.mrf.mxu0 }
0x18d5   : > { %v6065_v7 = vpop.f32.mrf.mxu0 }
0x18d6   : > { %v6066_v5 = vadd.f32 %v6065_v7, %v6016_v35 }
0x18d7   : > { %v8721_v45 = vpop.f32.mrf.mxu0 }
0x18d9   : > { %v6116_v46 = vpop.f32.mrf.mxu0 }
0x18da   : > { %v6123_v57 = vadd.f32 %v6116_v46, %v6063_v36 }
0x18db   : > { %v8726_v2 = vpop.f32.mrf.mxu0 }
0x18dc   : > { %v6137_v44 = vadd.f32 %v6130_v1, %v6123_v57  ;;  %v6337_v2 = vld [vmem:[%s11374_s1 + $0xc4] sm:$0xf] }
0x18dd   : > { %v6119_v40 = vpop.f32.mrf.mxu0 }
0x18de   : > { %v6124_v13 = vadd.f32 %v6119_v40, %v6066_v5  ;;  %v6139_v18 = vmax.f32 %v6137_v44, 0.0  ;;  %v6339_v5 = vld [vmem:[%s11375_s2 + $0x88] sm:$0xff] }
0x18df   : > { %v8727_v37 = vpop.f32.mrf.mxu0 }
0x18e0   : > { %v6138_v61 = vadd.f32 %v6135_v51, %v6124_v13 }
0x18e2   : > { %v6140_v15 = vmax.f32 %v6138_v61, 0.0 }
0x18e4   : > { %v6141_v62 = vpack.c.bf16 %v6140_v15, %v6139_v18  ;;  %v9148_v15 = vld [vmem:[%s11374_s1 + $0xc8] sm:$0xff]  }
0x18e6   : > { %6143 = vrot.lane.b32.xlu1 %v6141_v62, %s9342_s11  ;;  %v9149_v62 = vld [vmem:[#allocation2 + $0x50] ss:$8 sps:$4 sm:$0xff]  }
0x1958   : > { %v6144_v54 = vpop.permute.xlu1 %6143 }
0x1959   : > { %v6146_v14 = vsel %vm1291_vm6, 0, %v6144_v54  ;;  %v9151_v54 = vld [vmem:[#allocation2 + $0x54] ss:$8 sps:$4 sm:$0xff]  }
0x195a   : > { %v6147_v17 = vsel %vm5959_vm7, %v6146_v14, 0  ;;  %v9154_v14 = vld [vmem:[#allocation2 + $0x44] ss:$8 sps:$4 sm:$0xff]  }
0x195b   : > { %6262 = vrot.lane.b32.xlu1 %v6147_v17, %s9339_s16  ;;  %6159 = vrot.lane.b32.xlu0 %v6147_v17, %s9338_s15 }
0x195f   : > { %6320 = vperm.xlu1 %8860, %v6312_v16   ;;  %6315 = vperm.xlu0 %8859, %v6311_v49   ;;  %v9157_v16 = vld [vmem:[#allocation2 + $0x34] ss:$8 sps:$4 sm:$0xff]   ;;  %v9155_v49 = vld [vmem:[#allocation2 + $0x30] ss:$8 sps:$4 sm:$0xff]  }
0x19cd   : > { %v6160_v6 = vpop.permute.xlu0 %6159  ;;  %v6263_v55 = vpop.permute.xlu1 %6262 }
0x19ce   : > { %8729 = vmatpush3.bf16.msra.mxu0 %v6160_v6  ;;  %v9160_v6 = vld [vmem:[#allocation2 + $0x24] ss:$8 sps:$4 sm:$0xff]  }
0x19cf   : > { %8734 = vmatprep.subr.bf16.mxu0 %v9344_v60 }
0x19d1   : > { %8731 = vmatmul.mubr.msk.bf16.vlgmr.msra.gmra.mxu0 %vm5975_vm8, %v9145_v8  ;;  %v9158_v8 = vld [vmem:[#allocation2 + $0x20] ss:$8 sps:$4 sm:$0xff]  }
0x19d2   : > { %8735 = vmatpush3.bf16.msra.mxu0 %v6147_v17  ;;  %8736 = vmatprep.mubr.msk.bf16.mxu0 %vm9345_vm13, %v9344_v60  ;;  %v9152_v17 = vld [vmem:[#allocation2 + $0x40] ss:$8 sps:$4 sm:$0xff]  }
0x19d3   : > { %8740 = vmatprep.subr.bf16.mxu0 %v9344_v60 }
0x19d9   : > { %8737 = vmatmul.mubr.msk.bf16.vlgmr.msra.gmra.mxu0 %vm5975_vm8, %v9146_v21  ;;  %v6387_v21 = vld [vmem:[%s11375_s2 + $0x90] sm:$0xff] }
0x19da   : > { %8741 = vmatpush3.bf16.msra.mxu0 %v6263_v55  ;;  %8742 = vmatprep.mubr.msk.bf16.mxu0 %vm9345_vm13, %v9344_v60  ;;  %v6316_v53 = vpop.permute.xlu0 %6315  ;;  %v6321_v34 = vpop.permute.xlu1 %6320 }
0x19db   : > { %8752 = vmatprep.subr.bf16.mxu0 %v9344_v60 }
0x19e1   : > { %8743 = vmatmul.mubr.msk.bf16.vlgmr.msra.gmra.mxu0 %vm5975_vm8, %v9147_v41 }
0x19e2   : > { %8754 = vmatprep.mubr.msk.bf16.mxu0 %vm9345_vm13, %v9344_v60 }
0x1a91   : > { %v6199_v9 = vpop.f32.mrf.mxu0 }
0x1a93   : > { %v8732_v43 = vpop.f32.mrf.mxu0 }
0x1a94   : > { %v6388_v43 = vld [vmem:[%s11375_s2 + $0x98] sm:$0xff] }
0x1a95   : > { %v6202_v42 = vpop.f32.mrf.mxu0 }
0x1a97   : > { %v8733_v19 = vpop.f32.mrf.mxu0 }
0x1a99   : > { %v6248_v47 = vpop.f32.mrf.mxu0 }
0x1a9a   : > { %v6249_v24 = vadd.f32 %v6248_v47, %v6199_v9 }
0x1a9b   : > { %v8738_v30 = vpop.f32.mrf.mxu0 }
0x1a9d   : > { %v6251_v31 = vpop.f32.mrf.mxu0 }
0x1a9e   : > { %v6252_v52 = vadd.f32 %v6251_v31, %v6202_v42 }
0x1a9f   : > { %v8739_v10 = vpop.f32.mrf.mxu0 }
0x1aa1   : > { %v6302_v50 = vpop.f32.mrf.mxu0 }
0x1aa2   : > { %v6309_v48 = vadd.f32 %v6302_v50, %v6249_v24 }
0x1aa3   : > { %v8744_v25 = vpop.f32.mrf.mxu0 }
0x1aa4   : > { %v11107_v4 = vadd.f32 %v6316_v53, %v6309_v48 }
0x1aa5   : > { %v6305_v58 = vpop.f32.mrf.mxu0 }
0x1aa6   : > { %v6325_v28 = vmax.f32 %v11107_v4, 0.0  ;;  %v6310_v27 = vadd.f32 %v6305_v58, %v6252_v52  ;;  %v9163_v52 = vld [vmem:[#allocation2 + $0x14] ss:$8 sps:$4 sm:$0xff]   ;;  %v9161_v58 = vld [vmem:[#allocation2 + $0x10] ss:$8 sps:$4 sm:$0xff]  }
0x1aa7   : > { %v8745_v29 = vpop.f32.mrf.mxu0 }
0x1aa8   : > { %v11110_v35 = vadd.f32 %v6321_v34, %v6310_v27  ;;  %v6328_v38 = vsel %vm6327_vm9, %v6325_v28, 0.0  ;;  %v9166_v34 = vld [vmem:[#allocation2 + $0x4] ss:$8 sps:$4 sm:$0xff]   ;;  %v6588_v29 = vpack.c.bf16 %v10964_v11, %v10964_v11 }
0x1aa9   : > { %6329 = vadd.xlane.f32.xlu0 %v6328_v38  ;;  %v9164_v38 = vld [vmem:[#allocation2] ss:$8 sps:$4 sm:$0xff]  }
0x1aaa   : > { %v6326_v39 = vmax.f32 %v11110_v35, 0.0 }
0x1aac   : > { %v6331_v33 = vsel %vm6327_vm9, %v6326_v39, 0.0 }
0x1aad   : > { %6332 = vadd.xlane.f32.xlu1 %v6331_v33 }
0x1b32   : > { %v6330_v7 = vpop.xlane.xlu0 %6329 }
0x1b33   : > { %v6335_v36 = vmul.f32 0.010416667, %v6330_v7  ;;  %v6589_v7 = vpack.c.bf16 %v10967_v56, %v10967_v56 }
0x1b36   : > { %v6333_v45 = vpop.xlane.xlu1 %6332 }
0x1b37   : > { %v6336_v46 = vmul.f32 0.010416667, %v6333_v45 }
0x1b39   : > { %v6338_v57 = vpack.c.bf16 %v6336_v46, %v6335_v36 }
0x1b3b   : > { %8747 = vmatpush3.bf16.msra.mxu1 %v6338_v57 }
0x1b3c   : > { %6547 = vmatprep.subr.bf16.mxu1 %v9151_v54 }
0x1b3e   : > { %8749 = vmatmul.mubr.msk.bf16.vlgmr.msra.gmra.mxu1 %vm5975_vm8, %v6337_v2 }
0x1b3f   : > { %6575 = vmatprep.mubr.bf16.mxu1 %v9337_v20  ;;  %6548 = vmatpush1.bf16.msra.mxu1 %v9149_v62 }
0x1b40   : > { %6549 = vmatprep.subr.bf16.mxu1 %v9154_v14  ;;  %v6861_v14 = vld [vmem:[%s11375_s2 + $0xa0] sm:$0xff] }
0x1b43   : > { %6550 = vmatpush1.bf16.msra.mxu1 %v9152_v17 }
0x1b44   : > { %6551 = vmatprep.subr.bf16.mxu1 %v9157_v16 }
0x1b47   : > { %6552 = vmatpush1.bf16.msra.mxu1 %v9155_v49 }
0x1b48   : > { %6553 = vmatprep.subr.bf16.mxu1 %v9160_v6 }
0x1b4b   : > { %6554 = vmatpush1.bf16.msra.mxu1 %v9158_v8  ;;  %v6615_v8 = vld [vmem:[%s11374_s1 + $0xd4] sm:$0xf] }
0x1b4c   : > { %6555 = vmatprep.subr.bf16.mxu1 %v9163_v52 }
0x1b4f   : > { %6556 = vmatpush1.bf16.msra.mxu1 %v9161_v58  ;;  %v6731_v58 = vld [vmem:[%s11374_s1 + $0xd8] sm:$0xf] }
0x1b50   : > { %6557 = vmatprep.subr.bf16.mxu1 %v9166_v34  ;;  %v9167_v34 = vld [vmem:[#allocation4 + $0xa8] ss:$12 sps:$4 sm:$0xff]  }
0x1b53   : > { %6558 = vmatpush1.bf16.msra.mxu1 %v9164_v38  ;;  %v9173_v38 = vld [vmem:[#allocation4 + $0x94] ss:$12 sps:$4 sm:$0xff]  }
0x1bfe   : > { %v6377_v1 = vpop.f32.mrf.mxu1 }
0x1bff   : > { %v6378_v40 = vadd.f32 %v6377_v1, %v6339_v5 }
0x1c00   : > { %v8750_v44 = vpop.f32.mrf.mxu1 }
0x1c01   : > { %v6383_v13 = vmax.f32 %v6378_v40, 0.0 }
0x1c02   : > { %v6380_v51 = vpop.f32.mrf.mxu1 }
0x1c03   : > { %v6386_v37 = vpack.c.bf16 %v6383_v13, %v6383_v13 }
0x1c04   : > { %v8751_v61 = vpop.f32.mrf.mxu1 }
0x1c05   : > { %v6398_v18 = vsel %vm3364_vm11, %v6386_v37, 0 }
0x1c06   : > { %8753 = vmatpush3.bf16.msra.mxu0 %v6398_v18 }
0x1c09   : > { %8755 = vmatmul.mubr.msk.bf16.vlgmr.msra.gmra.mxu0 %vm3360_vm12, %v9148_v15 }
0x1c0a   : > { %6674 = vmatprep.mubr.bf16.mxu0 %v9337_v20 }
0x1cc9   : > { %v6434_v55 = vpop.f32.mrf.mxu0 }
0x1cca   : > { %v6435_v41 = vadd.f32 %v6434_v55, %v6387_v21 }
0x1ccb   : > { %v8756_v9 = vpop.f32.mrf.mxu0 }
0x1ccc   : > { %v6441_v42 = vsub.f32 0.0, %v6435_v41  ;;  %v7218_v9 = vld [vmem:[%s11374_s1 + $0xe0] sm:$0xf] }
0x1ccd   : > { %v6437_v19 = vpop.f32.mrf.mxu0 }
0x1cce   : > { %v6443_v47 = vmul.f32 1.442695, %v6441_v42  ;;  %v6438_v30 = vadd.f32 %v6437_v19, %v6388_v43 }
0x1ccf   : > { %v8757_v31 = vpop.f32.mrf.mxu0 }
0x1cd0   : > { %9223 = vpow2.f32 %v6443_v47  ;;  %v6442_v10 = vsub.f32 0.0, %v6438_v30  ;;  %v6614_v31 = vld [vmem:[%s11374_s1 + $0xd0] sm:$0xf] }
0x1cd2   : > { %v6445_v24 = vmul.f32 1.442695, %v6442_v10 }
0x1cd4   : > { %9225 = vpow2.f32 %v6445_v24 }
0x1cdd   : > { %v9224_v50 = vpop.eup %9223 }
0x1cde   : > { %v6447_v48 = vadd.f32 1.0, %v9224_v50  ;;  %v9169_v50 = vld [vmem:[#allocation4 + $0xac] ss:$12 sps:$4 sm:$0xff]  }
0x1ce0   : > { %9227 = vrcp.f32 %v6447_v48 }
0x1ce1   : > { %v9226_v53 = vpop.eup %9225 }
0x1ce2   : > { %v6448_v25 = vadd.f32 1.0, %v9226_v53 }
0x1ce4   : > { %9229 = vrcp.f32 %v6448_v25 }
0x1ced   : > { %v9228_v27 = vpop.eup %9227 }
0x1cee   : > { %6455 = vperm.xlu0 %8859, %v9228_v27   ;;  %v6796_v27 = vld [vmem:[%s11374_s1 + $0xdc] sm:$0xf] }
0x1cf1   : > { %v9230_v33 = vpop.eup %9229 }
0x1cf2   : > { %6598 = vrot.lane.b32.xlu0 %v6588_v29, %s9342_s11  ;;  %6460 = vperm.xlu1 %8860, %v9230_v33   ;;  %v9170_v29 = vld [vmem:[#allocation4 + $0xb0] ss:$12 sps:$4 sm:$0xff]  }
0x1cf3   : > { %v9171_v33 = vld [vmem:[#allocation4 + $0x90] ss:$12 sps:$4 sm:$0xff]  }
0x1cf6   : > { %6600 = vrot.lane.b32.xlu1 %v6589_v7, %s9342_s11  ;;  %v9174_v7 = vld [vmem:[#allocation4 + $0x98] ss:$12 sps:$4 sm:$0xff]  }
0x1d69   : > { %v6456_v45 = vpop.permute.xlu0 %6455 }
0x1d6a   : > { %v6463_v36 = vmul.f32 %v6456_v45, %v6325_v28  ;;  %v9177_v45 = vld [vmem:[#allocation4 + $0x7c] ss:$12 sps:$4 sm:$0xff]  }
0x1d6c   : > { %v6465_v57 = vadd.f32 %v6463_v36, %v5951_v59  ;;  %v9175_v36 = vld [vmem:[#allocation4 + $0x78] ss:$12 sps:$4 sm:$0xff]  }
0x1d6d   : > { %v6461_v46 = vpop.permute.xlu1 %6460  ;;  %v6599_v13 = vpop.permute.xlu0 %6598 }
0x1d6e   : > { %v6464_v11 = vmul.f32 %v6461_v46, %v6326_v39  ;;  %v6608_v22 = vsel %vm1291_vm6, 0, %v6599_v13  ;;  %v9178_v46 = vld [vmem:[#allocation4 + $0x80] ss:$12 sps:$4 sm:$0xff]  }
0x1d6f   : > { %v6686_v41 = vsel %vm3364_vm11, %v6608_v22, 0 }
0x1d70   : > { %v6466_v2 = vadd.f32 %v6464_v11, %v5952_v12  ;;  %v9181_v11 = vld [vmem:[#allocation4 + $0x64] ss:$12 sps:$4 sm:$0xff]  }
0x1d71   : > { %v6601_v28 = vpop.permute.xlu1 %6600 }
0x1d72   : > { %v6467_v5 = vpack.c.bf16 %v6466_v2, %v6465_v57  ;;  %v6603_v23 = vsel %vm1291_vm6, %v6599_v13, %v6601_v28  ;;  %v9179_v57 = vld [vmem:[#allocation4 + $0x60] ss:$12 sps:$4 sm:$0xff]   ;;  %v9182_v2 = vld [vmem:[#allocation4 + $0x68] ss:$12 sps:$4 sm:$0xff]   ;;  %v9190_v28 = vld [vmem:[#allocation4 + $0x38] ss:$12 sps:$4 sm:$0xff]  }
0x1d73   : > { %v6613_v59 = vsel %vm5035_vm0, %v6603_v23, 0  ;;  %v9191_v13 = vld [vmem:[#allocation4 + $0x18] ss:$12 sps:$4 sm:$0xff]  }
0x1d74   : > { %8431 = vmatmul.mubr.msk.bf16.vlgmr.msra.gmra.mxu1 %vm6327_vm9, %v6467_v5  ;;  %v9185_v5 = vld [vmem:[#allocation4 + $0x4c] ss:$12 sps:$4 sm:$0xff]   ;;  %v9197_v23 = vld [vmem:[#allocation4 + $0x4] ss:$12 sps:$4 sm:$0xff]  }
0x1d75   : > { %6850 = vmatprep.mubr.bf16.mxu1 %v9337_v20 }
0x1e34   : > { %v6577_v56 = vpop.f32.mrf.mxu1 }
0x1e36   : > { %v6579_v1 = vpop.f32.mrf.mxu1 }
0x1e38   : > { %v6581_v40 = vpop.f32.mrf.mxu1 }
0x1e39   : > { %v6586_v4 = vpack.c.bf16 %v6581_v40, %v6577_v56  ;;  %v9183_v56 = vld [vmem:[#allocation4 + $0x48] ss:$12 sps:$4 sm:$0xff]  }
0x1e3a   : > { %v6583_v44 = vpop.f32.mrf.mxu1  ;;  %v9189_v40 = vld [vmem:[#allocation4 + $0x34] ss:$12 sps:$4 sm:$0xff]  }
0x1e3b   : > { %v6587_v35 = vpack.c.bf16 %v6583_v44, %v6579_v1  ;;  %6594 = vrot.lane.b32.xlu0 %v6586_v4, %s9342_s11  ;;  %v9186_v1 = vld [vmem:[#allocation4 + $0x50] ss:$12 sps:$4 sm:$0xff]  }
0x1e3c   : > { %v9187_v4 = vld [vmem:[#allocation4 + $0x30] ss:$12 sps:$4 sm:$0xff]  }
0x1e3d   : > { %6596 = vrot.lane.b32.xlu1 %v6587_v35, %s9342_s11  ;;  %v9193_v44 = vld [vmem:[#allocation4 + $0x1c] ss:$12 sps:$4 sm:$0xff]   ;;  %v9194_v35 = vld [vmem:[#allocation4 + $0x20] ss:$12 sps:$4 sm:$0xff]  }
0x1e3f   : > { %6624 = vrot.lane.b32.xlu0 %v6608_v22, %s9338_s15 }
0x1e41   : > { %6626 = vrot.lane.b32.xlu1 %v6613_v59, %s9338_s15 }
0x1ead   : > { %v6595_v12 = vpop.permute.xlu0 %6594 }
0x1eae   : > { %v6605_v39 = vsel %vm1291_vm6, 0, %v6595_v12 }
0x1eaf   : > { %6620 = vrot.lane.b32.xlu0 %v6605_v39, %s9338_s15  ;;  %v6597_v51 = vpop.permute.xlu1 %6596 }
0x1eb0   : > { %v6602_v37 = vsel %vm1291_vm6, %v6595_v12, %v6597_v51  ;;  %v9202_v51 = vld [vmem:[#allocation4 + $0x110] ss:$12 sps:$4 sm:$0xff]  }
0x1eb1   : > { %v6610_v61 = vsel %vm5035_vm0, %v6602_v37, 0  ;;  %v6625_v18 = vpop.permute.xlu0 %6624 }
0x1eb2   : > { %6622 = vrot.lane.b32.xlu1 %v6610_v61, %s9338_s15 }
0x1eb3   : > { %6736 = vrot.lane.b32.xlu0 %v6608_v22, %s9339_s16  ;;  %v6627_v15 = vpop.permute.xlu1 %6626 }
0x1eb4   : > { %v6629_v62 = vsel %vm438_vm1, %v6625_v18, %v6627_v15  ;;  %8432 = vmatprep.subr.msk.bf16.mxu0 %vm3364_vm11, %v6627_v15  ;;  %v9206_v18 = vld [vmem:[#allocation4 + $0xf8] ss:$12 sps:$4 sm:$0xff]   ;;  %v9209_v15 = vld [vmem:[#allocation4 + $0xdc] ss:$12 sps:$4 sm:$0xff]  }
0x1eb5   : > { %v6637_v54 = vsel %vm3364_vm11, %v6629_v62, 0  ;;  %v9207_v62 = vld [vmem:[#allocation4 + $0xd8] ss:$12 sps:$4 sm:$0xff]  }
0x1eb6   : > { %6738 = vrot.lane.b32.xlu1 %v6613_v59, %s9339_s16  ;;  %6655 = vmatpush1.bf16.msra.mxu0 %v6637_v54  ;;  %v9210_v54 = vld [vmem:[#allocation4 + $0xe0] ss:$12 sps:$4 sm:$0xff]  }
0x1eb7   : > { %6801 = vrot.lane.b32.xlu0 %v6608_v22, %s9340_s17  ;;  %v9195_v22 = vld [vmem:[#allocation4] ss:$12 sps:$4 sm:$0xff]  }
0x1eba   : > { %6803 = vrot.lane.b32.xlu1 %v6613_v59, %s9340_s17 }
0x1ebb   : > { %6732 = vrot.lane.b32.xlu0 %v6605_v39, %s9339_s16 }
0x1ebe   : > { %6734 = vrot.lane.b32.xlu1 %v6610_v61, %s9339_s16 }
0x1ebf   : > { %6797 = vrot.lane.b32.xlu0 %v6605_v39, %s9340_s17  ;;  %v9199_v39 = vld [vmem:[#allocation4 + $0x108] ss:$12 sps:$4 sm:$0xff]  }
0x1ec2   : > { %6799 = vrot.lane.b32.xlu1 %v6610_v61, %s9340_s17  ;;  %v9203_v61 = vld [vmem:[#allocation4 + $0xf0] ss:$12 sps:$4 sm:$0xff]  }
0x1ec3   : > { %6864 = vperm.xlu0 %8859, %v6861_v14   ;;  %v9213_v14 = vld [vmem:[#allocation4 + $0xc4] ss:$12 sps:$4 sm:$0xff]  }
0x1f21   : > { %v6621_v17 = vpop.permute.xlu0 %6620 }
0x1f24   : > { %v6623_v16 = vpop.permute.xlu1 %6622 }
0x1f25   : > { %v6628_v49 = vsel %vm438_vm1, %v6621_v17, %v6623_v16  ;;  %v6737_v6 = vpop.permute.xlu0 %6736  ;;  %6656 = vmatprep.subr.bf16.mxu0 %v6623_v16  ;;  %v9211_v17 = vld [vmem:[#allocation4 + $0xc0] ss:$12 sps:$4 sm:$0xff]   ;;  %v9214_v16 = vld [vmem:[#allocation4 + $0xc8] ss:$12 sps:$4 sm:$0xff]  }
0x1f26   : > { %6657 = vmatpush1.bf16.msra.mxu0 %v6628_v49 }
0x1f27   : > { %8434 = vmatprep.subr.msk.bf16.mxu0 %vm3364_vm11, %v6613_v59  ;;  %v9198_v59 = vld [vmem:[#allocation4 + $0x8] ss:$12 sps:$4 sm:$0xff]  }
0x1f28   : > { %v6739_v21 = vpop.permute.xlu1 %6738 }
0x1f29   : > { %v6802_v55 = vpop.permute.xlu0 %6801  ;;  %8433 = vmatmul.mubr.msk.bf16.vlgmr.msra.gmra.mxu0 %vm6632_vm10, %v6615_v8  ;;  %v6741_v19 = vsel %vm748_vm3, %v6737_v6, %v6739_v21 }
0x1f2a   : > { %6703 = vmatpush1.bf16.msra.mxu0 %v6686_v41  ;;  %6722 = vmatprep.mubr.bf16.mxu0 %v9337_v20  ;;  %v6748_v24 = vsel %vm3364_vm11, %v6741_v19, 0 }
0x1f2b   : > { %8435 = vmatprep.subr.msk.bf16.mxu0 %vm5035_vm0, %v6602_v37  ;;  %v9205_v37 = vld [vmem:[#allocation4 + $0xf4] ss:$12 sps:$4 sm:$0xff]  }
0x1f2c   : > { %v6804_v43 = vpop.permute.xlu1 %6803 }
0x1f2d   : > { %v6806_v42 = vsel %vm920_vm4, %v6802_v55, %v6804_v43  ;;  %8441 = vmatprep.subr.msk.bf16.mxu1 %vm3364_vm11, %v6804_v43  ;;  %v6733_v30 = vpop.permute.xlu0 %6732 }
0x1f2e   : > { %v6813_v47 = vsel %vm3364_vm11, %v6806_v42, 0  ;;  %8437 = vmatpush1.bf16.msk.msra.mxu0 %vm11191_vm14, %v6595_v12  ;;  %v9201_v12 = vld [vmem:[#allocation4 + $0x10c] ss:$12 sps:$4 sm:$0xff]  }
0x1f2f   : > { %8439 = vmatprep.subr.msk.bf16.mxu0 %vm3364_vm11, %v6739_v21  ;;  %6831 = vmatpush1.bf16.msra.mxu1 %v6813_v47 }
0x1f30   : > { %v6735_v10 = vpop.permute.xlu1 %6734 }
0x1f31   : > { %8438 = vmatmul.mubr.msk.bf16.vlgmr.msra.gmra.mxu0 %vm6632_vm10, %v6614_v31  ;;  %v6798_v48 = vpop.permute.xlu0 %6797  ;;  %v6740_v25 = vsel %vm748_vm3, %v6733_v30, %v6735_v10 }
0x1f32   : > { %6766 = vmatpush1.bf16.msra.mxu0 %v6748_v24  ;;  %6785 = vmatprep.mubr.bf16.mxu0 %v9337_v20 }
0x1f33   : > { %6767 = vmatprep.subr.bf16.mxu0 %v6735_v10 }
0x1f34   : > { %v6800_v53 = vpop.permute.xlu1 %6799 }
0x1f35   : > { %v6805_v52 = vsel %vm920_vm4, %v6798_v48, %v6800_v53  ;;  %6832 = vmatprep.subr.bf16.mxu1 %v6800_v53 }
0x1f36   : > { %6768 = vmatpush1.bf16.msra.mxu0 %v6740_v25  ;;  %6833 = vmatpush1.bf16.msra.mxu1 %v6805_v52 }
0x1f37   : > { %7116 = vmatprep.subr.bf16.mxu0 %v9169_v50  ;;  %7157 = vmatprep.subr.bf16.mxu1 %v9337_v20 }
0x1f39   : > { %8440 = vmatmul.mubr.msk.bf16.vlgmr.msra.gmra.mxu0 %vm6632_vm10, %v6731_v58  ;;  %8442 = vmatmul.mubr.msk.bf16.vlgmr.msra.gmra.mxu1 %vm6632_vm10, %v6796_v27 }
0x1f3a   : > { %7117 = vmatpush1.bf16.msra.mxu0 %v9167_v34  ;;  %7158 = vmatpush1.bf16.msra.mxu1 %v9170_v29 }
0x1f3b   : > { %7118 = vmatprep.subr.bf16.mxu0 %v9173_v38  ;;  %7159 = vmatprep.subr.bf16.mxu1 %v9337_v20 }
0x1f3e   : > { %7119 = vmatpush1.bf16.msra.mxu0 %v9171_v33  ;;  %7160 = vmatpush1.bf16.msra.mxu1 %v9174_v7  ;;  %v6865_v48 = vpop.permute.xlu0 %6864 }
0x1f3f   : > { %7120 = vmatprep.subr.bf16.mxu0 %v9177_v45  ;;  %7161 = vmatprep.subr.bf16.mxu1 %v9337_v20 }
0x1f42   : > { %7121 = vmatpush1.bf16.msra.mxu0 %v9175_v36  ;;  %7162 = vmatpush1.bf16.msra.mxu1 %v9178_v46 }
0x1f43   : > { %7122 = vmatprep.subr.bf16.mxu0 %v9181_v11  ;;  %7163 = vmatprep.subr.bf16.mxu1 %v9337_v20 }
0x1f46   : > { %7123 = vmatpush1.bf16.msra.mxu0 %v9179_v57  ;;  %7164 = vmatpush1.bf16.msra.mxu1 %v9182_v2 }
0x1f47   : > { %7124 = vmatprep.subr.bf16.mxu0 %v9185_v5  ;;  %7165 = vmatprep.subr.bf16.mxu1 %v9337_v20 }
0x1f4a   : > { %7125 = vmatpush1.bf16.msra.mxu0 %v9183_v56  ;;  %7166 = vmatpush1.bf16.msra.mxu1 %v9186_v1 }
0x1f4b   : > { %7167 = vmatprep.subr.bf16.mxu1 %v9337_v20  ;;  %7126 = vmatprep.subr.bf16.mxu0 %v9189_v40 }
0x1f4e   : > { %7127 = vmatpush1.bf16.msra.mxu0 %v9187_v4  ;;  %7168 = vmatpush1.bf16.msra.mxu1 %v9190_v28 }
0x1f4f   : > { %7169 = vmatprep.subr.bf16.mxu1 %v9337_v20  ;;  %7128 = vmatprep.subr.bf16.mxu0 %v9193_v44 }
0x1f52   : > { %7129 = vmatpush1.bf16.msra.mxu0 %v9191_v13  ;;  %7170 = vmatpush1.bf16.msra.mxu1 %v9194_v35 }
0x1f53   : > { %7171 = vmatprep.subr.bf16.mxu1 %v9337_v20  ;;  %7130 = vmatprep.subr.bf16.mxu0 %v9197_v23 }
0x1f56   : > { %7131 = vmatpush1.bf16.msra.mxu0 %v9195_v22  ;;  %7172 = vmatpush1.bf16.msra.mxu1 %v9198_v59 }
0x1f57   : > { %7181 = vmatprep.subr.bf16.mxu1 %v9337_v20  ;;  %7140 = vmatprep.subr.bf16.mxu0 %v9201_v12  ;;  %v7608_v12 = vld [vmem:[%s11375_s2 + $0xa8] sm:$0xff] }
0x1f5a   : > { %7141 = vmatpush2.bf16.msra.mxu0 %v9199_v39  ;;  %7182 = vmatpush2.bf16.msra.mxu1 %v9202_v51 }
0x1f5b   : > { %7183 = vmatprep.subr.bf16.mxu1 %v9337_v20  ;;  %7142 = vmatprep.subr.bf16.mxu0 %v9205_v37 }
0x1f5e   : > { %7143 = vmatpush2.bf16.msra.mxu0 %v9203_v61  ;;  %7184 = vmatpush2.bf16.msra.mxu1 %v9206_v18 }
0x1f5f   : > { %7185 = vmatprep.subr.bf16.mxu1 %v9337_v20  ;;  %7144 = vmatprep.subr.bf16.mxu0 %v9209_v15 }
0x1f62   : > { %7145 = vmatpush2.bf16.msra.mxu0 %v9207_v62  ;;  %7186 = vmatpush2.bf16.msra.mxu1 %v9210_v54  ;;  %v7219_v62 = vld [vmem:[%s11374_s1 + $0xe4] sm:$0xf] }
0x1f63   : > { %7187 = vmatprep.subr.bf16.mxu1 %v9337_v20  ;;  %7146 = vmatprep.subr.bf16.mxu0 %v9213_v14 }
0x1f66   : > { %7147 = vmatpush2.bf16.msra.mxu0 %v9211_v17  ;;  %7188 = vmatpush2.bf16.msra.mxu1 %v9214_v16 }
0x1f67   : > { %8758 = vmatprep.subr.bf16.mxu1 %v9344_v60 }
0x1fe9   : > { %v6676_v49 = vpop.f32.mrf.mxu0 }
0x1feb   : > { %v6678_v6 = vpop.f32.mrf.mxu0 }
0x1fed   : > { %v6680_v8 = vpop.f32.mrf.mxu0 }
0x1fef   : > { %v6681_v21 = vpop.f32.mrf.mxu0 }
0x1ff1   : > { %v6724_v55 = vpop.f32.mrf.mxu0 }
0x1ff2   : > { %v6725_v19 = vadd.f32 %v6724_v55, %v6676_v49 }
0x1ff3   : > { %v6726_v41 = vpop.f32.mrf.mxu0 }
0x1ff4   : > { %v6727_v31 = vadd.f32 %v6726_v41, %v6678_v6 }
0x1ff5   : > { %v6728_v43 = vpop.f32.mrf.mxu0 }
0x1ff7   : > { %v6729_v42 = vpop.f32.mrf.mxu0 }
0x1ff9   : > { %v6787_v47 = vpop.f32.mrf.mxu0  ;;  %v6852_v30 = vpop.f32.mrf.mxu1 }
0x1ffa   : > { %v6794_v10 = vadd.f32 %v6787_v47, %v6725_v19  ;;  %v7404_v19 = vld [vmem:[%s11374_s1 + $0xe8] sm:$0xf] }
0x1ffb   : > { %v6789_v24 = vpop.f32.mrf.mxu0  ;;  %v6854_v50 = vpop.f32.mrf.mxu1 }
0x1ffc   : > { %v6859_v53 = vadd.f32 %v6852_v30, %v6794_v10  ;;  %v6795_v25 = vadd.f32 %v6789_v24, %v6727_v31  ;;  %v7506_v10 = vld [vmem:[%s11374_s1 + $0xec] sm:$0xf] }
0x1ffd   : > { %v6791_v52 = vpop.f32.mrf.mxu0  ;;  %v6856_v58 = vpop.f32.mrf.mxu1 }
0x1ffe   : > { %v6867_v27 = vadd.f32 %v6865_v48, %v6859_v53  ;;  %v6860_v34 = vadd.f32 %v6854_v50, %v6795_v25 }
0x1fff   : > { %v6792_v29 = vpop.f32.mrf.mxu0  ;;  %v6857_v38 = vpop.f32.mrf.mxu1 }
0x2000   : > { %v6868_v33 = vadd.f32 %v6865_v48, %v6860_v34  ;;  %v6869_v7 = vmax.f32 %v6867_v27, 0.0 }
0x2002   : > { %v6870_v45 = vmax.f32 %v6868_v33, 0.0  ;;  %v6871_v46 = vpack.c.bf16 %v6869_v7, %v6869_v7 }
0x2004   : > { %v6872_v36 = vpack.c.bf16 %v6870_v45, %v6870_v45 }
0x2006   : > { %8479 = vmatprep.mubr.msk.bf16.mxu0 %vm5401_vm2, %v6872_v36  ;;  %8480 = vmatprep.mubr.msk.bf16.mxu1 %vm5401_vm2, %v6872_v36 }
0x2007   : > { %7149 = vmatmul.mubr.bf16.vlgmr.msra.gmra.mxu0 %v6871_v46  ;;  %7190 = vmatmul.mubr.bf16.vlgmr.msra.gmra.mxu1 %v6871_v46 }
0x2008   : > { %7271 = vmatprep.mubr.bf16.mxu0 %v9337_v20  ;;  %8760 = vmatprep.mubr.msk.bf16.mxu1 %vm9345_vm13, %v9344_v60 }
0x20c7   : > { %v7150_v11 = vpop.f32.mrf.mxu0  ;;  %v7191_v57 = vpop.f32.mrf.mxu1 }
0x20c8   : > { %v7197_v2 = vpack.c.bf16 %v10565_v63, %v7150_v11  ;;  %v7199_v28 = vpack.c.bf16 %v10577_v32, %v7191_v57 }
0x20c9   : > { %v7152_v5 = vpop.f32.mrf.mxu0  ;;  %v7193_v56 = vpop.f32.mrf.mxu1 }
0x20ca   : > { %v7198_v1 = vpack.c.bf16 %v10570_v26, %v7152_v5  ;;  %7203 = vrot.lane.b32.xlu1 %v7197_v2, %s9342_s11 }
0x20cb   : > { %v7154_v40 = vpop.f32.mrf.mxu0  ;;  %v7194_v4 = vpop.f32.mrf.mxu1 }
0x20cc   : > { %7205 = vrot.lane.b32.xlu0 %v7198_v1, %s9342_s11 }
0x20cd   : > { %v7155_v44 = vpop.f32.mrf.mxu0  ;;  %v7195_v13 = vpop.f32.mrf.mxu1 }
0x20ce   : > { %7207 = vrot.lane.b32.xlu1 %v7199_v28, %s9342_s11 }
0x213c   : > { %v7204_v35 = vpop.permute.xlu1 %7203 }
0x213d   : > { %v7214_v59 = vsel %vm1291_vm6, 0, %v7204_v35 }
0x213e   : > { %v7206_v23 = vpop.permute.xlu0 %7205 }
0x213f   : > { %v7209_v63 = vsel %vm1291_vm6, %v7204_v35, %v7206_v23 }
0x2140   : > { %7224 = vrot.lane.b32.xlu0 %v7209_v63, %s9338_s15  ;;  %v7208_v22 = vpop.permute.xlu1 %7207 }
0x2141   : > { %v7210_v26 = vsel %vm1291_vm6, %v7206_v23, %v7208_v22  ;;  %v7217_v32 = vsel %vm1291_vm6, %v7208_v22, 0 }
0x2142   : > { %7226 = vrot.lane.b32.xlu1 %v7210_v26, %s9338_s15 }
0x2144   : > { %7222 = vrot.lane.b32.xlu0 %v7214_v59, %s9338_s15 }
0x2146   : > { %7228 = vrot.lane.b32.xlu1 %v7217_v32, %s9338_s15 }
0x2148   : > { %7407 = vrot.lane.b32.xlu0 %v7209_v63, %s9339_s16 }
0x214a   : > { %7409 = vrot.lane.b32.xlu1 %v7210_v26, %s9339_s16 }
0x214c   : > { %7405 = vrot.lane.b32.xlu0 %v7214_v59, %s9339_s16 }
0x214e   : > { %7411 = vrot.lane.b32.xlu1 %v7217_v32, %s9339_s16 }
0x2150   : > { %7509 = vrot.lane.b32.xlu0 %v7209_v63, %s9340_s17 }
0x2152   : > { %7511 = vrot.lane.b32.xlu1 %v7210_v26, %s9340_s17 }
0x2154   : > { %7507 = vrot.lane.b32.xlu0 %v7214_v59, %s9340_s17 }
0x2156   : > { %7513 = vrot.lane.b32.xlu1 %v7217_v32, %s9340_s17 }
0x2158   : > { %7611 = vperm.xlu0 %8859, %v7608_v12  }
0x21b2   : > { %v7225_v39 = vpop.permute.xlu0 %7224 }
0x21b4   : > { %v7227_v51 = vpop.permute.xlu1 %7226 }
0x21b5   : > { %v7231_v37 = vsel %vm438_vm1, %v7225_v39, %v7227_v51 }
0x21b6   : > { %v7223_v61 = vpop.permute.xlu0 %7222  ;;  %7253 = vmatprep.subr.bf16.mxu0 %v7231_v37 }
0x21b7   : > { %v7230_v18 = vsel %vm438_vm1, %v7223_v61, %v7225_v39 }
0x21b8   : > { %7254 = vmatpush1.bf16.msra.mxu0 %v7230_v18  ;;  %v7229_v15 = vpop.permute.xlu1 %7228 }
0x21b9   : > { %v7232_v54 = vsel %vm438_vm1, %v7227_v51, %v7229_v15  ;;  %7337 = vmatprep.subr.bf16.mxu0 %v7209_v63 }
0x21ba   : > { %v7408_v14 = vpop.permute.xlu0 %7407  ;;  %8759 = vmatpush3.bf16.msra.mxu1 %v7232_v54 }
0x21bb   : > { %8481 = vmatmul.mubr.msk.bf16.vlgmr.msra.gmra.mxu0 %vm5975_vm8, %v7219_v62  ;;  %8764 = vmatprep.subr.bf16.mxu1 %v9344_v60 }
0x21bc   : > { %8484 = vmatpush1.bf16.msk.msra.mxu0 %vm11191_vm14, %v7204_v35  ;;  %v7410_v17 = vpop.permute.xlu1 %7409  ;;  %7355 = vmatprep.mubr.bf16.mxu0 %v9337_v20 }
0x21bd   : > { %8761 = vmatmul.mubr.msk.bf16.vlgmr.msra.gmra.mxu1 %vm5975_vm8, %v7219_v62  ;;  %v7414_v16 = vsel %vm748_vm3, %v7408_v14, %v7410_v17 }
0x21be   : > { %v7406_v49 = vpop.permute.xlu0 %7405  ;;  %8765 = vmatpush3.bf16.msra.mxu1 %v7210_v26  ;;  %7436 = vmatprep.subr.bf16.mxu0 %v7414_v16 }
0x21bf   : > { %8766 = vmatprep.mubr.msk.bf16.mxu1 %vm9345_vm13, %v9344_v60  ;;  %8770 = vmatprep.subr.bf16.mxu1 %v9344_v60  ;;  %v7413_v21 = vsel %vm748_vm3, %v7406_v49, %v7408_v14 }
0x21c0   : > { %v7412_v6 = vpop.permute.xlu1 %7411 }
0x21c1   : > { %v7415_v41 = vsel %vm748_vm3, %v7410_v17, %v7412_v6 }
0x21c2   : > { %v7510_v8 = vpop.permute.xlu0 %7509 }
0x21c3   : > { %8485 = vmatmul.mubr.msk.bf16.vlgmr.msra.gmra.mxu0 %vm5975_vm8, %v7218_v9 }
0x21c4   : > { %7437 = vmatpush1.bf16.msra.mxu0 %v7413_v21  ;;  %v7512_v55 = vpop.permute.xlu1 %7511  ;;  %7454 = vmatprep.mubr.bf16.mxu0 %v9337_v20 }
0x21c5   : > { %8767 = vmatmul.mubr.msk.bf16.vlgmr.msra.gmra.mxu1 %vm5975_vm8, %v7218_v9  ;;  %v7516_v43 = vsel %vm920_vm4, %v7510_v8, %v7512_v55 }
0x21c6   : > { %8771 = vmatpush3.bf16.msra.mxu1 %v7415_v41  ;;  %7538 = vmatprep.subr.bf16.mxu0 %v7516_v43  ;;  %v7508_v42 = vpop.permute.xlu0 %7507 }
0x21c7   : > { %8772 = vmatprep.mubr.msk.bf16.mxu1 %vm9345_vm13, %v9344_v60  ;;  %8776 = vmatprep.subr.bf16.mxu1 %v9344_v60  ;;  %v7515_v30 = vsel %vm920_vm4, %v7508_v42, %v7510_v8 }
0x21c8   : > { %v7514_v47 = vpop.permute.xlu1 %7513 }
0x21c9   : > { %v7517_v31 = vsel %vm920_vm4, %v7512_v55, %v7514_v47 }
0x21cb   : > { %8487 = vmatmul.mubr.msk.bf16.vlgmr.msra.gmra.mxu0 %vm5975_vm8, %v7404_v19 }
0x21cc   : > { %7539 = vmatpush1.bf16.msra.mxu0 %v7515_v30  ;;  %7556 = vmatprep.mubr.bf16.mxu0 %v9337_v20 }
0x21cd   : > { %8773 = vmatmul.mubr.msk.bf16.vlgmr.msra.gmra.mxu1 %vm5975_vm8, %v7404_v19 }
0x21ce   : > { %8777 = vmatpush3.bf16.msra.mxu1 %v7517_v31  ;;  %8778 = vmatprep.mubr.msk.bf16.mxu1 %vm9345_vm13, %v9344_v60  ;;  %v7946_v31 = vld [vmem:[%s11375_s2 + $0xb0] sm:$0x1] }
0x21cf   : > { %8782 = vmatprep.subr.bf16.mxu1 %v9344_v60 }
0x21d3   : > { %8489 = vmatmul.mubr.msk.bf16.vlgmr.msra.gmra.mxu0 %vm5975_vm8, %v7506_v10  ;;  %v7612_v63 = vpop.permute.xlu0 %7611 }
0x21d4   : > { %7697 = vmatprep.mubr.bf16.mxu0 %v9337_v20 }
0x21d5   : > { %8779 = vmatmul.mubr.msk.bf16.vlgmr.msra.gmra.mxu1 %vm5975_vm8, %v7506_v10 }
0x21d6   : > { %8784 = vmatprep.mubr.msk.bf16.mxu1 %vm9345_vm13, %v9344_v60 }
0x227b   : > { %v7273_v24 = vpop.f32.mrf.mxu0 }
0x227d   : > { %v7275_v50 = vpop.f32.mrf.mxu0  ;;  %v7314_v48 = vpop.f32.mrf.mxu1 }
0x227f   : > { %v7277_v53 = vpop.f32.mrf.mxu0  ;;  %v8762_v25 = vpop.f32.mrf.mxu1 }
0x2281   : > { %v7278_v52 = vpop.f32.mrf.mxu0  ;;  %v7317_v58 = vpop.f32.mrf.mxu1 }
0x2283   : > { %v8763_v27 = vpop.f32.mrf.mxu1  ;;  %v7357_v34 = vpop.f32.mrf.mxu0 }
0x2284   : > { %v7358_v1 = vadd.f32 %v7357_v34, %v7273_v24  ;;  %v7639_v27 = vld [vmem:[%s11374_s1 + $0xf4] sm:$0x1] }
0x2285   : > { %v7359_v29 = vpop.f32.mrf.mxu0  ;;  %v7398_v38 = vpop.f32.mrf.mxu1 }
0x2286   : > { %v7360_v28 = vadd.f32 %v7359_v29, %v7275_v50  ;;  %v7399_v44 = vadd.f32 %v7398_v38, %v7314_v48 }
0x2287   : > { %v7361_v33 = vpop.f32.mrf.mxu0  ;;  %v8768_v7 = vpop.f32.mrf.mxu1 }
0x2289   : > { %v7362_v45 = vpop.f32.mrf.mxu0  ;;  %v7401_v36 = vpop.f32.mrf.mxu1 }
0x228b   : > { %v8769_v46 = vpop.f32.mrf.mxu1  ;;  %v7456_v11 = vpop.f32.mrf.mxu0 }
0x228c   : > { %v7503_v13 = vadd.f32 %v7456_v11, %v7358_v1  ;;  %v7838_v1 = vld [vmem:[%s11374_s1 + $0xf8] sm:$0x1] }
0x228d   : > { %v7458_v57 = vpop.f32.mrf.mxu0  ;;  %v7497_v2 = vpop.f32.mrf.mxu1 }
0x228e   : > { %v7504_v22 = vadd.f32 %v7458_v57, %v7360_v28  ;;  %v7505_v26 = vadd.f32 %v7497_v2, %v7399_v44  ;;  %v7638_v57 = vld [vmem:[%s11374_s1 + $0xf0] sm:$0x1] }
0x228f   : > { %v7460_v5 = vpop.f32.mrf.mxu0  ;;  %v8774_v56 = vpop.f32.mrf.mxu1 }
0x2291   : > { %v7461_v40 = vpop.f32.mrf.mxu0  ;;  %v7500_v4 = vpop.f32.mrf.mxu1 }
0x2293   : > { %v8775_v35 = vpop.f32.mrf.mxu1  ;;  %v7558_v23 = vpop.f32.mrf.mxu0 }
0x2294   : > { %v7605_v59 = vadd.f32 %v7558_v23, %v7503_v13 }
0x2295   : > { %v7560_v32 = vpop.f32.mrf.mxu0  ;;  %v7599_v12 = vpop.f32.mrf.mxu1 }
0x2296   : > { %v7614_v39 = vadd.f32 %v7612_v63, %v7605_v59  ;;  %v7606_v51 = vadd.f32 %v7560_v32, %v7504_v22  ;;  %v7607_v37 = vadd.f32 %v7599_v12, %v7505_v26  ;;  %v9346_v32 = vmov 1966171168  }
0x2297   : > { %v7562_v61 = vpop.f32.mrf.mxu0  ;;  %v8780_v18 = vpop.f32.mrf.mxu1  ;;  %v7960_v12 = vunpack.c.l.s4 %v9346_v32 }
0x2298   : > { %v7617_v15 = vmax.f32 %v7614_v39, 0.0  ;;  %v7615_v62 = vadd.f32 %v7612_v63, %v7606_v51  ;;  %v7616_v54 = vadd.f32 %v7612_v63, %v7607_v37 }
0x2299   : > { %v7563_v14 = vpop.f32.mrf.mxu0  ;;  %v7602_v17 = vpop.f32.mrf.mxu1 }
0x229a   : > { %v7620_v16 = vpack.c.bf16 %v7617_v15, %v7617_v15  ;;  %v7618_v49 = vmax.f32 %v7615_v62, 0.0  ;;  %v7619_v6 = vmax.f32 %v7616_v54, 0.0  ;;  %v7961_v14 = vunpack.c.0.s8 %v7960_v12 }
0x229b   : > { %v8781_v9 = vpop.f32.mrf.mxu1 }
0x229c   : > { %v7621_v8 = vpack.c.bf16 %v7618_v49, %v7618_v49  ;;  %7626 = vrot.lane.b32.xlu1 %v7620_v16, %s9342_s11  ;;  %v7622_v21 = vpack.c.bf16 %v7619_v6, %v7619_v6 }
0x229e   : > { %7628 = vrot.lane.b32.xlu0 %v7621_v8, %s9342_s11 }
0x22a0   : > { %7630 = vrot.lane.b32.xlu1 %v7622_v21, %s9342_s11 }
0x230e   : > { %v7627_v55 = vpop.permute.xlu1 %7626 }
0x230f   : > { %v7635_v41 = vsel %vm1291_vm6, 0, %v7627_v55 }
0x2310   : > { %v7629_v43 = vpop.permute.xlu0 %7628  ;;  %7642 = vrot.lane.b32.xlu0 %v7635_v41, %s9338_s15  ;;  %v7749_v33 = vsel %vm3364_vm11, %v7635_v41, 0 }
0x2311   : > { %v7632_v42 = vsel %vm1291_vm6, %v7627_v55, %v7629_v43 }
0x2312   : > { %7644 = vrot.lane.b32.xlu1 %v7632_v42, %s9338_s15  ;;  %v7631_v19 = vpop.permute.xlu1 %7630 }
0x2313   : > { %v7633_v47 = vsel %vm1291_vm6, %v7629_v43, %v7631_v19  ;;  %v7637_v30 = vsel %vm1291_vm6, %v7631_v19, 0  ;;  %v7964_v43 = vsub.s32 %v7961_v14, %v9466_v3 }
0x2314   : > { %7646 = vrot.lane.b32.xlu0 %v7633_v47, %s9338_s15  ;;  %v7755_v45 = vsel %vm3364_vm11, %v7633_v47, 0 }
0x2316   : > { %7648 = vrot.lane.b32.xlu1 %v7637_v30, %s9338_s15 }
0x2318   : > { %7839 = vrot.lane.b32.xlu0 %v7635_v41, %s9339_s16 }
0x231a   : > { %7841 = vrot.lane.b32.xlu1 %v7632_v42, %s9339_s16 }
0x231c   : > { %7843 = vrot.lane.b32.xlu0 %v7633_v47, %s9339_s16 }
0x231e   : > { %7845 = vrot.lane.b32.xlu1 %v7637_v30, %s9339_s16 }
0x2320   : > { %7949 = vperm.xlu0 %8859, %v7946_v31  }
0x2382   : > { %v7643_v10 = vpop.permute.xlu0 %7642 }
0x2384   : > { %v7645_v24 = vpop.permute.xlu1 %7644 }
0x2385   : > { %v7650_v50 = vsel %vm438_vm1, %v7643_v10, %v7645_v24 }
0x2386   : > { %v7647_v48 = vpop.permute.xlu0 %7646  ;;  %v7657_v25 = vsel %vm3364_vm11, %v7650_v50, 0 }
0x2387   : > { %v7651_v53 = vsel %vm438_vm1, %v7645_v24, %v7647_v48 }
0x2388   : > { %8491 = vmatprep.subr.msk.bf16.mxu0 %vm3364_vm11, %v7651_v53  ;;  %v7649_v52 = vpop.permute.xlu1 %7648 }
0x2389   : > { %v7652_v58 = vsel %vm438_vm1, %v7647_v48, %v7649_v52  ;;  %7680 = vmatpush1.bf16.msra.mxu0 %v7657_v25  ;;  %vm7984_vm1 = vcmp.lt.s32.totalorder %v357_v0, 384 }
0x238a   : > { %v7663_v34 = vsel %vm3364_vm11, %v7652_v58, 0  ;;  %v7840_v29 = vpop.permute.xlu0 %7839  ;;  %8494 = vmatprep.subr.msk.bf16.mxu0 %vm3364_vm11, %v7632_v42 }
0x238b   : > { %8783 = vmatpush3.bf16.msra.mxu1 %v7663_v34 }
0x238c   : > { %8492 = vmatmul.mubr.msk.bf16.vlgmr.msra.gmra.mxu0 %vm3360_vm12, %v7639_v27  ;;  %v7842_v38 = vpop.permute.xlu1 %7841  ;;  %8788 = vmatprep.subr.bf16.mxu1 %v9344_v60 }
0x238d   : > { %7772 = vmatpush1.bf16.msra.mxu0 %v7749_v33  ;;  %7789 = vmatprep.mubr.bf16.mxu0 %v9337_v20  ;;  %v7847_v11 = vsel %vm748_vm3, %v7840_v29, %v7842_v38 }
0x238e   : > { %v7844_v7 = vpop.permute.xlu0 %7843  ;;  %8785 = vmatmul.mubr.msk.bf16.vlgmr.msra.gmra.mxu1 %vm3360_vm12, %v7639_v27  ;;  %v7854_v5 = vsel %vm3364_vm11, %v7847_v11, 0 }
0x238f   : > { %v7848_v36 = vsel %vm748_vm3, %v7842_v38, %v7844_v7  ;;  %8789 = vmatpush3.bf16.msra.mxu1 %v7755_v45  ;;  %8790 = vmatprep.mubr.msk.bf16.mxu1 %vm9345_vm13, %v9344_v60 }
0x2390   : > { %8497 = vmatprep.subr.msk.bf16.mxu0 %vm3364_vm11, %v7848_v36  ;;  %v7846_v46 = vpop.permute.xlu1 %7845  ;;  %8794 = vmatprep.subr.bf16.mxu1 %v9344_v60 }
0x2391   : > { %v7849_v2 = vsel %vm748_vm3, %v7844_v7, %v7846_v46 }
0x2392   : > { %v7860_v56 = vsel %vm3364_vm11, %v7849_v2, 0 }
0x2394   : > { %8495 = vmatmul.mubr.msk.bf16.vlgmr.msra.gmra.mxu0 %vm3360_vm12, %v7638_v57 }
0x2395   : > { %7877 = vmatpush1.bf16.msra.mxu0 %v7854_v5  ;;  %7894 = vmatprep.mubr.bf16.mxu0 %v9337_v20 }
0x2396   : > { %8791 = vmatmul.mubr.msk.bf16.vlgmr.msra.gmra.mxu1 %vm3360_vm12, %v7638_v57 }
0x2397   : > { %8795 = vmatpush3.bf16.msra.mxu1 %v7860_v56  ;;  %8796 = vmatprep.mubr.msk.bf16.mxu1 %vm9345_vm13, %v9344_v60 }
0x239b   : > { %v7950_v49 = vpop.permute.xlu0 %7949 }
0x239c   : > { %8498 = vmatmul.mubr.msk.bf16.vlgmr.msra.gmra.mxu0 %vm3360_vm12, %v7838_v1 }
0x239e   : > { %8797 = vmatmul.mubr.msk.bf16.vlgmr.msra.gmra.mxu1 %vm3360_vm12, %v7838_v1 }
0x244c   : > { %v7699_v40 = vpop.f32.mrf.mxu0 }
0x244e   : > { %v7701_v4 = vpop.f32.mrf.mxu0  ;;  %v7740_v28 = vpop.f32.mrf.mxu1 }
0x2450   : > { %v7703_v20 = vpop.f32.mrf.mxu0  ;;  %v8786_v44 = vpop.f32.mrf.mxu1 }
0x2452   : > { %v7704_v13 = vpop.f32.mrf.mxu0  ;;  %v7743_v35 = vpop.f32.mrf.mxu1 }
0x2454   : > { %v8787_v23 = vpop.f32.mrf.mxu1  ;;  %v7791_v63 = vpop.f32.mrf.mxu0 }
0x2455   : > { %v7792_v37 = vadd.f32 %v7791_v63, %v7699_v40 }
0x2456   : > { %v7793_v22 = vpop.f32.mrf.mxu0  ;;  %v7832_v26 = vpop.f32.mrf.mxu1 }
0x2457   : > { %v7794_v15 = vadd.f32 %v7793_v22, %v7701_v4  ;;  %v7833_v62 = vadd.f32 %v7832_v26, %v7740_v28 }
0x2458   : > { %v7795_v60 = vpop.f32.mrf.mxu0  ;;  %v8792_v59 = vpop.f32.mrf.mxu1 }
0x245a   : > { %v7796_v39 = vpop.f32.mrf.mxu0  ;;  %v7835_v51 = vpop.f32.mrf.mxu1 }
0x245c   : > { %v8793_v61 = vpop.f32.mrf.mxu1  ;;  %v7896_v18 = vpop.f32.mrf.mxu0 }
0x245d   : > { %v7943_v54 = vadd.f32 %v7896_v18, %v7792_v37 }
0x245e   : > { %v7898_v17 = vpop.f32.mrf.mxu0  ;;  %v7937_v16 = vpop.f32.mrf.mxu1 }
0x245f   : > { %v7944_v6 = vadd.f32 %v7898_v17, %v7794_v15  ;;  %v7945_v9 = vadd.f32 %v7937_v16, %v7833_v62  ;;  %v7952_v55 = vadd.f32 %v7950_v49, %v7943_v54 }
0x2460   : > { %v7900_v8 = vpop.f32.mrf.mxu0  ;;  %v8798_v21 = vpop.f32.mrf.mxu1 }
0x2461   : > { %v7953_v41 = vadd.f32 %v7950_v49, %v7944_v6  ;;  %v7954_v42 = vadd.f32 %v7950_v49, %v7945_v9 }
0x2462   : > { %v7901_v19 = vpop.f32.mrf.mxu0  ;;  %v7940_v47 = vpop.f32.mrf.mxu1 }
0x2463   : > { %v7958_v30 = vcombine.low %v7952_v55, %v7953_v41  ;;  %v7972_v24 = vrot.slane %v7954_v42, %v7964_v43 }
0x2464   : > { %v8799_v31 = vpop.f32.mrf.mxu1 }
0x2465   : > { %v7965_v10 = vrot.slane %v7958_v30, %v7964_v43 }
0x2467   : > { %v7973_v50 = vcombine.low %v7965_v10, %v7972_v24 }
0x2469   : > { %v7980_v48 = vrot.slane %v7973_v50, %v7964_v43 }
0x246b   : > { %7986 = vst.msk [vmem:[%s347_s24] sm:$0x7] %vm7984_vm1, %v7980_v48 }
0x246c PF: > { %s20_s27 = sadd.s32 1, %s9324_s27  }
0x246d   : > { %p17_p2 = scmp.ge.s32.totalorder %s20_s27, 4  }
0x246f   :  { %19 = sbr.rel (!%p17_p2) target bundleno = 2 (0x2), region = 95 }
0x2474   :  { %8006 = vsyncpa [#allocation3], 1 }
0x2475   :  { %8008 = vsyncpa [#allocation3 + $0x1], 1 }
0x2476   :  { %8009 = vsyncpa [#allocation5], 1 }

</bundles_post_ra>
